<compile_context>
chip_gen: v6e
topology: v6e:2x2x1
jax: 0.10.0
libtpu: 0.0.40
codegen_flags: <defaults>
</compile_context>

<pallas_src>
import math
from functools import partial

import jax
import jax.numpy as jnp
from jax import lax
from jax.experimental import pallas as pl
from jax.experimental.pallas import tpu as pltpu

# ----------------------------- hyper-parameters (HLA_pep branch: L_pep + L_hla == 49) ------------
D_MODEL = 32
D_HEAD = 8
N_HEADS = 2          # must equal BATCH (reference broadcasting semantics)
SIGMA = 1.0
WINDOW_THRESHOLD = '1'
D_FF = 64
L_PEP = 15
L_HLA = 34
BATCH = 2

if WINDOW_THRESHOLD == '3':
    WINDOW_T = 0.01
elif WINDOW_THRESHOLD == '2':
    WINDOW_T = math.exp(-4 / 2)
elif WINDOW_THRESHOLD == '4':
    WINDOW_T = math.exp(-16 / 2)
else:
    WINDOW_T = math.exp(-1 / 2)

NEG_INF = float('-inf')


# ----------------------------- small in-kernel helpers -------------------------------------------
def _layer_norm(x):
    # fresh nn.LayerNorm(d_model): gamma=1, beta=0, eps=1e-5, biased variance
    mu = jnp.mean(x, axis=-1, keepdims=True)
    xc = x - mu
    var = jnp.mean(xc * xc, axis=-1, keepdims=True)
    return xc * lax.rsqrt(var + 1e-5)


def _softmax_lastdim(x):
    # softmax over the last axis; rows that are entirely -inf become all-zero rows
    # (equivalent to the reference's NaN -> 0 mapping).  Keep the -1e30 clamp: it is what
    # makes exp(-inf - m) collapse to 0 for fully masked rows.
    m = jnp.maximum(jnp.max(x, axis=-1, keepdims=True), -1e30)
    e = jnp.exp(x - m)
    denom = jnp.sum(e, axis=-1, keepdims=True)
    inv = pl.reciprocal(jnp.where(denom > 0.0, denom, 1.0), approx=True)
    return e * inv


# ----------------------------- fused whole-layer kernel ------------------------------------------
def _intercoder_kernel(pep_ref, hla_ref, bias_ref, qp0_ref, wproj_ref, fc_ref,
                       ffn1_ref, ffn2_ref,
                       pep_out_ref, hla_out_ref, attn_ref,
                       *, H, d, dm, dff, Lq, Lk, sigma, window_t):
    f32 = jnp.float32
    pep = pep_ref[0]                                   # (Lq, dm)
    hla = hla_ref[0]                                   # (Lk, dm)

    bias = bias_ref[0]                                 # (Lq, 3*Lk) packed additive 0/-inf masks
    bias_q = bias[:, 0:Lk]                             # pep->hla : pep_attn_mask | amino < 1
    bias_vt = bias[:, Lk:2 * Lk]                       # (hla->pep)^T : hla_attn_mask^T | amino < 1
    bias_f = bias[:, 2 * Lk:3 * Lk]                    # amino < 1 only

    wproj = wproj_ref[...]                             # (H, dm, 6d) = [pep: Q*s|Kv|Vv , hla: K|V|Qv*s]
    w_pep = wproj[:, :, 0:3 * d]
    w_hla = wproj[:, :, 3 * d:6 * d]

    # per-head fused projections (1/sqrt(d) already folded into the Q / Q_v weight columns)
    pep_h = jnp.broadcast_to(pep[None], (H, Lq, dm))
    hla_h = jnp.broadcast_to(hla[None], (H, Lk, dm))
    proj_p = jnp.einsum('hld,hdo->hlo', pep_h, w_pep, preferred_element_type=f32)   # (H, Lq, 3d)
    proj_h = jnp.einsum('hld,hdo->hlo', hla_h, w_hla, preferred_element_type=f32)   # (H, Lk, 3d)
    q_p = proj_p[:, :, 0:d]
    k_v = proj_p[:, :, d:2 * d]
    v_v = proj_p[:, :, 2 * d:3 * d]
    k_p = proj_h[:, :, 0:d]
    v_p = proj_h[:, :, d:2 * d]
    q_v = proj_h[:, :, 2 * d:3 * d]

    scores = jnp.einsum('hqd,hkd->hqk', q_p, k_p, preferred_element_type=f32)       # (H, Lq, Lk)
    scores_vt = jnp.einsum('hqd,hkd->hqk', k_v, q_v, preferred_element_type=f32)    # (H, Lq, Lk) == scores_v^T

    sm = scores + bias_q          # amino_attn
    smvt = scores_vt + bias_vt    # amino_attn_v, transposed to (pep, hla) layout
    smf = scores + bias_f         # full_amino_attn (amino<1 only)

    # ---- compile-time position / segment tables rebuilt from iota (no DMA, no constants) --------
    col = lax.broadcasted_iota(jnp.int32, (1, Lk), 1)
    kperm = jnp.where(col < 4, col + 14,
                      jnp.where(col < 18, col - 4, col)).astype(f32)                # key pos per column
    oh1 = ((col >= 4) & (col < 18)).astype(f32)
    oh2 = ((col < 4) | ((col >= 18) & (col < 24))).astype(f32)
    oh3 = (col >= 24).astype(f32)

    # reduction matrix RED (Lk, 8): e @ RED -> per-segment sums and position-weighted sums
    rrow = lax.broadcasted_iota(jnp.int32, (Lk, 8), 0)
    rcol = lax.broadcasted_iota(jnp.int32, (Lk, 8), 1)
    rkp = jnp.where(rrow < 4, rrow + 14,
                    jnp.where(rrow < 18, rrow - 4, rrow)).astype(f32)
    rseg = jnp.where(rrow < 4, 2, jnp.where(rrow < 18, 1, jnp.where(rrow < 24, 2, 3)))
    tgt = jnp.where((rcol == 0) | (rcol == 3), 1,
                    jnp.where((rcol == 1) | (rcol == 4), 2,
                              jnp.where((rcol == 2) | (rcol == 5), 3, 0)))
    rsel = (rseg == tgt).astype(f32)
    red = jnp.where(rcol < 3, rsel, rsel * rkp)                                      # cols 6,7 are 0
    red_h = jnp.broadcast_to(red[None], (H, Lk, 8))

    inv_2s2 = 1.0 / (2.0 * sigma * sigma)

    def space_from(qp):        # qp: (H, Lq, 3) per-segment query positions
        qsel = qp[:, :, 0:1] * oh1 + qp[:, :, 1:2] * oh2 + qp[:, :, 2:3] * oh3
        diff = qsel - kperm
        return jnp.exp(-(diff * diff) * inv_2s2)                                     # (H, Lq, Lk)

    qp = qp0_ref[...]          # (H, Lq, 3) initial positions (head-indexed, same for every b)
    space = space_from(qp)

    # two rounds of sliding-window position refinement:
    # one shared exp + one head-batched MXU matmul per round replaces 3 per-segment softmaxes.
    for _ in range(2):
        base = jnp.where(space < window_t, NEG_INF, sm)
        m = jnp.maximum(jnp.max(base, axis=-1, keepdims=True), -1e30)
        e = jnp.exp(base - m)                                                        # masked cols -> 0
        sums = jnp.einsum('hqk,hkc->hqc', e, red_h, preferred_element_type=f32)      # (H, Lq, 8)
        s = sums[:, :, 0:3]
        w = sums[:, :, 3:6]
        cand = w * pl.reciprocal(jnp.where(s > 0.0, s, 1.0), approx=True)
        qp = jnp.where(s > 0.0, cand, qp)          # empty windows keep the previous position
        space = space_from(qp)

    attn = _softmax_lastdim(sm + space)                       # (H, Lq, Lk)  pep -> hla
    y_nat = jnp.swapaxes(smvt + space, 1, 2)                  # (H, Lk, Lq)
    attn_v = _softmax_lastdim(y_nat)                          # (H, Lk, Lq)  hla -> pep
    full = smf + space                                        # unmasked scores + space (keeps -inf)

    # attn rows are either a proper softmax (sum==1) or all-zero, so the reference's
    # `+ (1 - attn.sum())*Q` followed by `* attn.sum()` collapses to a plain attn @ V
    # (fully-masked rows give 0 in both formulations).
    ctx_p = jnp.einsum('hqk,hkd->hqd', attn, v_p, preferred_element_type=f32)        # (H, Lq, d)
    ctx_v = jnp.einsum('hkq,hqd->hkd', attn_v, v_v, preferred_element_type=f32)      # (H, Lk, d)

    # fc / fc_v as per-head blocks: concat-over-heads @ fc  ==  sum_h ctx[h] @ fc[h]
    fcw = fc_ref[...]                                          # (H, d, 2*dm) = [fc | fc_v]
    fc_p = fcw[:, :, 0:dm]
    fc_v = fcw[:, :, dm:2 * dm]
    out_p = jnp.sum(jnp.einsum('hqd,hdm->hqm', ctx_p, fc_p, preferred_element_type=f32), axis=0)
    out_v = jnp.sum(jnp.einsum('hkd,hdm->hkm', ctx_v, fc_v, preferred_element_type=f32), axis=0)

    pep_y = _layer_norm(out_p + pep)                           # (Lq, dm)
    hla_y = _layer_norm(out_v + hla)                           # (Lk, dm)

    # TODO(synk): PoswiseFeedForwardNet definition was not included in the prompt; implemented as
    # Linear(d_model,d_ff,bias=False) -> ReLU -> Linear(d_ff,d_model,bias=False) + residual + LN.
    w1 = ffn1_ref[...]                                         # (dm, 2*dff) = [pep_w1 | hla_w1]
    w2 = ffn2_ref[...]                                         # (dff, 2*dm) = [pep_w2 | hla_w2]
    h_p = jnp.maximum(jnp.dot(pep_y, w1[:, 0:dff], preferred_element_type=f32), 0.0)
    h_h = jnp.maximum(jnp.dot(hla_y, w1[:, dff:2 * dff], preferred_element_type=f32), 0.0)
    pep_f = _layer_norm(jnp.dot(h_p, w2[:, 0:dm], preferred_element_type=f32) + pep_y)
    hla_f = _layer_norm(jnp.dot(h_h, w2[:, dm:2 * dm], preferred_element_type=f32) + hla_y)

    pep_out_ref[0] = pep_f
    hla_out_ref[0] = hla_f
    # single lane-dense attention slab: [attn | full | attn_v^T]
    attn_ref[0] = jnp.concatenate([attn, full, jnp.swapaxes(attn_v, 1, 2)], axis=-1)


# ----------------------------- host-side glue -----------------------------------------------------
def _split_heads_w(w, scale=1.0):
    """(d_model, H*d) head-major columns -> (H, d_model, d), optionally pre-scaled."""
    return (w.reshape(D_MODEL, N_HEADS, D_HEAD) * scale).transpose(1, 0, 2)


def init_positions_hla_pep(len_q):
    """DualInterAttention.initial_position for name == 'HLA_pep'.

    Reference position tensors are (1, B, 15) broadcast against (B, H, ...) attention tensors,
    pairing their dim-1 with the *head* dim (requires B == n_heads).  Returns (H, 15, 3)."""
    lq = len_q[:, None] - 1.0
    ar = jnp.arange(L_PEP, dtype=jnp.float32)[None, :]
    q1 = 13.0 * (ar / lq)
    q1 = jnp.where(q1 > 13.0, 10000.0, q1)
    q2 = 9.0 * (ar / lq) + 14.0
    q2 = jnp.where(q2 > 23.0, 10000.0, q2)
    q3 = 9.0 - 9.0 * (ar / lq) + 24.0
    q3 = jnp.where(q3 < 24.0, 10000.0, q3)
    return jnp.stack([q1, q2, q3], axis=-1)


def intercoder_layer_forward(params, pep, hla, pep_attn_mask, hla_attn_mask, amino_mask,
                             len_q, len_k):
    del len_k   # only used in the 'HLApep_TCR' branch of the reference
    B, Lq, dm = pep.shape
    Lk = hla.shape[1]
    H, d = N_HEADS, D_HEAD
    assert B == H, "reference broadcasting semantics require batch == n_heads"
    assert Lq == L_PEP and Lk == L_HLA, "this kernel implements the HLA_pep branch"
    scale = 1.0 / math.sqrt(d)

    # fused per-head projection weights: pep side [Q*scale | K_v | V_v], hla side [K | V | Q_v*scale]
    w_pep_h = jnp.concatenate([_split_heads_w(params['W_Q'], scale),
                               _split_heads_w(params['W_K_v']),
                               _split_heads_w(params['W_V_v'])], axis=-1)            # (H, dm, 3d)
    w_hla_h = jnp.concatenate([_split_heads_w(params['W_K']),
                               _split_heads_w(params['W_V']),
                               _split_heads_w(params['W_Q_v'], scale)], axis=-1)     # (H, dm, 3d)
    w_proj = jnp.concatenate([w_pep_h, w_hla_h], axis=-1)                            # (H, dm, 6d)

    fc_pack = jnp.concatenate([params['fc'].reshape(H, d, dm),
                               params['fc_v'].reshape(H, d, dm)], axis=-1)           # (H, d, 2dm)
    ffn1_pack = jnp.concatenate([params['pep_ffn_w1'], params['hla_ffn_w1']], axis=-1)   # (dm, 2dff)
    ffn2_pack = jnp.concatenate([params['pep_ffn_w2'], params['hla_ffn_w2']], axis=-1)   # (dff, 2dm)

    # additive 0 / -inf attention biases packed into one lane-dense slab (B, Lq, 3*Lk)
    amino_lt1 = amino_mask < 1.0
    bias_q = jnp.where(pep_attn_mask.astype(bool) | amino_lt1, NEG_INF, 0.0).astype(jnp.float32)
    bias_vt = jnp.where(jnp.swapaxes(hla_attn_mask.astype(bool), 1, 2) | amino_lt1,
                        NEG_INF, 0.0).astype(jnp.float32)
    bias_f = jnp.where(amino_lt1, NEG_INF, 0.0).astype(jnp.float32)
    bias_pack = jnp.concatenate([bias_q, bias_vt, bias_f], axis=-1)                  # (B, Lq, 3Lk)

    qp0 = init_positions_hla_pep(len_q.astype(jnp.float32))                          # (H, Lq, 3)

    kernel = partial(_intercoder_kernel, H=H, d=d, dm=dm, dff=D_FF,
                     Lq=Lq, Lk=Lk, sigma=SIGMA, window_t=WINDOW_T)

    grid_spec = pltpu.PrefetchScalarGridSpec(
        num_scalar_prefetch=0,
        grid=(B,),
        in_specs=[
            pl.BlockSpec((1, Lq, dm), lambda b: (b, 0, 0)),            # pep
            pl.BlockSpec((1, Lk, dm), lambda b: (b, 0, 0)),            # hla
            pl.BlockSpec((1, Lq, 3 * Lk), lambda b: (b, 0, 0)),        # packed biases
            pl.BlockSpec((H, Lq, 3), lambda b: (0, 0, 0)),             # initial positions
            pl.BlockSpec((H, dm, 6 * d), lambda b: (0, 0, 0)),         # fused projection weights
            pl.BlockSpec((H, d, 2 * dm), lambda b: (0, 0, 0)),         # fc | fc_v
            pl.BlockSpec((dm, 2 * D_FF), lambda b: (0, 0)),            # FFN w1 pack
            pl.BlockSpec((D_FF, 2 * dm), lambda b: (0, 0)),            # FFN w2 pack
        ],
        out_specs=[
            pl.BlockSpec((1, Lq, dm), lambda b: (b, 0, 0)),            # pep outputs
            pl.BlockSpec((1, Lk, dm), lambda b: (b, 0, 0)),            # hla outputs
            pl.BlockSpec((1, H, Lq, 3 * Lk), lambda b: (b, 0, 0, 0)),  # attn | full | attn_v^T
        ],
    )
    out_shapes = (
        jax.ShapeDtypeStruct((B, Lq, dm), jnp.float32),
        jax.ShapeDtypeStruct((B, Lk, dm), jnp.float32),
        jax.ShapeDtypeStruct((B, H, Lq, 3 * Lk), jnp.float32),
    )

    pep_out, hla_out, attn_slab = pl.pallas_call(
        kernel,
        grid_spec=grid_spec,
        out_shape=out_shapes,
        compiler_params=pltpu.CompilerParams(dimension_semantics=("parallel",)),
    )(pep, hla, bias_pack, qp0, w_proj, fc_pack, ffn1_pack, ffn2_pack)

    attn = attn_slab[..., 0:Lk]                                        # (B, H, Lq, Lk)
    full_attn = attn_slab[..., Lk:2 * Lk]                              # (B, H, Lq, Lk)
    attn_v = jnp.swapaxes(attn_slab[..., 2 * Lk:3 * Lk], -1, -2)       # (B, H, Lk, Lq)
    return pep_out, hla_out, attn, attn_v, full_attn


def init_params(key):
    def lin(k, fan_in, fan_out):
        bound = 1.0 / math.sqrt(fan_in)
        return jax.random.uniform(k, (fan_in, fan_out), jnp.float32, -bound, bound)

    keys = jax.random.split(key, 12)
    hd = N_HEADS * D_HEAD
    return {
        'W_Q': lin(keys[0], D_MODEL, hd),
        'W_K': lin(keys[1], D_MODEL, hd),
        'W_V': lin(keys[2], D_MODEL, hd),
        'fc': lin(keys[3], hd, D_MODEL),
        'W_Q_v': lin(keys[4], D_MODEL, hd),
        'W_K_v': lin(keys[5], D_MODEL, hd),
        'W_V_v': lin(keys[6], D_MODEL, hd),
        'fc_v': lin(keys[7], hd, D_MODEL),
        'pep_ffn_w1': lin(keys[8], D_MODEL, D_FF),
        'pep_ffn_w2': lin(keys[9], D_FF, D_MODEL),
        'hla_ffn_w1': lin(keys[10], D_MODEL, D_FF),
        'hla_ffn_w2': lin(keys[11], D_FF, D_MODEL),
    }


if __name__ == "__main__":
    key = jax.random.PRNGKey(0)
    kp, kx1, kx2, kam = jax.random.split(key, 4)
    params = init_params(kp)

    pep = jax.random.normal(kx1, (BATCH, L_PEP, D_MODEL), jnp.float32)
    hla = jax.random.normal(kx2, (BATCH, L_HLA, D_MODEL), jnp.float32)

    len_q = jnp.array([9.0, 11.0], jnp.float32)     # peptide lengths
    len_k = jnp.array([34.0, 34.0], jnp.float32)    # HLA lengths (unused on the HLA_pep path)

    # pep -> hla attention: HLA keys have no padding
    pep_attn_mask = jnp.zeros((BATCH, L_PEP, L_HLA), jnp.bool_)
    # hla -> pep attention: mask padded peptide key positions
    pep_valid = jnp.arange(L_PEP)[None, :] < len_q[:, None]                     # (B, 15)
    hla_attn_mask = jnp.broadcast_to(~pep_valid[:, None, :], (BATCH, L_HLA, L_PEP))
    # amino contact mask (float; >= 1.0 means allowed); zero out padded peptide rows
    amino_rand = (jax.random.uniform(kam, (BATCH, L_PEP, L_HLA)) < 0.8).astype(jnp.float32)
    amino_mask = amino_rand * pep_valid[:, :, None].astype(jnp.float32)

    fwd = jax.jit(intercoder_layer_forward)
    outs = fwd(params, pep, hla, pep_attn_mask, hla_attn_mask, amino_mask, len_q, len_k)
    jax.block_until_ready(outs)
    print("KERNEL_OK")
</pallas_src>

<mosaic_0001>
module attributes {stable_mosaic.version = 11 : i64} {
  func.func @_intercoder_kernel(%arg0: i32, %arg1: memref<1x15x32xf32, #tpu.memory_space<vmem>>, %arg2: memref<1x34x32xf32, #tpu.memory_space<vmem>>, %arg3: memref<1x15x102xf32, #tpu.memory_space<vmem>>, %arg4: memref<2x15x3xf32, #tpu.memory_space<vmem>>, %arg5: memref<2x32x48xf32, #tpu.memory_space<vmem>>, %arg6: memref<2x8x64xf32, #tpu.memory_space<vmem>>, %arg7: memref<32x128xf32, #tpu.memory_space<vmem>>, %arg8: memref<64x64xf32, #tpu.memory_space<vmem>>, %arg9: memref<1x15x32xf32, #tpu.memory_space<vmem>>, %arg10: memref<1x34x32xf32, #tpu.memory_space<vmem>>, %arg11: memref<1x2x15x102xf32, #tpu.memory_space<vmem>>) attributes {dimension_semantics = [#tpu.dimension_semantics<parallel>], iteration_bounds = array<i64: 2>, scalar_prefetch = 0 : i64, scratch_operands = 0 : i64, tpu.core_type = #tpu.core_type<tc>, window_params = [{transform_indices = @transform_0, window_bounds = array<i64: 1, 15, 32>}, {transform_indices = @transform_1, window_bounds = array<i64: 1, 34, 32>}, {transform_indices = @transform_2, window_bounds = array<i64: 1, 15, 102>}, {pipeline_mode = #tpu.pipeline_mode<synchronous>, transform_indices = @transform_3, window_bounds = array<i64: 2, 15, 3>}, {pipeline_mode = #tpu.pipeline_mode<synchronous>, transform_indices = @transform_4, window_bounds = array<i64: 2, 32, 48>}, {pipeline_mode = #tpu.pipeline_mode<synchronous>, transform_indices = @transform_5, window_bounds = array<i64: 2, 8, 64>}, {pipeline_mode = #tpu.pipeline_mode<synchronous>, transform_indices = @transform_6, window_bounds = array<i64: 32, 128>}, {pipeline_mode = #tpu.pipeline_mode<synchronous>, transform_indices = @transform_7, window_bounds = array<i64: 64, 64>}, {transform_indices = @transform_8, window_bounds = array<i64: 1, 15, 32>}, {transform_indices = @transform_9, window_bounds = array<i64: 1, 34, 32>}, {transform_indices = @transform_10, window_bounds = array<i64: 1, 2, 15, 102>}]} {
    %c0 = arith.constant 0 : index
    %c0_0 = arith.constant 0 : index
    %c0_1 = arith.constant 0 : index
    %0 = vector.load %arg1[%c0, %c0_0, %c0_1] : memref<1x15x32xf32, #tpu.memory_space<vmem>>, vector<1x15x32xf32>
    %1 = vector.shape_cast %0 : vector<1x15x32xf32> to vector<15x32xf32>
    %c0_2 = arith.constant 0 : index
    %c0_3 = arith.constant 0 : index
    %c0_4 = arith.constant 0 : index
    %2 = vector.load %arg2[%c0_2, %c0_3, %c0_4] : memref<1x34x32xf32, #tpu.memory_space<vmem>>, vector<1x34x32xf32>
    %3 = vector.shape_cast %2 : vector<1x34x32xf32> to vector<34x32xf32>
    %c0_5 = arith.constant 0 : index
    %c0_6 = arith.constant 0 : index
    %c0_7 = arith.constant 0 : index
    %4 = vector.load %arg3[%c0_5, %c0_6, %c0_7] : memref<1x15x102xf32, #tpu.memory_space<vmem>>, vector<1x15x102xf32>
    %5 = vector.shape_cast %4 : vector<1x15x102xf32> to vector<15x102xf32>
    %6 = vector.extract_strided_slice %5 {offsets = [0, 0], sizes = [15, 34], strides = [1, 1]} : vector<15x102xf32> to vector<15x34xf32>
    %7 = vector.extract_strided_slice %5 {offsets = [0, 34], sizes = [15, 34], strides = [1, 1]} : vector<15x102xf32> to vector<15x34xf32>
    %8 = vector.extract_strided_slice %5 {offsets = [0, 68], sizes = [15, 34], strides = [1, 1]} : vector<15x102xf32> to vector<15x34xf32>
    %c0_8 = arith.constant 0 : index
    %c0_9 = arith.constant 0 : index
    %c0_10 = arith.constant 0 : index
    %9 = vector.load %arg5[%c0_8, %c0_9, %c0_10] : memref<2x32x48xf32, #tpu.memory_space<vmem>>, vector<2x32x48xf32>
    %10 = vector.extract_strided_slice %9 {offsets = [0, 0, 0], sizes = [2, 32, 24], strides = [1, 1, 1]} : vector<2x32x48xf32> to vector<2x32x24xf32>
    %11 = vector.extract_strided_slice %9 {offsets = [0, 0, 24], sizes = [2, 32, 24], strides = [1, 1, 1]} : vector<2x32x48xf32> to vector<2x32x24xf32>
    %12 = vector.shape_cast %1 : vector<15x32xf32> to vector<1x15x32xf32>
    %13 = vector.shape_cast %12 : vector<1x15x32xf32> to vector<1x15x32xf32>
    %14 = vector.broadcast %13 : vector<1x15x32xf32> to vector<2x15x32xf32>
    %15 = vector.shape_cast %3 : vector<34x32xf32> to vector<1x34x32xf32>
    %16 = vector.shape_cast %15 : vector<1x34x32xf32> to vector<1x34x32xf32>
    %17 = vector.broadcast %16 : vector<1x34x32xf32> to vector<2x34x32xf32>
    "tpu.trace_start"() <{level = 10 : i32, message = "hld,hdo->hlo"}> : () -> ()
    %cst = arith.constant dense<0.000000e+00> : vector<2x15x24xf32>
    %18 = tpu.matmul %14, %10, %cst {dimension_numbers = #tpu.dot_dimension_numbers<[2], [1], [1], [2], [0, 0, 0, 1, 1, 2], [0], [0]>} : vector<2x15x32xf32>, vector<2x32x24xf32>, vector<2x15x24xf32> -> vector<2x15x24xf32>
    %cst_11 = arith.constant dense<0.000000e+00> : vector<2x34x24xf32>
    %19 = tpu.matmul %17, %11, %cst_11 {dimension_numbers = #tpu.dot_dimension_numbers<[2], [1], [1], [2], [0, 0, 0, 1, 1, 2], [0], [0]>} : vector<2x34x32xf32>, vector<2x32x24xf32>, vector<2x34x24xf32> -> vector<2x34x24xf32>
    "tpu.trace_stop"() : () -> ()
    %20 = vector.extract_strided_slice %18 {offsets = [0, 0, 0], sizes = [2, 15, 8], strides = [1, 1, 1]} : vector<2x15x24xf32> to vector<2x15x8xf32>
    %21 = vector.extract_strided_slice %18 {offsets = [0, 0, 8], sizes = [2, 15, 8], strides = [1, 1, 1]} : vector<2x15x24xf32> to vector<2x15x8xf32>
    %22 = vector.extract_strided_slice %18 {offsets = [0, 0, 16], sizes = [2, 15, 8], strides = [1, 1, 1]} : vector<2x15x24xf32> to vector<2x15x8xf32>
    %23 = vector.extract_strided_slice %19 {offsets = [0, 0, 0], sizes = [2, 34, 8], strides = [1, 1, 1]} : vector<2x34x24xf32> to vector<2x34x8xf32>
    %24 = vector.extract_strided_slice %19 {offsets = [0, 0, 8], sizes = [2, 34, 8], strides = [1, 1, 1]} : vector<2x34x24xf32> to vector<2x34x8xf32>
    %25 = vector.extract_strided_slice %19 {offsets = [0, 0, 16], sizes = [2, 34, 8], strides = [1, 1, 1]} : vector<2x34x24xf32> to vector<2x34x8xf32>
    "tpu.trace_start"() <{level = 10 : i32, message = "hqd,hkd->hqk"}> : () -> ()
    %cst_12 = arith.constant dense<0.000000e+00> : vector<2x15x34xf32>
    %26 = tpu.matmul %20, %23, %cst_12 {dimension_numbers = #tpu.dot_dimension_numbers<[2], [2], [1], [1], [0, 0, 0, 1, 1, 1], [0], [0]>} : vector<2x15x8xf32>, vector<2x34x8xf32>, vector<2x15x34xf32> -> vector<2x15x34xf32>
    %cst_13 = arith.constant dense<0.000000e+00> : vector<2x15x34xf32>
    %27 = tpu.matmul %21, %25, %cst_13 {dimension_numbers = #tpu.dot_dimension_numbers<[2], [2], [1], [1], [0, 0, 0, 1, 1, 1], [0], [0]>} : vector<2x15x8xf32>, vector<2x34x8xf32>, vector<2x15x34xf32> -> vector<2x15x34xf32>
    "tpu.trace_stop"() : () -> ()
    %28 = vector.shape_cast %6 : vector<15x34xf32> to vector<1x15x34xf32>
    %29 = vector.broadcast %28 : vector<1x15x34xf32> to vector<2x15x34xf32>
    %30 = arith.addf %26, %29 : vector<2x15x34xf32>
    %31 = vector.shape_cast %7 : vector<15x34xf32> to vector<1x15x34xf32>
    %32 = vector.broadcast %31 : vector<1x15x34xf32> to vector<2x15x34xf32>
    %33 = arith.addf %27, %32 : vector<2x15x34xf32>
    %34 = vector.shape_cast %8 : vector<15x34xf32> to vector<1x15x34xf32>
    %35 = vector.broadcast %34 : vector<1x15x34xf32> to vector<2x15x34xf32>
    %36 = arith.addf %26, %35 : vector<2x15x34xf32>
    %37 = tpu.iota {dimensions = array<i32: 1>} : vector<1x34xi32>
    %c4_i32 = arith.constant 4 : i32
    %38 = vector.broadcast %c4_i32 : i32 to vector<1x34xi32>
    %39 = arith.cmpi slt, %37, %38 : vector<1x34xi32>
    %c14_i32 = arith.constant 14 : i32
    %40 = vector.broadcast %c14_i32 : i32 to vector<1x34xi32>
    %41 = arith.addi %37, %40 : vector<1x34xi32>
    %c18_i32 = arith.constant 18 : i32
    %42 = vector.broadcast %c18_i32 : i32 to vector<1x34xi32>
    %43 = arith.cmpi slt, %37, %42 : vector<1x34xi32>
    %c4_i32_14 = arith.constant 4 : i32
    %44 = vector.broadcast %c4_i32_14 : i32 to vector<1x34xi32>
    %45 = arith.subi %37, %44 : vector<1x34xi32>
    %46 = arith.select %43, %45, %37 : vector<1x34xi1>, vector<1x34xi32>
    %47 = arith.select %39, %41, %46 : vector<1x34xi1>, vector<1x34xi32>
    %48 = arith.sitofp %47 : vector<1x34xi32> to vector<1x34xf32>
    %c4_i32_15 = arith.constant 4 : i32
    %49 = vector.broadcast %c4_i32_15 : i32 to vector<1x34xi32>
    %50 = arith.cmpi sge, %37, %49 : vector<1x34xi32>
    %c18_i32_16 = arith.constant 18 : i32
    %51 = vector.broadcast %c18_i32_16 : i32 to vector<1x34xi32>
    %52 = arith.cmpi slt, %37, %51 : vector<1x34xi32>
    %53 = arith.andi %50, %52 : vector<1x34xi1>
    %54 = arith.extui %53 : vector<1x34xi1> to vector<1x34xi32>
    %55 = arith.sitofp %54 : vector<1x34xi32> to vector<1x34xf32>
    %c4_i32_17 = arith.constant 4 : i32
    %56 = vector.broadcast %c4_i32_17 : i32 to vector<1x34xi32>
    %57 = arith.cmpi slt, %37, %56 : vector<1x34xi32>
    %c18_i32_18 = arith.constant 18 : i32
    %58 = vector.broadcast %c18_i32_18 : i32 to vector<1x34xi32>
    %59 = arith.cmpi sge, %37, %58 : vector<1x34xi32>
    %c24_i32 = arith.constant 24 : i32
    %60 = vector.broadcast %c24_i32 : i32 to vector<1x34xi32>
    %61 = arith.cmpi slt, %37, %60 : vector<1x34xi32>
    %62 = arith.andi %59, %61 : vector<1x34xi1>
    %63 = arith.ori %57, %62 : vector<1x34xi1>
    %64 = arith.extui %63 : vector<1x34xi1> to vector<1x34xi32>
    %65 = arith.sitofp %64 : vector<1x34xi32> to vector<1x34xf32>
    %c24_i32_19 = arith.constant 24 : i32
    %66 = vector.broadcast %c24_i32_19 : i32 to vector<1x34xi32>
    %67 = arith.cmpi sge, %37, %66 : vector<1x34xi32>
    %68 = arith.extui %67 : vector<1x34xi1> to vector<1x34xi32>
    %69 = arith.sitofp %68 : vector<1x34xi32> to vector<1x34xf32>
    %70 = tpu.iota {dimensions = array<i32: 0>} : vector<34x8xi32>
    %71 = tpu.iota {dimensions = array<i32: 1>} : vector<34x8xi32>
    %c4_i32_20 = arith.constant 4 : i32
    %72 = vector.broadcast %c4_i32_20 : i32 to vector<34x8xi32>
    %73 = arith.cmpi slt, %70, %72 : vector<34x8xi32>
    %c14_i32_21 = arith.constant 14 : i32
    %74 = vector.broadcast %c14_i32_21 : i32 to vector<34x8xi32>
    %75 = arith.addi %70, %74 : vector<34x8xi32>
    %c18_i32_22 = arith.constant 18 : i32
    %76 = vector.broadcast %c18_i32_22 : i32 to vector<34x8xi32>
    %77 = arith.cmpi slt, %70, %76 : vector<34x8xi32>
    %c4_i32_23 = arith.constant 4 : i32
    %78 = vector.broadcast %c4_i32_23 : i32 to vector<34x8xi32>
    %79 = arith.subi %70, %78 : vector<34x8xi32>
    %80 = arith.select %77, %79, %70 : vector<34x8xi1>, vector<34x8xi32>
    %81 = arith.select %73, %75, %80 : vector<34x8xi1>, vector<34x8xi32>
    %82 = arith.sitofp %81 : vector<34x8xi32> to vector<34x8xf32>
    %c4_i32_24 = arith.constant 4 : i32
    %83 = vector.broadcast %c4_i32_24 : i32 to vector<34x8xi32>
    %84 = arith.cmpi slt, %70, %83 : vector<34x8xi32>
    %c18_i32_25 = arith.constant 18 : i32
    %85 = vector.broadcast %c18_i32_25 : i32 to vector<34x8xi32>
    %86 = arith.cmpi slt, %70, %85 : vector<34x8xi32>
    %c24_i32_26 = arith.constant 24 : i32
    %87 = vector.broadcast %c24_i32_26 : i32 to vector<34x8xi32>
    %88 = arith.cmpi slt, %70, %87 : vector<34x8xi32>
    %c2_i32 = arith.constant 2 : i32
    %c3_i32 = arith.constant 3 : i32
    %89 = vector.broadcast %c2_i32 : i32 to vector<34x8xi32>
    %90 = vector.broadcast %c3_i32 : i32 to vector<34x8xi32>
    %91 = arith.select %88, %89, %90 : vector<34x8xi1>, vector<34x8xi32>
    %c1_i32 = arith.constant 1 : i32
    %92 = vector.broadcast %c1_i32 : i32 to vector<34x8xi32>
    %93 = arith.select %86, %92, %91 : vector<34x8xi1>, vector<34x8xi32>
    %c2_i32_27 = arith.constant 2 : i32
    %94 = vector.broadcast %c2_i32_27 : i32 to vector<34x8xi32>
    %95 = arith.select %84, %94, %93 : vector<34x8xi1>, vector<34x8xi32>
    %c0_i32 = arith.constant 0 : i32
    %96 = vector.broadcast %c0_i32 : i32 to vector<34x8xi32>
    %97 = arith.cmpi eq, %71, %96 : vector<34x8xi32>
    %c3_i32_28 = arith.constant 3 : i32
    %98 = vector.broadcast %c3_i32_28 : i32 to vector<34x8xi32>
    %99 = arith.cmpi eq, %71, %98 : vector<34x8xi32>
    %100 = arith.ori %97, %99 : vector<34x8xi1>
    %c1_i32_29 = arith.constant 1 : i32
    %101 = vector.broadcast %c1_i32_29 : i32 to vector<34x8xi32>
    %102 = arith.cmpi eq, %71, %101 : vector<34x8xi32>
    %c4_i32_30 = arith.constant 4 : i32
    %103 = vector.broadcast %c4_i32_30 : i32 to vector<34x8xi32>
    %104 = arith.cmpi eq, %71, %103 : vector<34x8xi32>
    %105 = arith.ori %102, %104 : vector<34x8xi1>
    %c2_i32_31 = arith.constant 2 : i32
    %106 = vector.broadcast %c2_i32_31 : i32 to vector<34x8xi32>
    %107 = arith.cmpi eq, %71, %106 : vector<34x8xi32>
    %c5_i32 = arith.constant 5 : i32
    %108 = vector.broadcast %c5_i32 : i32 to vector<34x8xi32>
    %109 = arith.cmpi eq, %71, %108 : vector<34x8xi32>
    %110 = arith.ori %107, %109 : vector<34x8xi1>
    %c3_i32_32 = arith.constant 3 : i32
    %c0_i32_33 = arith.constant 0 : i32
    %111 = vector.broadcast %c3_i32_32 : i32 to vector<34x8xi32>
    %112 = vector.broadcast %c0_i32_33 : i32 to vector<34x8xi32>
    %113 = arith.select %110, %111, %112 : vector<34x8xi1>, vector<34x8xi32>
    %c2_i32_34 = arith.constant 2 : i32
    %114 = vector.broadcast %c2_i32_34 : i32 to vector<34x8xi32>
    %115 = arith.select %105, %114, %113 : vector<34x8xi1>, vector<34x8xi32>
    %c1_i32_35 = arith.constant 1 : i32
    %116 = vector.broadcast %c1_i32_35 : i32 to vector<34x8xi32>
    %117 = arith.select %100, %116, %115 : vector<34x8xi1>, vector<34x8xi32>
    %118 = arith.cmpi eq, %95, %117 : vector<34x8xi32>
    %119 = arith.extui %118 : vector<34x8xi1> to vector<34x8xi32>
    %120 = arith.sitofp %119 : vector<34x8xi32> to vector<34x8xf32>
    %c3_i32_36 = arith.constant 3 : i32
    %121 = vector.broadcast %c3_i32_36 : i32 to vector<34x8xi32>
    %122 = arith.cmpi slt, %71, %121 : vector<34x8xi32>
    %123 = arith.mulf %120, %82 : vector<34x8xf32>
    %124 = arith.select %122, %120, %123 : vector<34x8xi1>, vector<34x8xf32>
    %125 = vector.shape_cast %124 : vector<34x8xf32> to vector<1x34x8xf32>
    %126 = vector.shape_cast %125 : vector<1x34x8xf32> to vector<1x34x8xf32>
    %127 = vector.broadcast %126 : vector<1x34x8xf32> to vector<2x34x8xf32>
    %c0_37 = arith.constant 0 : index
    %c0_38 = arith.constant 0 : index
    %c0_39 = arith.constant 0 : index
    %128 = vector.load %arg4[%c0_37, %c0_38, %c0_39] : memref<2x15x3xf32, #tpu.memory_space<vmem>>, vector<2x15x3xf32>
    %129 = vector.extract_strided_slice %128 {offsets = [0, 0, 0], sizes = [2, 15, 1], strides = [1, 1, 1]} : vector<2x15x3xf32> to vector<2x15x1xf32>
    %130 = vector.shape_cast %55 : vector<1x34xf32> to vector<1x1x34xf32>
    %131 = vector.broadcast %129 : vector<2x15x1xf32> to vector<2x15x34xf32>
    %132 = vector.broadcast %130 : vector<1x1x34xf32> to vector<2x15x34xf32>
    %133 = arith.mulf %131, %132 : vector<2x15x34xf32>
    %134 = vector.extract_strided_slice %128 {offsets = [0, 0, 1], sizes = [2, 15, 1], strides = [1, 1, 1]} : vector<2x15x3xf32> to vector<2x15x1xf32>
    %135 = vector.shape_cast %65 : vector<1x34xf32> to vector<1x1x34xf32>
    %136 = vector.broadcast %134 : vector<2x15x1xf32> to vector<2x15x34xf32>
    %137 = vector.broadcast %135 : vector<1x1x34xf32> to vector<2x15x34xf32>
    %138 = arith.mulf %136, %137 : vector<2x15x34xf32>
    %139 = arith.addf %133, %138 : vector<2x15x34xf32>
    %140 = vector.extract_strided_slice %128 {offsets = [0, 0, 2], sizes = [2, 15, 1], strides = [1, 1, 1]} : vector<2x15x3xf32> to vector<2x15x1xf32>
    %141 = vector.shape_cast %69 : vector<1x34xf32> to vector<1x1x34xf32>
    %142 = vector.broadcast %140 : vector<2x15x1xf32> to vector<2x15x34xf32>
    %143 = vector.broadcast %141 : vector<1x1x34xf32> to vector<2x15x34xf32>
    %144 = arith.mulf %142, %143 : vector<2x15x34xf32>
    %145 = arith.addf %139, %144 : vector<2x15x34xf32>
    %146 = vector.shape_cast %48 : vector<1x34xf32> to vector<1x1x34xf32>
    %147 = vector.broadcast %146 : vector<1x1x34xf32> to vector<2x15x34xf32>
    %148 = arith.subf %145, %147 : vector<2x15x34xf32>
    %149 = arith.mulf %148, %148 : vector<2x15x34xf32>
    %cst_40 = arith.constant 0.000000e+00 : f32
    %150 = vector.broadcast %cst_40 : f32 to vector<2x15x34xf32>
    %151 = arith.subf %150, %149 : vector<2x15x34xf32>
    %cst_41 = arith.constant 5.000000e-01 : f32
    %152 = vector.broadcast %cst_41 : f32 to vector<2x15x34xf32>
    %153 = arith.mulf %151, %152 : vector<2x15x34xf32>
    %154 = math.exp %153 : vector<2x15x34xf32>
    %cst_42 = arith.constant 0.606530666 : f32
    %155 = vector.broadcast %cst_42 : f32 to vector<2x15x34xf32>
    %156 = arith.cmpf olt, %154, %155 : vector<2x15x34xf32>
    %cst_43 = arith.constant 0xFF800000 : f32
    %157 = vector.broadcast %cst_43 : f32 to vector<2x15x34xf32>
    %158 = arith.select %156, %157, %30 : vector<2x15x34xi1>, vector<2x15x34xf32>
    %cst_44 = arith.constant dense<0xFF800000> : vector<2x15xf32>
    %159 = vector.multi_reduction <maximumf>, %158, %cst_44 [2] : vector<2x15x34xf32> to vector<2x15xf32>
    %160 = vector.shape_cast %159 : vector<2x15xf32> to vector<2x15x1xf32>
    %cst_45 = arith.constant -1.000000e+30 : f32
    %161 = vector.broadcast %cst_45 : f32 to vector<2x15x1xf32>
    %162 = arith.maximumf %160, %161 : vector<2x15x1xf32>
    %163 = vector.broadcast %162 : vector<2x15x1xf32> to vector<2x15x34xf32>
    %164 = arith.subf %158, %163 : vector<2x15x34xf32>
    %165 = math.exp %164 : vector<2x15x34xf32>
    "tpu.trace_start"() <{level = 10 : i32, message = "hqk,hkc->hqc"}> : () -> ()
    %cst_46 = arith.constant dense<0.000000e+00> : vector<2x15x8xf32>
    %166 = tpu.matmul %165, %127, %cst_46 {dimension_numbers = #tpu.dot_dimension_numbers<[2], [1], [1], [2], [0, 0, 0, 1, 1, 2], [0], [0]>} : vector<2x15x34xf32>, vector<2x34x8xf32>, vector<2x15x8xf32> -> vector<2x15x8xf32>
    "tpu.trace_stop"() : () -> ()
    %167 = vector.extract_strided_slice %166 {offsets = [0, 0, 0], sizes = [2, 15, 3], strides = [1, 1, 1]} : vector<2x15x8xf32> to vector<2x15x3xf32>
    %168 = vector.extract_strided_slice %166 {offsets = [0, 0, 3], sizes = [2, 15, 3], strides = [1, 1, 1]} : vector<2x15x8xf32> to vector<2x15x3xf32>
    %cst_47 = arith.constant 0.000000e+00 : f32
    %169 = vector.broadcast %cst_47 : f32 to vector<2x15x3xf32>
    %170 = arith.cmpf ogt, %167, %169 : vector<2x15x3xf32>
    %cst_48 = arith.constant 1.000000e+00 : f32
    %171 = vector.broadcast %cst_48 : f32 to vector<2x15x3xf32>
    %172 = arith.select %170, %167, %171 : vector<2x15x3xi1>, vector<2x15x3xf32>
    %173 = tpu.reciprocal %172 {approx = true} : vector<2x15x3xf32> -> vector<2x15x3xf32>
    %174 = arith.mulf %168, %173 : vector<2x15x3xf32>
    %cst_49 = arith.constant 0.000000e+00 : f32
    %175 = vector.broadcast %cst_49 : f32 to vector<2x15x3xf32>
    %176 = arith.cmpf ogt, %167, %175 : vector<2x15x3xf32>
    %177 = arith.select %176, %174, %128 : vector<2x15x3xi1>, vector<2x15x3xf32>
    %178 = vector.extract_strided_slice %177 {offsets = [0, 0, 0], sizes = [2, 15, 1], strides = [1, 1, 1]} : vector<2x15x3xf32> to vector<2x15x1xf32>
    %179 = vector.shape_cast %55 : vector<1x34xf32> to vector<1x1x34xf32>
    %180 = vector.broadcast %178 : vector<2x15x1xf32> to vector<2x15x34xf32>
    %181 = vector.broadcast %179 : vector<1x1x34xf32> to vector<2x15x34xf32>
    %182 = arith.mulf %180, %181 : vector<2x15x34xf32>
    %183 = vector.extract_strided_slice %177 {offsets = [0, 0, 1], sizes = [2, 15, 1], strides = [1, 1, 1]} : vector<2x15x3xf32> to vector<2x15x1xf32>
    %184 = vector.shape_cast %65 : vector<1x34xf32> to vector<1x1x34xf32>
    %185 = vector.broadcast %183 : vector<2x15x1xf32> to vector<2x15x34xf32>
    %186 = vector.broadcast %184 : vector<1x1x34xf32> to vector<2x15x34xf32>
    %187 = arith.mulf %185, %186 : vector<2x15x34xf32>
    %188 = arith.addf %182, %187 : vector<2x15x34xf32>
    %189 = vector.extract_strided_slice %177 {offsets = [0, 0, 2], sizes = [2, 15, 1], strides = [1, 1, 1]} : vector<2x15x3xf32> to vector<2x15x1xf32>
    %190 = vector.shape_cast %69 : vector<1x34xf32> to vector<1x1x34xf32>
    %191 = vector.broadcast %189 : vector<2x15x1xf32> to vector<2x15x34xf32>
    %192 = vector.broadcast %190 : vector<1x1x34xf32> to vector<2x15x34xf32>
    %193 = arith.mulf %191, %192 : vector<2x15x34xf32>
    %194 = arith.addf %188, %193 : vector<2x15x34xf32>
    %195 = vector.shape_cast %48 : vector<1x34xf32> to vector<1x1x34xf32>
    %196 = vector.broadcast %195 : vector<1x1x34xf32> to vector<2x15x34xf32>
    %197 = arith.subf %194, %196 : vector<2x15x34xf32>
    %198 = arith.mulf %197, %197 : vector<2x15x34xf32>
    %cst_50 = arith.constant 0.000000e+00 : f32
    %199 = vector.broadcast %cst_50 : f32 to vector<2x15x34xf32>
    %200 = arith.subf %199, %198 : vector<2x15x34xf32>
    %cst_51 = arith.constant 5.000000e-01 : f32
    %201 = vector.broadcast %cst_51 : f32 to vector<2x15x34xf32>
    %202 = arith.mulf %200, %201 : vector<2x15x34xf32>
    %203 = math.exp %202 : vector<2x15x34xf32>
    %cst_52 = arith.constant 0.606530666 : f32
    %204 = vector.broadcast %cst_52 : f32 to vector<2x15x34xf32>
    %205 = arith.cmpf olt, %203, %204 : vector<2x15x34xf32>
    %cst_53 = arith.constant 0xFF800000 : f32
    %206 = vector.broadcast %cst_53 : f32 to vector<2x15x34xf32>
    %207 = arith.select %205, %206, %30 : vector<2x15x34xi1>, vector<2x15x34xf32>
    %cst_54 = arith.constant dense<0xFF800000> : vector<2x15xf32>
    %208 = vector.multi_reduction <maximumf>, %207, %cst_54 [2] : vector<2x15x34xf32> to vector<2x15xf32>
    %209 = vector.shape_cast %208 : vector<2x15xf32> to vector<2x15x1xf32>
    %cst_55 = arith.constant -1.000000e+30 : f32
    %210 = vector.broadcast %cst_55 : f32 to vector<2x15x1xf32>
    %211 = arith.maximumf %209, %210 : vector<2x15x1xf32>
    %212 = vector.broadcast %211 : vector<2x15x1xf32> to vector<2x15x34xf32>
    %213 = arith.subf %207, %212 : vector<2x15x34xf32>
    %214 = math.exp %213 : vector<2x15x34xf32>
    "tpu.trace_start"() <{level = 10 : i32, message = "hqk,hkc->hqc"}> : () -> ()
    %cst_56 = arith.constant dense<0.000000e+00> : vector<2x15x8xf32>
    %215 = tpu.matmul %214, %127, %cst_56 {dimension_numbers = #tpu.dot_dimension_numbers<[2], [1], [1], [2], [0, 0, 0, 1, 1, 2], [0], [0]>} : vector<2x15x34xf32>, vector<2x34x8xf32>, vector<2x15x8xf32> -> vector<2x15x8xf32>
    "tpu.trace_stop"() : () -> ()
    %216 = vector.extract_strided_slice %215 {offsets = [0, 0, 0], sizes = [2, 15, 3], strides = [1, 1, 1]} : vector<2x15x8xf32> to vector<2x15x3xf32>
    %217 = vector.extract_strided_slice %215 {offsets = [0, 0, 3], sizes = [2, 15, 3], strides = [1, 1, 1]} : vector<2x15x8xf32> to vector<2x15x3xf32>
    %cst_57 = arith.constant 0.000000e+00 : f32
    %218 = vector.broadcast %cst_57 : f32 to vector<2x15x3xf32>
    %219 = arith.cmpf ogt, %216, %218 : vector<2x15x3xf32>
    %cst_58 = arith.constant 1.000000e+00 : f32
    %220 = vector.broadcast %cst_58 : f32 to vector<2x15x3xf32>
    %221 = arith.select %219, %216, %220 : vector<2x15x3xi1>, vector<2x15x3xf32>
    %222 = tpu.reciprocal %221 {approx = true} : vector<2x15x3xf32> -> vector<2x15x3xf32>
    %223 = arith.mulf %217, %222 : vector<2x15x3xf32>
    %cst_59 = arith.constant 0.000000e+00 : f32
    %224 = vector.broadcast %cst_59 : f32 to vector<2x15x3xf32>
    %225 = arith.cmpf ogt, %216, %224 : vector<2x15x3xf32>
    %226 = arith.select %225, %223, %177 : vector<2x15x3xi1>, vector<2x15x3xf32>
    %227 = vector.extract_strided_slice %226 {offsets = [0, 0, 0], sizes = [2, 15, 1], strides = [1, 1, 1]} : vector<2x15x3xf32> to vector<2x15x1xf32>
    %228 = vector.shape_cast %55 : vector<1x34xf32> to vector<1x1x34xf32>
    %229 = vector.broadcast %227 : vector<2x15x1xf32> to vector<2x15x34xf32>
    %230 = vector.broadcast %228 : vector<1x1x34xf32> to vector<2x15x34xf32>
    %231 = arith.mulf %229, %230 : vector<2x15x34xf32>
    %232 = vector.extract_strided_slice %226 {offsets = [0, 0, 1], sizes = [2, 15, 1], strides = [1, 1, 1]} : vector<2x15x3xf32> to vector<2x15x1xf32>
    %233 = vector.shape_cast %65 : vector<1x34xf32> to vector<1x1x34xf32>
    %234 = vector.broadcast %232 : vector<2x15x1xf32> to vector<2x15x34xf32>
    %235 = vector.broadcast %233 : vector<1x1x34xf32> to vector<2x15x34xf32>
    %236 = arith.mulf %234, %235 : vector<2x15x34xf32>
    %237 = arith.addf %231, %236 : vector<2x15x34xf32>
    %238 = vector.extract_strided_slice %226 {offsets = [0, 0, 2], sizes = [2, 15, 1], strides = [1, 1, 1]} : vector<2x15x3xf32> to vector<2x15x1xf32>
    %239 = vector.shape_cast %69 : vector<1x34xf32> to vector<1x1x34xf32>
    %240 = vector.broadcast %238 : vector<2x15x1xf32> to vector<2x15x34xf32>
    %241 = vector.broadcast %239 : vector<1x1x34xf32> to vector<2x15x34xf32>
    %242 = arith.mulf %240, %241 : vector<2x15x34xf32>
    %243 = arith.addf %237, %242 : vector<2x15x34xf32>
    %244 = vector.shape_cast %48 : vector<1x34xf32> to vector<1x1x34xf32>
    %245 = vector.broadcast %244 : vector<1x1x34xf32> to vector<2x15x34xf32>
    %246 = arith.subf %243, %245 : vector<2x15x34xf32>
    %247 = arith.mulf %246, %246 : vector<2x15x34xf32>
    %cst_60 = arith.constant 0.000000e+00 : f32
    %248 = vector.broadcast %cst_60 : f32 to vector<2x15x34xf32>
    %249 = arith.subf %248, %247 : vector<2x15x34xf32>
    %cst_61 = arith.constant 5.000000e-01 : f32
    %250 = vector.broadcast %cst_61 : f32 to vector<2x15x34xf32>
    %251 = arith.mulf %249, %250 : vector<2x15x34xf32>
    %252 = math.exp %251 : vector<2x15x34xf32>
    %253 = arith.addf %30, %252 : vector<2x15x34xf32>
    %cst_62 = arith.constant dense<0xFF800000> : vector<2x15xf32>
    %254 = vector.multi_reduction <maximumf>, %253, %cst_62 [2] : vector<2x15x34xf32> to vector<2x15xf32>
    %255 = vector.shape_cast %254 : vector<2x15xf32> to vector<2x15x1xf32>
    %cst_63 = arith.constant -1.000000e+30 : f32
    %256 = vector.broadcast %cst_63 : f32 to vector<2x15x1xf32>
    %257 = arith.maximumf %255, %256 : vector<2x15x1xf32>
    %258 = vector.broadcast %257 : vector<2x15x1xf32> to vector<2x15x34xf32>
    %259 = arith.subf %253, %258 : vector<2x15x34xf32>
    %260 = math.exp %259 : vector<2x15x34xf32>
    %cst_64 = arith.constant dense<0.000000e+00> : vector<2x15xf32>
    %261 = vector.multi_reduction <add>, %260, %cst_64 [2] : vector<2x15x34xf32> to vector<2x15xf32>
    %262 = vector.shape_cast %261 : vector<2x15xf32> to vector<2x15x1xf32>
    %cst_65 = arith.constant 0.000000e+00 : f32
    %263 = vector.broadcast %cst_65 : f32 to vector<2x15x1xf32>
    %264 = arith.cmpf ogt, %262, %263 : vector<2x15x1xf32>
    %cst_66 = arith.constant 1.000000e+00 : f32
    %265 = vector.broadcast %cst_66 : f32 to vector<2x15x1xf32>
    %266 = arith.select %264, %262, %265 : vector<2x15x1xi1>, vector<2x15x1xf32>
    %267 = tpu.reciprocal %266 {approx = true} : vector<2x15x1xf32> -> vector<2x15x1xf32>
    %268 = vector.broadcast %267 : vector<2x15x1xf32> to vector<2x15x34xf32>
    %269 = arith.mulf %260, %268 : vector<2x15x34xf32>
    %270 = arith.addf %33, %252 : vector<2x15x34xf32>
    %271 = tpu.transpose %270, [0, 2, 1] : vector<2x15x34xf32> -> vector<2x34x15xf32>
    %cst_67 = arith.constant dense<0xFF800000> : vector<2x34xf32>
    %272 = vector.multi_reduction <maximumf>, %271, %cst_67 [2] : vector<2x34x15xf32> to vector<2x34xf32>
    %273 = vector.shape_cast %272 : vector<2x34xf32> to vector<2x34x1xf32>
    %cst_68 = arith.constant -1.000000e+30 : f32
    %274 = vector.broadcast %cst_68 : f32 to vector<2x34x1xf32>
    %275 = arith.maximumf %273, %274 : vector<2x34x1xf32>
    %276 = vector.broadcast %275 : vector<2x34x1xf32> to vector<2x34x15xf32>
    %277 = arith.subf %271, %276 : vector<2x34x15xf32>
    %278 = math.exp %277 : vector<2x34x15xf32>
    %cst_69 = arith.constant dense<0.000000e+00> : vector<2x34xf32>
    %279 = vector.multi_reduction <add>, %278, %cst_69 [2] : vector<2x34x15xf32> to vector<2x34xf32>
    %280 = vector.shape_cast %279 : vector<2x34xf32> to vector<2x34x1xf32>
    %cst_70 = arith.constant 0.000000e+00 : f32
    %281 = vector.broadcast %cst_70 : f32 to vector<2x34x1xf32>
    %282 = arith.cmpf ogt, %280, %281 : vector<2x34x1xf32>
    %cst_71 = arith.constant 1.000000e+00 : f32
    %283 = vector.broadcast %cst_71 : f32 to vector<2x34x1xf32>
    %284 = arith.select %282, %280, %283 : vector<2x34x1xi1>, vector<2x34x1xf32>
    %285 = tpu.reciprocal %284 {approx = true} : vector<2x34x1xf32> -> vector<2x34x1xf32>
    %286 = vector.broadcast %285 : vector<2x34x1xf32> to vector<2x34x15xf32>
    %287 = arith.mulf %278, %286 : vector<2x34x15xf32>
    %288 = arith.addf %36, %252 : vector<2x15x34xf32>
    "tpu.trace_start"() <{level = 10 : i32, message = "hqk,hkd->hqd"}> : () -> ()
    %cst_72 = arith.constant dense<0.000000e+00> : vector<2x15x8xf32>
    %289 = tpu.matmul %269, %24, %cst_72 {dimension_numbers = #tpu.dot_dimension_numbers<[2], [1], [1], [2], [0, 0, 0, 1, 1, 2], [0], [0]>} : vector<2x15x34xf32>, vector<2x34x8xf32>, vector<2x15x8xf32> -> vector<2x15x8xf32>
    "tpu.trace_stop"() : () -> ()
    "tpu.trace_start"() <{level = 10 : i32, message = "hkq,hqd->hkd"}> : () -> ()
    %cst_73 = arith.constant dense<0.000000e+00> : vector<2x34x8xf32>
    %290 = tpu.matmul %287, %22, %cst_73 {dimension_numbers = #tpu.dot_dimension_numbers<[2], [1], [1], [2], [0, 0, 0, 1, 1, 2], [0], [0]>} : vector<2x34x15xf32>, vector<2x15x8xf32>, vector<2x34x8xf32> -> vector<2x34x8xf32>
    "tpu.trace_stop"() : () -> ()
    %c0_74 = arith.constant 0 : index
    %c0_75 = arith.constant 0 : index
    %c0_76 = arith.constant 0 : index
    %291 = vector.load %arg6[%c0_74, %c0_75, %c0_76] : memref<2x8x64xf32, #tpu.memory_space<vmem>>, vector<2x8x64xf32>
    %292 = vector.extract_strided_slice %291 {offsets = [0, 0, 0], sizes = [2, 8, 32], strides = [1, 1, 1]} : vector<2x8x64xf32> to vector<2x8x32xf32>
    %293 = vector.extract_strided_slice %291 {offsets = [0, 0, 32], sizes = [2, 8, 32], strides = [1, 1, 1]} : vector<2x8x64xf32> to vector<2x8x32xf32>
    "tpu.trace_start"() <{level = 10 : i32, message = "hqd,hdm->hqm"}> : () -> ()
    %cst_77 = arith.constant dense<0.000000e+00> : vector<2x15x32xf32>
    %294 = tpu.matmul %289, %292, %cst_77 {dimension_numbers = #tpu.dot_dimension_numbers<[2], [1], [1], [2], [0, 0, 0, 1, 1, 2], [0], [0]>} : vector<2x15x8xf32>, vector<2x8x32xf32>, vector<2x15x32xf32> -> vector<2x15x32xf32>
    "tpu.trace_stop"() : () -> ()
    %cst_78 = arith.constant dense<0.000000e+00> : vector<15x32xf32>
    %295 = vector.multi_reduction <add>, %294, %cst_78 [0] : vector<2x15x32xf32> to vector<15x32xf32>
    "tpu.trace_start"() <{level = 10 : i32, message = "hkd,hdm->hkm"}> : () -> ()
    %cst_79 = arith.constant dense<0.000000e+00> : vector<2x34x32xf32>
    %296 = tpu.matmul %290, %293, %cst_79 {dimension_numbers = #tpu.dot_dimension_numbers<[2], [1], [1], [2], [0, 0, 0, 1, 1, 2], [0], [0]>} : vector<2x34x8xf32>, vector<2x8x32xf32>, vector<2x34x32xf32> -> vector<2x34x32xf32>
    "tpu.trace_stop"() : () -> ()
    %cst_80 = arith.constant dense<0.000000e+00> : vector<34x32xf32>
    %297 = vector.multi_reduction <add>, %296, %cst_80 [0] : vector<2x34x32xf32> to vector<34x32xf32>
    %298 = arith.addf %295, %1 : vector<15x32xf32>
    %cst_81 = arith.constant dense<0.000000e+00> : vector<15xf32>
    %299 = vector.multi_reduction <add>, %298, %cst_81 [1] : vector<15x32xf32> to vector<15xf32>
    %300 = vector.shape_cast %299 : vector<15xf32> to vector<15x1xf32>
    %cst_82 = arith.constant 3.200000e+01 : f32
    %301 = vector.broadcast %cst_82 : f32 to vector<15x1xf32>
    %302 = arith.divf %300, %301 : vector<15x1xf32>
    %303 = vector.broadcast %302 : vector<15x1xf32> to vector<15x32xf32>
    %304 = arith.subf %298, %303 : vector<15x32xf32>
    %305 = arith.mulf %304, %304 : vector<15x32xf32>
    %cst_83 = arith.constant dense<0.000000e+00> : vector<15xf32>
    %306 = vector.multi_reduction <add>, %305, %cst_83 [1] : vector<15x32xf32> to vector<15xf32>
    %307 = vector.shape_cast %306 : vector<15xf32> to vector<15x1xf32>
    %cst_84 = arith.constant 3.200000e+01 : f32
    %308 = vector.broadcast %cst_84 : f32 to vector<15x1xf32>
    %309 = arith.divf %307, %308 : vector<15x1xf32>
    %cst_85 = arith.constant 9.99999974E-6 : f32
    %310 = vector.broadcast %cst_85 : f32 to vector<15x1xf32>
    %311 = arith.addf %309, %310 : vector<15x1xf32>
    %312 = math.rsqrt %311 : vector<15x1xf32>
    %313 = vector.broadcast %312 : vector<15x1xf32> to vector<15x32xf32>
    %314 = arith.mulf %304, %313 : vector<15x32xf32>
    %315 = arith.addf %297, %3 : vector<34x32xf32>
    %cst_86 = arith.constant dense<0.000000e+00> : vector<34xf32>
    %316 = vector.multi_reduction <add>, %315, %cst_86 [1] : vector<34x32xf32> to vector<34xf32>
    %317 = vector.shape_cast %316 : vector<34xf32> to vector<34x1xf32>
    %cst_87 = arith.constant 3.200000e+01 : f32
    %318 = vector.broadcast %cst_87 : f32 to vector<34x1xf32>
    %319 = arith.divf %317, %318 : vector<34x1xf32>
    %320 = vector.broadcast %319 : vector<34x1xf32> to vector<34x32xf32>
    %321 = arith.subf %315, %320 : vector<34x32xf32>
    %322 = arith.mulf %321, %321 : vector<34x32xf32>
    %cst_88 = arith.constant dense<0.000000e+00> : vector<34xf32>
    %323 = vector.multi_reduction <add>, %322, %cst_88 [1] : vector<34x32xf32> to vector<34xf32>
    %324 = vector.shape_cast %323 : vector<34xf32> to vector<34x1xf32>
    %cst_89 = arith.constant 3.200000e+01 : f32
    %325 = vector.broadcast %cst_89 : f32 to vector<34x1xf32>
    %326 = arith.divf %324, %325 : vector<34x1xf32>
    %cst_90 = arith.constant 9.99999974E-6 : f32
    %327 = vector.broadcast %cst_90 : f32 to vector<34x1xf32>
    %328 = arith.addf %326, %327 : vector<34x1xf32>
    %329 = math.rsqrt %328 : vector<34x1xf32>
    %330 = vector.broadcast %329 : vector<34x1xf32> to vector<34x32xf32>
    %331 = arith.mulf %321, %330 : vector<34x32xf32>
    %c0_91 = arith.constant 0 : index
    %c0_92 = arith.constant 0 : index
    %332 = vector.load %arg7[%c0_91, %c0_92] : memref<32x128xf32, #tpu.memory_space<vmem>>, vector<32x128xf32>
    %c0_93 = arith.constant 0 : index
    %c0_94 = arith.constant 0 : index
    %333 = vector.load %arg8[%c0_93, %c0_94] : memref<64x64xf32, #tpu.memory_space<vmem>>, vector<64x64xf32>
    %334 = vector.extract_strided_slice %332 {offsets = [0, 0], sizes = [32, 64], strides = [1, 1]} : vector<32x128xf32> to vector<32x64xf32>
    %cst_95 = arith.constant dense<0.000000e+00> : vector<15x64xf32>
    %335 = tpu.matmul %314, %334, %cst_95 {dimension_numbers = #tpu.dot_dimension_numbers<[1], [0], [0], [1], [0, 0, 1, 1], [], []>} : vector<15x32xf32>, vector<32x64xf32>, vector<15x64xf32> -> vector<15x64xf32>
    %cst_96 = arith.constant 0.000000e+00 : f32
    %336 = vector.broadcast %cst_96 : f32 to vector<15x64xf32>
    %337 = arith.maximumf %335, %336 : vector<15x64xf32>
    %338 = vector.extract_strided_slice %332 {offsets = [0, 64], sizes = [32, 64], strides = [1, 1]} : vector<32x128xf32> to vector<32x64xf32>
    %cst_97 = arith.constant dense<0.000000e+00> : vector<34x64xf32>
    %339 = tpu.matmul %331, %338, %cst_97 {dimension_numbers = #tpu.dot_dimension_numbers<[1], [0], [0], [1], [0, 0, 1, 1], [], []>} : vector<34x32xf32>, vector<32x64xf32>, vector<34x64xf32> -> vector<34x64xf32>
    %cst_98 = arith.constant 0.000000e+00 : f32
    %340 = vector.broadcast %cst_98 : f32 to vector<34x64xf32>
    %341 = arith.maximumf %339, %340 : vector<34x64xf32>
    %342 = vector.extract_strided_slice %333 {offsets = [0, 0], sizes = [64, 32], strides = [1, 1]} : vector<64x64xf32> to vector<64x32xf32>
    %cst_99 = arith.constant dense<0.000000e+00> : vector<15x32xf32>
    %343 = tpu.matmul %337, %342, %cst_99 {dimension_numbers = #tpu.dot_dimension_numbers<[1], [0], [0], [1], [0, 0, 1, 1], [], []>} : vector<15x64xf32>, vector<64x32xf32>, vector<15x32xf32> -> vector<15x32xf32>
    %344 = arith.addf %343, %314 : vector<15x32xf32>
    %cst_100 = arith.constant dense<0.000000e+00> : vector<15xf32>
    %345 = vector.multi_reduction <add>, %344, %cst_100 [1] : vector<15x32xf32> to vector<15xf32>
    %346 = vector.shape_cast %345 : vector<15xf32> to vector<15x1xf32>
    %cst_101 = arith.constant 3.200000e+01 : f32
    %347 = vector.broadcast %cst_101 : f32 to vector<15x1xf32>
    %348 = arith.divf %346, %347 : vector<15x1xf32>
    %349 = vector.broadcast %348 : vector<15x1xf32> to vector<15x32xf32>
    %350 = arith.subf %344, %349 : vector<15x32xf32>
    %351 = arith.mulf %350, %350 : vector<15x32xf32>
    %cst_102 = arith.constant dense<0.000000e+00> : vector<15xf32>
    %352 = vector.multi_reduction <add>, %351, %cst_102 [1] : vector<15x32xf32> to vector<15xf32>
    %353 = vector.shape_cast %352 : vector<15xf32> to vector<15x1xf32>
    %cst_103 = arith.constant 3.200000e+01 : f32
    %354 = vector.broadcast %cst_103 : f32 to vector<15x1xf32>
    %355 = arith.divf %353, %354 : vector<15x1xf32>
    %cst_104 = arith.constant 9.99999974E-6 : f32
    %356 = vector.broadcast %cst_104 : f32 to vector<15x1xf32>
    %357 = arith.addf %355, %356 : vector<15x1xf32>
    %358 = math.rsqrt %357 : vector<15x1xf32>
    %359 = vector.broadcast %358 : vector<15x1xf32> to vector<15x32xf32>
    %360 = arith.mulf %350, %359 : vector<15x32xf32>
    %361 = vector.extract_strided_slice %333 {offsets = [0, 32], sizes = [64, 32], strides = [1, 1]} : vector<64x64xf32> to vector<64x32xf32>
    %cst_105 = arith.constant dense<0.000000e+00> : vector<34x32xf32>
    %362 = tpu.matmul %341, %361, %cst_105 {dimension_numbers = #tpu.dot_dimension_numbers<[1], [0], [0], [1], [0, 0, 1, 1], [], []>} : vector<34x64xf32>, vector<64x32xf32>, vector<34x32xf32> -> vector<34x32xf32>
    %363 = arith.addf %362, %331 : vector<34x32xf32>
    %cst_106 = arith.constant dense<0.000000e+00> : vector<34xf32>
    %364 = vector.multi_reduction <add>, %363, %cst_106 [1] : vector<34x32xf32> to vector<34xf32>
    %365 = vector.shape_cast %364 : vector<34xf32> to vector<34x1xf32>
    %cst_107 = arith.constant 3.200000e+01 : f32
    %366 = vector.broadcast %cst_107 : f32 to vector<34x1xf32>
    %367 = arith.divf %365, %366 : vector<34x1xf32>
    %368 = vector.broadcast %367 : vector<34x1xf32> to vector<34x32xf32>
    %369 = arith.subf %363, %368 : vector<34x32xf32>
    %370 = arith.mulf %369, %369 : vector<34x32xf32>
    %cst_108 = arith.constant dense<0.000000e+00> : vector<34xf32>
    %371 = vector.multi_reduction <add>, %370, %cst_108 [1] : vector<34x32xf32> to vector<34xf32>
    %372 = vector.shape_cast %371 : vector<34xf32> to vector<34x1xf32>
    %cst_109 = arith.constant 3.200000e+01 : f32
    %373 = vector.broadcast %cst_109 : f32 to vector<34x1xf32>
    %374 = arith.divf %372, %373 : vector<34x1xf32>
    %cst_110 = arith.constant 9.99999974E-6 : f32
    %375 = vector.broadcast %cst_110 : f32 to vector<34x1xf32>
    %376 = arith.addf %374, %375 : vector<34x1xf32>
    %377 = math.rsqrt %376 : vector<34x1xf32>
    %378 = vector.broadcast %377 : vector<34x1xf32> to vector<34x32xf32>
    %379 = arith.mulf %369, %378 : vector<34x32xf32>
    %c0_111 = arith.constant 0 : index
    %c0_112 = arith.constant 0 : index
    %c0_113 = arith.constant 0 : index
    %380 = vector.load %arg9[%c0_111, %c0_112, %c0_113] : memref<1x15x32xf32, #tpu.memory_space<vmem>>, vector<1x15x32xf32>
    %381 = vector.shape_cast %380 : vector<1x15x32xf32> to vector<15x32xf32>
    %382 = vector.shape_cast %360 : vector<15x32xf32> to vector<1x15x32xf32>
    tpu.vector_store %arg9[%c0_111, %c0_112, %c0_113], %382 {strides = array<i32>} : memref<1x15x32xf32, #tpu.memory_space<vmem>>, vector<1x15x32xf32>,
    %c0_114 = arith.constant 0 : index
    %c0_115 = arith.constant 0 : index
    %c0_116 = arith.constant 0 : index
    %383 = vector.load %arg10[%c0_114, %c0_115, %c0_116] : memref<1x34x32xf32, #tpu.memory_space<vmem>>, vector<1x34x32xf32>
    %384 = vector.shape_cast %383 : vector<1x34x32xf32> to vector<34x32xf32>
    %385 = vector.shape_cast %379 : vector<34x32xf32> to vector<1x34x32xf32>
    tpu.vector_store %arg10[%c0_114, %c0_115, %c0_116], %385 {strides = array<i32>} : memref<1x34x32xf32, #tpu.memory_space<vmem>>, vector<1x34x32xf32>,
    %386 = tpu.transpose %287, [0, 2, 1] : vector<2x34x15xf32> -> vector<2x15x34xf32>
    %387 = tpu.concatenate %269, %288, %386 in 2 : vector<2x15x34xf32>, vector<2x15x34xf32>, vector<2x15x34xf32> -> vector<2x15x102xf32>
    %c0_117 = arith.constant 0 : index
    %c0_118 = arith.constant 0 : index
    %c0_119 = arith.constant 0 : index
    %c0_120 = arith.constant 0 : index
    %388 = vector.load %arg11[%c0_117, %c0_118, %c0_119, %c0_120] : memref<1x2x15x102xf32, #tpu.memory_space<vmem>>, vector<1x2x15x102xf32>
    %389 = vector.shape_cast %388 : vector<1x2x15x102xf32> to vector<2x15x102xf32>
    %390 = vector.shape_cast %387 : vector<2x15x102xf32> to vector<1x2x15x102xf32>
    tpu.vector_store %arg11[%c0_117, %c0_118, %c0_119, %c0_120], %390 {strides = array<i32>} : memref<1x2x15x102xf32, #tpu.memory_space<vmem>>, vector<1x2x15x102xf32>,
    return
  }
  func.func @transform_0(%arg0: i32) -> (i32, i32, i32) {
    %c0_i32 = arith.constant 0 : i32
    %c0_i32_0 = arith.constant 0 : i32
    %c0_i32_1 = arith.constant 0 : i32
    return %arg0, %c0_i32, %c0_i32_0 : i32, i32, i32
  }
  func.func @transform_1(%arg0: i32) -> (i32, i32, i32) {
    %c0_i32 = arith.constant 0 : i32
    %c0_i32_0 = arith.constant 0 : i32
    %c0_i32_1 = arith.constant 0 : i32
    return %arg0, %c0_i32, %c0_i32_0 : i32, i32, i32
  }
  func.func @transform_2(%arg0: i32) -> (i32, i32, i32) {
    %c0_i32 = arith.constant 0 : i32
    %c0_i32_0 = arith.constant 0 : i32
    %c0_i32_1 = arith.constant 0 : i32
    return %arg0, %c0_i32, %c0_i32_0 : i32, i32, i32
  }
  func.func @transform_3(%arg0: i32) -> (i32, i32, i32) {
    %c0_i32 = arith.constant 0 : i32
    %c0_i32_0 = arith.constant 0 : i32
    %c0_i32_1 = arith.constant 0 : i32
    %c0_i32_2 = arith.constant 0 : i32
    return %c0_i32, %c0_i32_0, %c0_i32_1 : i32, i32, i32
  }
  func.func @transform_4(%arg0: i32) -> (i32, i32, i32) {
    %c0_i32 = arith.constant 0 : i32
    %c0_i32_0 = arith.constant 0 : i32
    %c0_i32_1 = arith.constant 0 : i32
    %c0_i32_2 = arith.constant 0 : i32
    return %c0_i32, %c0_i32_0, %c0_i32_1 : i32, i32, i32
  }
  func.func @transform_5(%arg0: i32) -> (i32, i32, i32) {
    %c0_i32 = arith.constant 0 : i32
    %c0_i32_0 = arith.constant 0 : i32
    %c0_i32_1 = arith.constant 0 : i32
    %c0_i32_2 = arith.constant 0 : i32
    return %c0_i32, %c0_i32_0, %c0_i32_1 : i32, i32, i32
  }
  func.func @transform_6(%arg0: i32) -> (i32, i32) {
    %c0_i32 = arith.constant 0 : i32
    %c0_i32_0 = arith.constant 0 : i32
    %c0_i32_1 = arith.constant 0 : i32
    return %c0_i32, %c0_i32_0 : i32, i32
  }
  func.func @transform_7(%arg0: i32) -> (i32, i32) {
    %c0_i32 = arith.constant 0 : i32
    %c0_i32_0 = arith.constant 0 : i32
    %c0_i32_1 = arith.constant 0 : i32
    return %c0_i32, %c0_i32_0 : i32, i32
  }
  func.func @transform_8(%arg0: i32) -> (i32, i32, i32) {
    %c0_i32 = arith.constant 0 : i32
    %c0_i32_0 = arith.constant 0 : i32
    %c0_i32_1 = arith.constant 0 : i32
    return %arg0, %c0_i32, %c0_i32_0 : i32, i32, i32
  }
  func.func @transform_9(%arg0: i32) -> (i32, i32, i32) {
    %c0_i32 = arith.constant 0 : i32
    %c0_i32_0 = arith.constant 0 : i32
    %c0_i32_1 = arith.constant 0 : i32
    return %arg0, %c0_i32, %c0_i32_0 : i32, i32, i32
  }
  func.func @transform_10(%arg0: i32) -> (i32, i32, i32, i32) {
    %c0_i32 = arith.constant 0 : i32
    %c0_i32_0 = arith.constant 0 : i32
    %c0_i32_1 = arith.constant 0 : i32
    %c0_i32_2 = arith.constant 0 : i32
    return %arg0, %c0_i32, %c0_i32_0, %c0_i32_1 : i32, i32, i32, i32
  }
}

</mosaic_0001>

<bundles_post_ra>
// kernel: intercoder_layer_forward.1
= control target key start
LH: loop header
LB: loop body
LE: loop exit
PB: predicated region body
PF: predicated region fallthrough
CT: control target
= control target key end

     0   :  { %s5112_s13 = smov 0   ;;  %s6467_s0 = inlined_call_operand.vmem [shape: f32[2,15,32], index: 0, kind: input, shape index: {}]   ;;  %s6468_s1 = inlined_call_operand.vmem [shape: f32[2,34,32], index: 1, kind: input, shape index: {}]   ;;  %s6469_s2 = inlined_call_operand.vmem [shape: f32[2,15,102], index: 2, kind: input, shape index: {}]   ;;  %s6470_s3 = inlined_call_operand.vmem [shape: f32[2,15,3], index: 3, kind: input, shape index: {}]   ;;  %s6471_s4 = inlined_call_operand.vmem [shape: f32[2,32,48], index: 4, kind: input, shape index: {}]   ;;  %s6472_s5 = inlined_call_operand.vmem [shape: f32[2,8,64], index: 5, kind: input, shape index: {}]   ;;  %s6473_s6 = inlined_call_operand.vmem [shape: f32[32,128], index: 6, kind: input, shape index: {}]   ;;  %s6474_s7 = inlined_call_operand.vmem [shape: f32[64,64], index: 7, kind: input, shape index: {}]   ;;  %s6475_s8 = inlined_call_operand.vmem [shape: f32[2,15,32], index: 8, kind: output, shape index: {0}]   ;;  %s6476_s9 = inlined_call_operand.vmem [shape: f32[2,34,32], index: 9, kind: output, shape index: {1}]   ;;  %s6477_s10 = inlined_call_operand.vmem [shape: f32[2,2,15,102], index: 10, kind: output, shape index: {2}]  }
   0x1 LB: > { %s4157_s14 = sadd.s32 4294967295, %s5039_s13   ;;  %p4161_p0 = scmp.ge.s32.totalorder %s5039_s13, 1  ;;  %s5039_s13 = sphi %s5112_s13, %s21_s13  }
   0x2   : > { %p337_p1 = scmp.lt.s32.totalorder %s5039_s13, 3 }
   0x4   : > { %p338_p2 = pnand %p4161_p0, %p337_p1 }
   0x5   : > { %p395_p3 = scmp.lt.s32.totalorder (!%p338_p2), %s4157_s14, 1  ;;  %s5041_s19 = smov (!%p338_p2), 104  }
   0x6   : > { %341 = sbr.rel (%p338_p2) target bundleno = 4195 (0x1063), region = 52  ;;  %s5047_s12 = smov (!%p338_p2), 112  }
   0x7   : > { %s5048_s15 = smov (!%p338_p2), 120   ;;  %s5049_s20 = smov (!%p338_p2), 3  }
   0x8   : > { %s5051_s21 = smov (!%p338_p2), 94   ;;  %s5052_s27 = smov (!%p338_p2), 96  }
   0x9   : > { %s5054_s23 = smov (!%p338_p2), 60   ;;  %s5056_s24 = smov (!%p338_p2), 68  }
   0xb   : > { %v437_v0 = vld [vmem:[%s6471_s4 + $0x18] sm:$0xff]  ;;  %v435_v1 = vld [vmem:[%s6471_s4 + $0x8] sm:$0xff]  ;;  %v436_v3 = vld [vmem:[%s6471_s4 + $0x10] sm:$0xff]  ;;  %s6491_s14 = smov (!%p395_p3, %s4157_s14), 1  ;;  %vm442_vm0 = vcmask 261120   ;;  %v6482_v10 = vmov 0.0   ;;  %v1247_v35 = vlaneseq }
   0xc   : > { %609 = vrot.lane.b32.xlu0 %v437_v0, %s5041_s19  ;;  %605 = vrot.lane.b32.xlu1 %v435_v1, %s5041_s19  ;;  %v441_v2 = vld [vmem:[%s6471_s4 + $0x38] sm:$0xff]  ;;  %v434_v4 = vld [vmem:[%s6471_s4] sm:$0xff]  ;;  %s5143_s28 = sshll.u32 %s6491_s14, 4  ;;  %vm5043_vm1 = vmmov 0   ;;  %v6484_v12 = vmov 1   ;;  %v6478_v14 = vmov 0  }
   0xd   : > { %4465 = vmatprep.subr.mxu0 %v437_v0  ;;  %4476 = vmatprep.subr.mxu1 %v441_v2  ;;  %v440_v5 = vld [vmem:[%s6471_s4 + $0x30] sm:$0xff]  ;;  %s5151_s11 = scalar_lea.vmem %s6467_s0, %s5143_s28  ;;  %v439_v7 = vld [vmem:[%s6471_s4 + $0x28] sm:$0xff]  ;;  %v438_v9 = vld [vmem:[%s6471_s4 + $0x20] sm:$0xff]  ;;  %v6480_v16 = vmov 2   ;;  %s4829_s26 = smul.u32 40, %s6491_s14  ;;  %vm826_vm2 = vcmask 64512  }
   0xe   : > { %4466 = vmatpush3.msra.mxu0 %v437_v0  ;;  %4477 = vmatpush3.msra.mxu1 %v441_v2  ;;  %v425_v6 = vld [vmem:[%s5151_s11] sm:$0xff]  ;;  %v426_v8 = vld [vmem:[%s5151_s11 + $0x8] sm:$0x7f]  ;;  %v5196_v15 = vld [vmem:[%s6470_s3 + $0x10] sm:$0xff]  ;;  %v5278_v37 = vand.u32 127, %v1247_v35  ;;  %s5418_s18 = scalar_lea.vmem %s6469_s2, %s5143_s28  ;;  %vm1480_vm12 = vcmask 276480   ;;  %s6410_s29 = scalar_lea.vmem %s6475_s8, %s5143_s28 }
   0xf   : > { %4467 = vmatprep.subr.mxu0 %v436_v3  ;;  %4478 = vmatprep.subr.mxu1 %v440_v5  ;;  %v5178_v11 = vld [vmem:[%s6470_s3] sm:$0xff]  ;;  %v5184_v13 = vld [vmem:[%s6470_s3 + $0x8] sm:$0x7f]  ;;  %v5204_v17 = vld [vmem:[%s6470_s3 + $0x18] sm:$0x7f]  ;;  %s5225_s30 = scalar_lea.vmem %s6468_s1, %s4829_s26  ;;  %vm1476_vm14 = vcmask 277504  }
  0x10   : > { %607 = vrot.lane.b32.xlu0 %v436_v3, %s5041_s19  ;;  %603 = vrot.lane.b32.xlu1 %v434_v4, %s5041_s19  ;;  %v427_v22 = vld [vmem:[%s5225_s30] sm:$0xff]  ;;  %v428_v25 = vld [vmem:[%s5225_s30 + $0x8] sm:$0xff]  ;;  %vm1249_vm3 = vcmp.lt.s32.totalorder %v5278_v37, 4  ;;  %vm1260_vm4 = vcmp.ge.s32.totalorder %v5278_v37, 18  ;;  %vm1261_vm5 = vcmp.lt.s32.totalorder %v5278_v37, 24  ;;  %vm1251_vm7 = vcmp.lt.s32.totalorder %v5278_v37, 18 }
  0x11   : > { %4468 = vmatpush3.msra.mxu0 %v436_v3  ;;  %4479 = vmatpush3.msra.mxu1 %v440_v5  ;;  %v429_v28 = vld [vmem:[%s5225_s30 + $0x10] sm:$0xff]  ;;  %v430_v29 = vld [vmem:[%s5225_s30 + $0x18] sm:$0xff]  ;;  %v431_v30 = vld [vmem:[%s5225_s30 + $0x20] sm:$0x3]  ;;  %vm1256_vm8 = vcmp.ge.s32.totalorder %v5278_v37, 4  ;;  %vm1266_vm11 = vcmp.ge.s32.totalorder %v5278_v37, 24 }
  0x12   : > { %4469 = vmatprep.subr.mxu0 %v435_v1  ;;  %4473 = vmatprep.mubr.msk.f32.mxu0 %vm442_vm0, %v425_v6  ;;  %vm1262_vm6 = vmand %vm1260_vm4, %vm1261_vm5  ;;  %v5301_v46 = vsel %vm1266_vm11, 1.0, %v6482_v10  ;;  %vm1336_vm5 = vcmp.eq.s32.totalorder %v5278_v37, 2  ;;  %vm1331_vm11 = vcmp.eq.s32.totalorder %v5278_v37, 3  ;;  %s4294_s28 = sshll.u32 %s6491_s14, 5 }
  0x13   : > { %4470 = vmatpush3.msra.mxu0 %v435_v1  ;;  %4480 = vmatprep.subr.mxu1 %v439_v7  ;;  %vm1263_vm9 = vmor %vm1249_vm3, %vm1262_vm6  ;;  %vm1337_vm6 = vcmp.eq.s32.totalorder %v5278_v37, 5  ;;  %s6435_s16 = scalar_lea.vmem %s6477_s10, %s4294_s28 }
  0x14   : > { %730 = vrot.lane.b32.xlu0 %v441_v2, %s5041_s19  ;;  %728 = vrot.lane.b32.xlu1 %v440_v5, %s5041_s19  ;;  %v5288_v39 = vsel %vm1263_vm9, 1.0, %v6482_v10  ;;  %vm1257_vm10 = vmand %vm1256_vm8, %vm1251_vm7  ;;  %vm1334_vm8 = vcmp.eq.s32.totalorder %v5278_v37, 4 }
  0x15   : > { %4471 = vmatprep.subr.mxu0 %v434_v4  ;;  %4481 = vmatpush3.msra.mxu1 %v439_v7  ;;  %v5293_v41 = vsel %vm1257_vm10, 1.0, %v6482_v10  ;;  %vm1338_vm9 = vmor %vm1336_vm5, %vm1337_vm6  ;;  %vm1330_vm10 = vcmp.eq.s32.totalorder %v5278_v37, 0  ;;  %vm1357_vm5 = vcmp.lt.s32.totalorder %v5278_v37, 3 }
  0x16   : > { %4472 = vmatpush3.msra.mxu0 %v434_v4  ;;  %4482 = vmatprep.subr.mxu1 %v438_v9 }
  0x17   : > { %4487 = vmatprep.subr.mxu0 %v6482_v10  ;;  %4474 = vmatmul.mubr.msk.f32.vlgmr.msra.gmra.mxu0 %vm442_vm0, %v426_v8 }
  0x18   : > { %726 = vrot.lane.b32.xlu0 %v439_v7, %s5041_s19  ;;  %724 = vrot.lane.b32.xlu1 %v438_v9, %s5041_s19  ;;  %s5050_s19 = smov 125  }
  0x19   : > { %4483 = vmatpush3.msra.mxu1 %v438_v9  ;;  %4484 = vmatprep.mubr.msk.f32.mxu1 %vm442_vm0, %v425_v6 }
  0x1a   : > { %4485 = vmatmul.mubr.msk.f32.vlgmr.msra.gmra.mxu1 %vm442_vm0, %v426_v8  ;;  %4510 = vmatprep.subr.mxu1 %v6482_v10 }
  0x1b   : > { %4495 = vmatprep.mubr.msk.f32.mxu0 %vm5043_vm1, %v6482_v10  ;;  %4518 = vmatprep.mubr.msk.f32.mxu1 %vm5043_vm1, %v6482_v10 }
  0x1c   : > { %4854 = vset.pattern.permute.xlu1 %v6484_v12  ;;  %4856 = vset.pattern.permute.xlu0 %v6484_v12 }
  0x1d   : > { %1397 = vperm.xlu1 %4854, %v5178_v11   ;;  %1401 = vperm.xlu0 %4856, %v5184_v13  }
  0x21   : > { %4855 = vset.pattern.permute.xlu1 %v6478_v14  ;;  %4857 = vset.pattern.permute.xlu0 %v6478_v14 }
  0x22   : > { %1379 = vperm.xlu1 %4855, %v5184_v13   ;;  %1374 = vperm.xlu0 %4857, %v5178_v11  }
  0x26   : > { %4858 = vset.pattern.permute.xlu1 %v6480_v16  ;;  %1384 = vperm.xlu0 %4857, %v5196_v15  }
  0x27   : > { %1421 = vperm.xlu1 %4858, %v5178_v11  }
  0x2a   : > { %4861 = vset.pattern.permute.xlu0 %v6484_v12 }
  0x2b   : > { %1425 = vperm.xlu1 %4858, %v5184_v13   ;;  %1409 = vperm.xlu0 %4861, %v5204_v17  }
  0x2f   : > { %4859 = vset.pattern.permute.xlu1 %v6484_v12  ;;  %4863 = vset.pattern.permute.xlu0 %v6478_v14 }
  0x30   : > { %1405 = vperm.xlu1 %4859, %v5196_v15  }
  0x34   : > { %4860 = vset.pattern.permute.xlu1 %v6478_v14 }
  0x35   : > { %1389 = vperm.xlu1 %4860, %v5204_v17  }
  0x39   : > { %4862 = vset.pattern.permute.xlu1 %v6480_v16 }
  0x3a   : > { %1429 = vperm.xlu1 %4862, %v5196_v15  }
  0x3e   : > { %1433 = vperm.xlu1 %4862, %v5204_v17  }
  0x42   : > { %4865 = vset.pattern.permute.xlu1 %v6478_v14 }
  0x7e   : > { %v610_v18 = vpop.permute.xlu0 %609  ;;  %v606_v19 = vpop.permute.xlu1 %605 }
  0x7f   : > { %4488 = vmatpush3.msra.mxu0 %v610_v18 }
  0x80   : > { %4489 = vmatprep.subr.mxu0 %v6482_v10 }
  0x82   : > { %v608_v20 = vpop.permute.xlu0 %607  ;;  %v604_v21 = vpop.permute.xlu1 %603 }
  0x83   : > { %4490 = vmatpush3.msra.mxu0 %v608_v20 }
  0x84   : > { %4491 = vmatprep.subr.mxu0 %v6482_v10 }
  0x85   : > { %4492 = vmatpush3.msra.mxu0 %v606_v19 }
  0x86   : > { %v731_v23 = vpop.permute.xlu0 %730  ;;  %4493 = vmatprep.subr.mxu0 %v6482_v10  ;;  %v729_v24 = vpop.permute.xlu1 %728 }
  0x87   : > { %4494 = vmatpush3.msra.mxu0 %v604_v21  ;;  %4511 = vmatpush3.msra.mxu1 %v731_v23 }
  0x88   : > { %4496 = vmatmul.mubr.msk.f32.vlgmr.msra.gmra.mxu0 %vm442_vm0, %v427_v22  ;;  %4512 = vmatprep.subr.mxu1 %v6482_v10 }
  0x89   : > { %4513 = vmatpush3.msra.mxu1 %v729_v24  ;;  %4498 = vmatprep.mubr.msk.f32.mxu0 %vm5043_vm1, %v6482_v10 }
  0x8a   : > { %v727_v26 = vpop.permute.xlu0 %726  ;;  %4514 = vmatprep.subr.mxu1 %v6482_v10  ;;  %v725_v27 = vpop.permute.xlu1 %724 }
  0x8b   : > { %4515 = vmatpush3.msra.mxu1 %v727_v26  ;;  %v4214_v26 = vadd.s32 4294967292, %v5278_v37 }
  0x8c   : > { %4499 = vmatmul.mubr.msk.f32.gmra.mxu0 %vm442_vm0, %v428_v25  ;;  %4516 = vmatprep.subr.mxu1 %v6482_v10 }
  0x8d   : > { %4517 = vmatpush3.msra.mxu1 %v725_v27  ;;  %4501 = vmatprep.mubr.msk.f32.mxu0 %vm5043_vm1, %v6482_v10 }
  0x8e   : > { %4519 = vmatmul.mubr.msk.f32.vlgmr.msra.gmra.mxu1 %vm442_vm0, %v427_v22 }
  0x8f   : > { %4521 = vmatprep.mubr.msk.f32.mxu1 %vm5043_vm1, %v6482_v10 }
  0x90   : > { %4502 = vmatmul.mubr.msk.f32.gmra.mxu0 %vm442_vm0, %v429_v28 }
  0x91   : > { %4504 = vmatprep.mubr.msk.f32.mxu0 %vm5043_vm1, %v6482_v10 }
  0x92   : > { %4522 = vmatmul.mubr.msk.f32.gmra.mxu1 %vm442_vm0, %v428_v25 }
  0x93   : > { %4524 = vmatprep.mubr.msk.f32.mxu1 %vm5043_vm1, %v6482_v10 }
  0x94   : > { %4505 = vmatmul.mubr.msk.f32.gmra.mxu0 %vm442_vm0, %v430_v29 }
  0x95   : > { %4507 = vmatprep.mubr.msk.f32.mxu0 %vm5043_vm1, %v6482_v10 }
  0x96   : > { %4525 = vmatmul.mubr.msk.f32.gmra.mxu1 %vm442_vm0, %v429_v28 }
  0x97   : > { %4527 = vmatprep.mubr.msk.f32.mxu1 %vm5043_vm1, %v6482_v10 }
  0x98   : > { %4508 = vmatmul.mubr.msk.f32.gmra.mxu0 %vm442_vm0, %v431_v30  ;;  %v5275_v36 = vpop.permute.xlu1 %1397  ;;  %v1402_v40 = vpop.permute.xlu0 %1401 }
  0x99   : > { %v1413_v43 = vmul.f32 %v5288_v39, %v1402_v40  ;;  %v1412_v27 = vmul.f32 %v5288_v39, %v5275_v36 }
  0x9a   : > { %4528 = vmatmul.mubr.msk.f32.gmra.mxu1 %vm442_vm0, %v430_v29  ;;  %v1250_v29 = vadd.s32 14, %v5278_v37 }
  0x9b   : > { %4530 = vmatprep.mubr.msk.f32.mxu1 %vm5043_vm1, %v6482_v10 }
  0x9d   : > { %v1380_v38 = vpop.permute.xlu1 %1379  ;;  %v1375_v7 = vpop.permute.xlu0 %1374 }
  0x9e   : > { %4531 = vmatmul.mubr.msk.f32.gmra.mxu1 %vm442_vm0, %v431_v30  ;;  %v1393_v44 = vmul.f32 %v5293_v41, %v1380_v38  ;;  %v1392_v28 = vmul.f32 %v5293_v41, %v1375_v7  ;;  %v1253_v30 = vsel %vm1251_vm7, %v4214_v26, %v5278_v37  ;;  %vm1333_vm7 = vcmp.eq.s32.totalorder %v5278_v37, 1 }
  0xa0   : > { %v1417_v45 = vadd.f32 %v1413_v43, %v1393_v44  ;;  %v1416_v40 = vadd.f32 %v1412_v27, %v1392_v28 }
  0xa1   : > { %v1385_v9 = vpop.permute.xlu0 %1384 }
  0xa2   : > { %v5295_v42 = vpop.permute.xlu1 %1421 }
  0xa3   : > { %v1436_v38 = vmul.f32 %v5301_v46, %v5295_v42 }
  0xa6   : > { %v1426_v47 = vpop.permute.xlu1 %1425  ;;  %v1410_v19 = vpop.permute.xlu0 %1409 }
  0xa7   : > { %v1437_v48 = vmul.f32 %v5301_v46, %v1426_v47  ;;  %v1415_v44 = vmul.f32 %v5288_v39, %v1410_v19  ;;  %v1394_v47 = vmul.f32 %v5293_v41, %v1385_v9 }
  0xa9   : > { %v5304_v49 = vadd.f32 %v1437_v48, %v1417_v45  ;;  %v1254_v45 = vsel %vm1249_vm3, %v1250_v29, %v1253_v30  ;;  %v5421_v29 = vld [vmem:[%s5418_s18 + $0x8] sm:$0x7f] }
  0xaa   : > { %v5405_v48 = vcvt.s32.f32 %v1254_v45 }
  0xab   : > { %v1406_v6 = vpop.permute.xlu1 %1405 }
  0xac   : > { %v1414_v36 = vmul.f32 %v5288_v39, %v1406_v6  ;;  %v1445_v42 = vsub.f32 %v5304_v49, %v5405_v48 }
  0xb0   : > { %v1390_v8 = vpop.permute.xlu1 %1389 }
  0xb1   : > { %v1395_v43 = vmul.f32 %v5293_v41, %v1390_v8 }
  0xb5   : > { %v1430_v18 = vpop.permute.xlu1 %1429 }
  0xb9   : > { %v1434_v20 = vpop.permute.xlu1 %1433 }
  0xd7   : > { %v5263_v31 = vpop.f32.mrf.mxu0 }
  0xd9   : > { %v5265_v32 = vpop.f32.mrf.mxu0 }
  0xda   : > { %4543 = vmatprep.mubr.msk.f32.mxu0 %vm826_vm2, %v5265_v32  ;;  %v5269_v33 = vpop.f32.mrf.mxu1 }
  0xdc   : > { %v5271_v34 = vpop.f32.mrf.mxu1 }
  0xdd   : > { %4556 = vmatprep.mubr.msk.f32.mxu1 %vm826_vm2, %v5271_v34 }
 0x148   : > { %v5306_v50 = vpop.f32.mrf.mxu0 }
 0x14a   : > { %v4497_v51 = vpop.f32.mrf.mxu0 }
 0x14b   : > { %v1440_v51 = vadd.f32 %v1436_v38, %v1416_v40  ;;  %v5426_v40 = vld [vmem:[%s5418_s18] sm:$0xff] }
 0x14c   : > { %v5308_v52 = vpop.f32.mrf.mxu0 }
 0x14d   : > { %1029 = vrot.lane.b32.xlu0 %v5308_v52, %s5047_s12 }
 0x14e   : > { %v5312_v53 = vpop.f32.mrf.mxu1  ;;  %v4500_v54 = vpop.f32.mrf.mxu0 }
 0x14f   : > { %v1419_v54 = vadd.f32 %v1415_v44, %v1395_v43 }
 0x150   : > { %v5314_v55 = vpop.f32.mrf.mxu0  ;;  %v4520_v56 = vpop.f32.mrf.mxu1 }
 0x151   : > { %1031 = vrot.lane.b32.xlu1 %v5314_v55, %s5047_s12  ;;  %v1439_v56 = vmul.f32 %v5301_v46, %v1434_v20 }
 0x152   : > { %v5318_v57 = vpop.f32.mrf.mxu1  ;;  %v4503_v58 = vpop.f32.mrf.mxu0 }
 0x153   : > { %v1418_v58 = vadd.f32 %v1414_v36, %v1394_v47 }
 0x154   : > { %v5320_v59 = vpop.f32.mrf.mxu0  ;;  %v4523_v60 = vpop.f32.mrf.mxu1 }
 0x155   : > { %1033 = vrot.lane.b32.xlu1 %v5320_v59, %s5047_s12  ;;  %v1438_v60 = vmul.f32 %v5301_v46, %v1430_v18 }
 0x156   : > { %v5324_v61 = vpop.f32.mrf.mxu1  ;;  %v4506_v62 = vpop.f32.mrf.mxu0 }
 0x157   : > { %v1444_v62 = vsub.f32 %v1440_v51, %v5405_v48 }
 0x158   : > { %v5326_v63 = vpop.f32.mrf.mxu0  ;;  %v4526_v0 = vpop.f32.mrf.mxu1 }
 0x159   : > { %1035 = vrot.lane.b32.xlu0 %v5326_v63, %s5047_s12  ;;  %4533 = vmatprep.subr.msk.mxu0 %vm826_vm2, %v5326_v63  ;;  %v1443_v0 = vadd.f32 %v1439_v56, %v1419_v54  ;;  %v1448_v6 = vmul.f32 %v1444_v62, %v1444_v62 }
 0x15a   : > { %v4509_v1 = vpop.f32.mrf.mxu0  ;;  %v5332_v2 = vpop.f32.mrf.mxu1  ;;  %4534 = vmatpush3.xpose.msk.msra.mxu0 %vm826_vm2, %v5326_v63 }
 0x15b   : > { %4535 = vmatprep.subr.msk.mxu0 %vm826_vm2, %v5320_v59  ;;  %v1449_v1 = vmul.f32 %v1445_v42, %v1445_v42  ;;  %v1452_v19 = vsub.f32 0.0, %v1448_v6 }
 0x15c   : > { %v4529_v3 = vpop.f32.mrf.mxu1 }
 0x15d   : > { %1023 = vrot.lane.b32.xlu0 %v5265_v32, %s5048_s15  ;;  %v1442_v3 = vadd.f32 %v1438_v60, %v1418_v58  ;;  %v1453_v7 = vsub.f32 0.0, %v1449_v1 }
 0x15e   : > { %v5340_v4 = vpop.f32.mrf.mxu1  ;;  %4536 = vmatpush3.xpose.msk.msra.mxu0 %vm826_vm2, %v5320_v59 }
 0x15f   : > { %4537 = vmatprep.subr.msk.mxu0 %vm826_vm2, %v5314_v55  ;;  %4546 = vmatprep.subr.msk.mxu1 %vm826_vm2, %v5340_v4  ;;  %v1446_v8 = vsub.f32 %v1442_v3, %v5405_v48  ;;  %v1457_v20 = vmul.f32 0.5, %v1453_v7 }
 0x160   : > { %v4532_v5 = vpop.f32.mrf.mxu1  ;;  %4547 = vmatpush3.xpose.msk.msra.mxu1 %vm826_vm2, %v5340_v4 }
 0x161   : > { %4548 = vmatprep.subr.msk.mxu1 %vm826_vm2, %v5332_v2  ;;  %v1447_v5 = vsub.f32 %v1443_v0, %v5405_v48  ;;  %v1462_v18 = vmul.f32 1.442695, %v1457_v20 }
 0x162   : > { %4538 = vmatpush3.xpose.msk.msra.mxu0 %vm826_vm2, %v5314_v55 }
 0x163   : > { %4539 = vmatprep.subr.msk.mxu0 %vm826_vm2, %v5308_v52  ;;  %v1451_v9 = vmul.f32 %v1447_v5, %v1447_v5  ;;  %4884 = vpow2.f32 %v1462_v18 }
 0x164   : > { %4549 = vmatpush3.xpose.msk.msra.mxu1 %vm826_vm2, %v5332_v2 }
 0x165   : > { %4550 = vmatprep.subr.msk.mxu1 %vm826_vm2, %v5324_v61  ;;  %v1455_v49 = vsub.f32 0.0, %v1451_v9  ;;  %v1270_v9 = vshrl.u32 %v1247_v35, 7 }
 0x166   : > { %4540 = vmatpush3.xpose.msk.msra.mxu0 %vm826_vm2, %v5308_v52 }
 0x167   : > { %4541 = vmatprep.subr.msk.mxu0 %vm826_vm2, %v5306_v50  ;;  %vm1275_vm6 = vcmp.lt.s32.totalorder %v1270_v9, 4 }
 0x168   : > { %4551 = vmatpush3.xpose.msk.msra.mxu1 %vm826_vm2, %v5324_v61 }
 0x169   : > { %4552 = vmatprep.subr.msk.mxu1 %vm826_vm2, %v5318_v57 }
 0x16a   : > { %4542 = vmatpush3.xpose.msk.msra.mxu0 %vm826_vm2, %v5306_v50 }
 0x16c   : > { %4553 = vmatpush3.xpose.msk.msra.mxu1 %vm826_vm2, %v5318_v57 }
 0x16d   : > { %4544 = vmatmul.mubr.msk.f32.vlgmr.msra.gmra.mxu0 %vm826_vm2, %v5263_v31  ;;  %4554 = vmatprep.subr.msk.mxu1 %vm826_vm2, %v5312_v53 }
 0x170   : > { %4555 = vmatpush3.xpose.msk.msra.mxu1 %vm826_vm2, %v5312_v53  ;;  %v4885_v30 = vpop.eup %4884 }
 0x171   : > { %vm1469_vm13 = vcmp.lt.f32.partialorder %v4885_v30, 0.60653067  ;;  %v1271_v30 = vadd.s32 8, %v1270_v9 }
 0x173   : > { %4557 = vmatmul.mubr.msk.f32.vlgmr.msra.gmra.mxu1 %vm826_vm2, %v5269_v33 }
 0x1bf   : > { %v1030_v21 = vpop.permute.xlu0 %1029 }
 0x1c3   : > { %v1032_v22 = vpop.permute.xlu1 %1031 }
 0x1c7   : > { %v1034_v24 = vpop.permute.xlu1 %1033 }
 0x1cb   : > { %v1036_v23 = vpop.permute.xlu0 %1035 }
 0x1cc   : > { %4559 = vmatprep.subr.msk.mxu0 %vm826_vm2, %v1036_v23 }
 0x1cd   : > { %4560 = vmatpush3.xpose.msk.msra.mxu0 %vm826_vm2, %v1036_v23 }
 0x1ce   : > { %4561 = vmatprep.subr.msk.mxu0 %vm826_vm2, %v1034_v24 }
 0x1cf   : > { %v1024_v25 = vpop.permute.xlu0 %1023 }
 0x1d0   : > { %4569 = vmatprep.mubr.msk.f32.mxu0 %vm826_vm2, %v1024_v25  ;;  %v1459_v25 = vmul.f32 0.5, %v1455_v49  ;;  %v1274_v49 = vadd.s32 32, %v1270_v9 }
 0x1d1   : > { %4562 = vmatpush3.xpose.msk.msra.mxu0 %vm826_vm2, %v1034_v24 }
 0x1d2   : > { %4563 = vmatprep.subr.msk.mxu0 %vm826_vm2, %v1032_v22  ;;  %v1466_v27 = vmul.f32 1.442695, %v1459_v25 }
 0x1d5   : > { %4564 = vmatpush3.xpose.msk.msra.mxu0 %vm826_vm2, %v1032_v22  ;;  %v1456_v22 = vmul.f32 0.5, %v1452_v19 }
 0x1d6   : > { %4565 = vmatprep.subr.msk.mxu0 %vm826_vm2, %v1030_v21 }
 0x1d7   : > { %v1460_v24 = vmul.f32 1.442695, %v1456_v22 }
 0x1d9   : > { %4566 = vmatpush3.xpose.msk.msra.mxu0 %vm826_vm2, %v1030_v21  ;;  %v1450_v21 = vmul.f32 %v1446_v8, %v1446_v8  ;;  %4886 = vpow2.f32 %v1460_v24  ;;  %v1339_v8 = vsel %vm1338_vm9, 3, %v6478_v14  ;;  %v1325_v14 = vsel %vm1275_vm6, 2, %v6484_v12 }
 0x1da   : > { %4888 = vpow2.f32 %v1466_v27  ;;  %v1273_v27 = vadd.s32 24, %v1270_v9  ;;  %vm1512_vm9 = vcmask 1041408  }
 0x1db   : > { %v1454_v23 = vsub.f32 0.0, %v1450_v21  ;;  %v1272_v21 = vadd.s32 16, %v1270_v9 }
 0x1dd   : > { %v1458_v26 = vmul.f32 0.5, %v1454_v23  ;;  %v1309_v23 = vcvt.s32.f32 %v1274_v49  ;;  %v4220_v18 = vadd.s32 4294967292, %v1272_v21 }
 0x1df   : > { %v1464_v28 = vmul.f32 1.442695, %v1458_v26 }
 0x1e1   : > { %4890 = vpow2.f32 %v1464_v28 }
 0x1e6   : > { %v4887_v43 = vpop.eup %4886 }
 0x1e7   : > { %vm1468_vm15 = vcmp.lt.f32.partialorder %v4887_v43, 0.60653067  ;;  %v4889_v54 = vpop.eup %4888 }
 0x1e8   : > { %vm1471_vm3 = vcmp.lt.f32.partialorder %v4889_v54, 0.60653067 }
 0x1ee   : > { %v4891_v60 = vpop.eup %4890 }
 0x1ef   : > { %vm1470_vm4 = vcmp.lt.f32.partialorder %v4891_v60, 0.60653067  ;;  %v1280_v60 = vadd.s32 14, %v1270_v9 }
 0x22d   : > { %v5423_v38 = vpop.f32.mrf.mxu0 }
 0x22e   : > { %v5430_v44 = vadd.f32 %v5423_v38, %v5421_v29 }
 0x22f   : > { %v5432_v45 = vpop.f32.mrf.mxu0 }
 0x230   : > { %v5436_v36 = vadd.f32 %v5432_v45, %v5426_v40  ;;  %v1473_v47 = vsel %vm1469_vm13, -inf, %v5430_v44  ;;  %vm1335_vm13 = vmor %vm1333_vm7, %vm1334_vm8 }
 0x231   : > { %v1481_v51 = vsel %vm1480_vm12, %v1473_v47, -inf  ;;  %v1340_v19 = vsel %vm1335_vm13, 2, %v1339_v8  ;;  %v1308_v8 = vcvt.s32.f32 %v1273_v27 }
 0x232   : > { %1482 = vmax.xlane.f32.xlu1 %v1481_v51  ;;  %v1472_v56 = vsel %vm1468_vm15, -inf, %v5436_v36  ;;  %vm1332_vm15 = vmor %vm1330_vm10, %vm1331_vm11 }
 0x233   : > { %v5441_v42 = vpop.f32.mrf.mxu1  ;;  %v1477_v58 = vsel %vm1476_vm14, %v1472_v56, -inf  ;;  %v1341_v20 = vsel %vm1332_vm15, 1, %v1340_v19  ;;  %v4219_v19 = vadd.s32 4294967292, %v1271_v30 }
 0x234   : > { %v5446_v62 = vadd.f32 %v5441_v42, %v5421_v29  ;;  %1478 = vmax.xlane.f32.xlu0 %v1477_v58  ;;  %vm4223_vm8 = vcmp.eq.s32.totalorder %v1341_v20, 1  ;;  %vm1342_vm10 = vcmp.eq.s32.totalorder %v1325_v14, %v1341_v20 }
 0x235   : > { %v5448_v0 = vpop.f32.mrf.mxu1 }
 0x236   : > { %v5452_v1 = vadd.f32 %v5448_v0, %v5426_v40  ;;  %v5455_v3 = vsel %vm1471_vm3, -inf, %v5446_v62  ;;  %vm4224_vm3 = vcmp.eq.s32.totalorder %v1341_v20, 3 }
 0x237   : > { %v1487_v5 = vsel %vm1480_vm12, %v5455_v3, -inf  ;;  %v4229_v25 = vsel %vm4224_vm3, 1.0, %v6482_v10 }
 0x238   : > { %1488 = vmax.xlane.f32.xlu1 %v1487_v5  ;;  %v1474_v6 = vsel %vm1470_vm4, -inf, %v5452_v1  ;;  %vm1287_vm4 = vcmp.lt.s32.totalorder %v1272_v21, 18  ;;  %v1362_v51 = vmul.f32 %v4229_v25, %v1309_v23  ;;  %v4218_v5 = vadd.s32 4294967292, %v1270_v9 }
 0x239   : > { %v1484_v7 = vsel %vm1476_vm14, %v1474_v6, -inf  ;;  %v1322_v28 = vsel %vm1287_vm4, 1, %v6480_v16  ;;  %v1297_v54 = vsel %vm1287_vm4, %v4220_v18, %v1272_v21  ;;  %v1361_v27 = vmul.f32 %v4229_v25, %v1308_v8 }
 0x23a   : > { %1485 = vmax.xlane.f32.xlu0 %v1484_v7  ;;  %vm1344_vm7 = vcmp.eq.s32.totalorder %v1322_v28, %v1341_v20  ;;  %v1307_v23 = vcvt.s32.f32 %v1297_v54  ;;  %v1306_v28 = vcvt.s32.f32 %v4219_v19  ;;  %v4226_v9 = vsel %vm1342_vm10, 1.0, %v6482_v10 }
 0x23b   : > { %v4228_v21 = vsel %vm1344_vm7, 1.0, %v6482_v10  ;;  %v5493_v14 = vsel %vm1357_vm5, %v4229_v25, %v1361_v27 }
 0x249   : > { %1027 = vrot.lane.b32.xlu1 %v5306_v50, %s5047_s12 }
 0x250   : > { %1025 = vrot.lane.b32.xlu0 %v5263_v31, %s5048_s15 }
 0x2bb   : > { %v1483_v22 = vpop.xlane.xlu1 %1482 }
 0x2bc   : > { %v1491_v24 = vmax.f32 %v1483_v22, -1e+30 }
 0x2bd   : > { %v1479_v26 = vpop.xlane.xlu0 %1478 }
 0x2be   : > { %v1495_v43 = vsub.f32 %v1473_v47, %v1491_v24  ;;  %v1490_v35 = vmax.f32 %v1479_v26, -1e+30  ;;  %v5480_v47 = vsel %vm1357_vm5, %v4229_v25, %v1362_v51  ;;  %v1300_v24 = vsel %vm1275_vm6, %v1280_v60, %v4218_v5 }
 0x2bf   : > { %v1305_v51 = vcvt.s32.f32 %v1300_v24 }
 0x2c0   : > { %v1494_v58 = vsub.f32 %v1472_v56, %v1490_v35  ;;  %v1500_v49 = vmul.f32 1.442695, %v1495_v43  ;;  %v4227_v43 = vsel %vm4223_vm8, 1.0, %v6482_v10  ;;  %v1360_v35 = vmul.f32 %v4228_v21, %v1307_v23 }
 0x2c1   : > { %v1489_v7 = vpop.xlane.xlu1 %1488  ;;  %v1358_v20 = vmul.f32 %v4226_v9, %v1305_v51 }
 0x2c2   : > { %v1498_v22 = vmul.f32 1.442695, %v1494_v58  ;;  %v1493_v56 = vmax.f32 %v1489_v7, -1e+30 }
 0x2c3   : > { %v1486_v16 = vpop.xlane.xlu0 %1485  ;;  %v5512_v5 = vsel %vm1357_vm5, %v4226_v9, %v1358_v20 }
 0x2c4   : > { %4892 = vpow2.f32 %v1498_v22  ;;  %v1492_v18 = vmax.f32 %v1486_v16, -1e+30  ;;  %v1497_v54 = vsub.f32 %v5455_v3, %v1493_v56  ;;  %v5500_v3 = vsel %vm1357_vm5, %v4228_v21, %v1360_v35 }
 0x2c5   : > { %v1028_v26 = vpop.permute.xlu1 %1027  ;;  %4894 = vpow2.f32 %v1500_v49 }
 0x2c6   : > { %v1496_v30 = vsub.f32 %v1474_v6, %v1492_v18  ;;  %4567 = vmatprep.subr.msk.mxu0 %vm826_vm2, %v1028_v26  ;;  %v1359_v6 = vmul.f32 %v4227_v43, %v1306_v28  ;;  %v1504_v60 = vmul.f32 1.442695, %v1497_v54 }
 0x2c7   : > { %4568 = vmatpush3.xpose.msk.msra.mxu0 %vm826_vm2, %v1028_v26  ;;  %v1026_v58 = vpop.permute.xlu0 %1025 }
 0x2c8   : > { %v1502_v16 = vmul.f32 1.442695, %v1496_v30  ;;  %4585 = vmatprep.subr.msk.mxu0 %vm1512_vm9, %v5480_v47  ;;  %v5506_v25 = vsel %vm1357_vm5, %v4227_v43, %v1359_v6 }
 0x2ca   : > { %4896 = vpow2.f32 %v1502_v16  ;;  %4570 = vmatmul.mubr.msk.f32.vlgmr.msra.gmra.mxu0 %vm826_vm2, %v1026_v58 }
 0x2cb   : > { %4586 = vmatpush3.msk.msra.mxu0 %vm1512_vm9, %v5480_v47  ;;  %4898 = vpow2.f32 %v1504_v60 }
 0x2cc   : > { %4587 = vmatprep.subr.mxu0 %v5493_v14 }
 0x2cd   : > { %4588 = vmatpush3.msra.mxu0 %v5493_v14 }
 0x2ce   : > { %4589 = vmatprep.subr.mxu0 %v5500_v3 }
 0x2cf   : > { %4590 = vmatpush3.msra.mxu0 %v5500_v3 }
 0x2d0   : > { %4591 = vmatprep.subr.mxu0 %v5506_v25 }
 0x2d1   : > { %v4893_v7 = vpop.eup %4892  ;;  %4592 = vmatpush3.msra.mxu0 %v5506_v25 }
 0x2d2   : > { %4593 = vmatprep.subr.mxu0 %v5512_v5  ;;  %4595 = vmatprep.mubr.msk.f32.mxu0 %vm1476_vm14, %v4893_v7  ;;  %v4895_v8 = vpop.eup %4894 }
 0x2d3   : > { %4594 = vmatpush3.msra.mxu0 %v5512_v5 }
 0x2d4   : > { %4596 = vmatmul.mubr.msk.f32.vlgmr.msra.gmra.mxu0 %vm1476_vm14, %v4895_v8  ;;  %4598 = vmatprep.subr.msk.mxu0 %vm1512_vm9, %v5480_v47 }
 0x2d5   : > { %4599 = vmatpush3.msk.msra.mxu0 %vm1512_vm9, %v5480_v47 }
 0x2d6   : > { %4600 = vmatprep.subr.mxu0 %v5493_v14 }
 0x2d7   : > { %v4897_v37 = vpop.eup %4896  ;;  %4601 = vmatpush3.msra.mxu0 %v5493_v14 }
 0x2d8   : > { %4602 = vmatprep.subr.mxu0 %v5500_v3  ;;  %4608 = vmatprep.mubr.msk.f32.mxu0 %vm1476_vm14, %v4897_v37  ;;  %v4899_v19 = vpop.eup %4898 }
 0x2d9   : > { %4603 = vmatpush3.msra.mxu0 %v5500_v3 }
 0x2da   : > { %4604 = vmatprep.subr.mxu0 %v5506_v25 }
 0x2db   : > { %4605 = vmatpush3.msra.mxu0 %v5506_v25 }
 0x2dc   : > { %4606 = vmatprep.subr.mxu0 %v5512_v5 }
 0x2dd   : > { %4607 = vmatpush3.msra.mxu0 %v5512_v5 }
 0x2de   : > { %4609 = vmatmul.mubr.msk.f32.vlgmr.msra.gmra.mxu0 %vm1476_vm14, %v4899_v19  ;;  %4611 = vmatprep.subr.msk.mxu0 %vm1512_vm9, %v5480_v47 }
 0x2df   : > { %4612 = vmatpush3.msk.msra.mxu0 %vm1512_vm9, %v5480_v47 }
 0x2e0   : > { %4613 = vmatprep.subr.mxu0 %v5493_v14 }
 0x2e1   : > { %4614 = vmatpush3.msra.mxu0 %v5493_v14 }
 0x2e2   : > { %4615 = vmatprep.subr.mxu0 %v5500_v3 }
 0x2e3   : > { %4616 = vmatpush3.msra.mxu0 %v5500_v3 }
 0x2e4   : > { %4617 = vmatprep.subr.mxu0 %v5506_v25 }
 0x2e5   : > { %4618 = vmatpush3.msra.mxu0 %v5506_v25 }
 0x2e6   : > { %4619 = vmatprep.subr.mxu0 %v5512_v5 }
 0x2e7   : > { %4620 = vmatpush3.msra.mxu0 %v5512_v5 }
 0x38a   : > { %v5546_v49 = vpop.f32.mrf.mxu0 }
 0x38c   : > { %v5548_v22 = vpop.f32.mrf.mxu0 }
 0x394   : > { %v4597_v23 = vpop.f32.mrf.mxu0 }
 0x395   : > { %vm1673_vm11 = vcmp.gt.f32.partialorder %v4597_v23, 0.0 }
 0x396   : > { %v1582_v21 = vpop.f32.mrf.mxu0  ;;  %v1677_v18 = vsel %vm1673_vm11, %v4597_v23, 1.0 }
 0x397   : > { %vm1672_vm13 = vcmp.gt.f32.partialorder %v1582_v21, 0.0 }
 0x398   : > { %v1676_v56 = vsel %vm1672_vm13, %v1582_v21, 1.0 }
 0x399   : > { %4900 = vrcp.f32 %v1676_v56 }
 0x39a   : > { %4902 = vrcp.f32 %v1677_v18 }
 0x39e   : > { %v4610_v24 = vpop.f32.mrf.mxu0 }
 0x39f   : > { %vm1675_vm15 = vcmp.gt.f32.partialorder %v4610_v24, 0.0 }
 0x3a0   : > { %v1663_v26 = vpop.f32.mrf.mxu0  ;;  %v1679_v28 = vsel %vm1675_vm15, %v4610_v24, 1.0 }
 0x3a1   : > { %vm1674_vm3 = vcmp.gt.f32.partialorder %v1663_v26, 0.0 }
 0x3a2   : > { %v1678_v27 = vsel %vm1674_vm3, %v1663_v26, 1.0 }
 0x3a3   : > { %4904 = vrcp.f32 %v1678_v27  ;;  %v6486_v27 = vmov 2  }
 0x3a4   : > { %4906 = vrcp.f32 %v1679_v28 }
 0x3a6   : > { %v4901_v30 = vpop.eup %4900 }
 0x3a7   : > { %1688 = vrot.lane.b32.xlu1 %v4901_v30, %s5049_s20  ;;  %v4903_v43 = vpop.eup %4902 }
 0x3ab   : > { %1690 = vrot.lane.b32.xlu1 %v4903_v43, %s5049_s20 }
 0x3b0   : > { %v4905_v35 = vpop.eup %4904 }
 0x3b1   : > { %1692 = vrot.lane.b32.xlu0 %v4905_v35, %s5049_s20  ;;  %v4907_v51 = vpop.eup %4906 }
 0x3b5   : > { %1694 = vrot.lane.b32.xlu0 %v4907_v51, %s5049_s20 }
 0x419   : > { %v1689_v54 = vpop.permute.xlu1 %1688 }
 0x41a   : > { %v1700_v16 = vmul.f32 %v1689_v54, %v1582_v21  ;;  %v6487_v21 = vmov 0  }
 0x41c   : > { %1708 = vrot.lane.b32.xlu1 %v1700_v16, %s5050_s19 }
 0x41d   : > { %v1691_v9 = vpop.permute.xlu1 %1690 }
 0x41e   : > { %v1701_v58 = vmul.f32 %v4597_v23, %v1691_v9 }
 0x420   : > { %1710 = vrot.lane.b32.xlu1 %v1701_v58, %s5050_s19 }
 0x423   : > { %v1693_v6 = vpop.permute.xlu0 %1692 }
 0x424   : > { %v1702_v20 = vmul.f32 %v1693_v6, %v1663_v26 }
 0x426   : > { %1712 = vrot.lane.b32.xlu0 %v1702_v20, %s5050_s19 }
 0x427   : > { %v1695_v60 = vpop.permute.xlu0 %1694 }
 0x428   : > { %v1703_v7 = vmul.f32 %v4610_v24, %v1695_v60 }
 0x42a   : > { %1714 = vrot.lane.b32.xlu0 %v1703_v7, %s5050_s19 }
 0x48e   : > { %v1709_v8 = vpop.permute.xlu1 %1708 }
 0x48f   : > { %v5564_v37 = vsel %vm1672_vm13, %v1709_v8, %v5178_v11 }
 0x490   : > { %1726 = vperm.xlu1 %4865, %v5564_v37  }
 0x492   : > { %v1711_v19 = vpop.permute.xlu1 %1710 }
 0x493   : > { %v5569_v56 = vsel %vm1673_vm11, %v1711_v19, %v5184_v13 }
 0x494   : > { %4866 = vset.pattern.permute.xlu1 %v6484_v12  ;;  %1731 = vperm.xlu0 %4863, %v5569_v56  }
 0x495   : > { %1749 = vperm.xlu1 %4866, %v5564_v37  }
 0x498   : > { %4864 = vset.pattern.permute.xlu0 %v6484_v12  ;;  %v1713_v18 = vpop.permute.xlu0 %1712 }
 0x499   : > { %4867 = vset.pattern.permute.xlu1 %v6486_v27  ;;  %1753 = vperm.xlu0 %4864, %v5569_v56   ;;  %v5580_v13 = vsel %vm1674_vm3, %v1713_v18, %v5196_v15 }
 0x49a   : > { %1773 = vperm.xlu1 %4867, %v5564_v37  }
 0x49c   : > { %v1715_v11 = vpop.permute.xlu0 %1714 }
 0x49d   : > { %v5584_v23 = vsel %vm1675_vm15, %v1715_v11, %v5204_v17  ;;  %4870 = vset.pattern.permute.xlu0 %v6487_v21  ;;  %vm2307_vm15 = vcmask 115712  }
 0x49e   : > { %4868 = vset.pattern.permute.xlu1 %v6487_v21  ;;  %1736 = vperm.xlu0 %4870, %v5580_v13  }
 0x49f   : > { %1741 = vperm.xlu1 %4868, %v5584_v23  }
 0x4a2   : > { %4871 = vset.pattern.permute.xlu0 %v6486_v27 }
 0x4a3   : > { %1781 = vperm.xlu0 %4871, %v5580_v13   ;;  %4869 = vset.pattern.permute.xlu1 %v6484_v12 }
 0x4a4   : > { %1761 = vperm.xlu1 %4869, %v5584_v23  }
 0x4a7   : > { %1144 = vrot.lane.b32.xlu0 %v5332_v2, %s5047_s12 }
 0x4a8   : > { %1757 = vperm.xlu1 %4869, %v5580_v13   ;;  %4873 = vset.pattern.permute.xlu0 %v6487_v21 }
 0x4ab   : > { %1138 = vrot.lane.b32.xlu0 %v5312_v53, %s5047_s12 }
 0x4ac   : > { %4872 = vset.pattern.permute.xlu1 %v6486_v27 }
 0x4ad   : > { %1777 = vperm.xlu1 %4872, %v5569_v56  }
 0x4b1   : > { %1785 = vperm.xlu1 %4872, %v5584_v23  }
 0x4b5   : > { %1146 = vrot.lane.b32.xlu1 %v5340_v4, %s5047_s12 }
 0x4b9   : > { %1142 = vrot.lane.b32.xlu1 %v5324_v61, %s5047_s12 }
 0x4bd   : > { %1140 = vrot.lane.b32.xlu1 %v5318_v57, %s5047_s12 }
 0x50b   : > { %v1727_v15 = vpop.permute.xlu1 %1726 }
 0x50c   : > { %v1744_v43 = vmul.f32 %v5293_v41, %v1727_v15 }
 0x50f   : > { %v1732_v24 = vpop.permute.xlu0 %1731 }
 0x510   : > { %v1750_v17 = vpop.permute.xlu1 %1749 }
 0x511   : > { %v1764_v28 = vmul.f32 %v5288_v39, %v1750_v17  ;;  %v1745_v17 = vmul.f32 %v5293_v41, %v1732_v24 }
 0x513   : > { %v1768_v54 = vadd.f32 %v1764_v28, %v1744_v43 }
 0x514   : > { %v1754_v30 = vpop.permute.xlu0 %1753 }
 0x515   : > { %v1774_v26 = vpop.permute.xlu1 %1773  ;;  %v1765_v19 = vmul.f32 %v5288_v39, %v1754_v30 }
 0x516   : > { %v1788_v35 = vmul.f32 %v5301_v46, %v1774_v26 }
 0x517   : > { %v1769_v43 = vadd.f32 %v1765_v19, %v1745_v17 }
 0x518   : > { %v1792_v16 = vadd.f32 %v1788_v35, %v1768_v54 }
 0x519   : > { %v1737_v9 = vpop.permute.xlu0 %1736 }
 0x51a   : > { %v1742_v51 = vpop.permute.xlu1 %1741  ;;  %v1796_v6 = vsub.f32 %v1792_v16, %v5405_v48  ;;  %v1746_v7 = vmul.f32 %v5293_v41, %v1737_v9 }
 0x51c   : > { %v1800_v18 = vmul.f32 %v1796_v6, %v1796_v6 }
 0x51e   : > { %v1782_v20 = vpop.permute.xlu0 %1781  ;;  %v1804_v35 = vsub.f32 0.0, %v1800_v18 }
 0x51f   : > { %v1762_v58 = vpop.permute.xlu1 %1761  ;;  %v1790_v11 = vmul.f32 %v5301_v46, %v1782_v20 }
 0x520   : > { %v1767_v54 = vmul.f32 %v5288_v39, %v1762_v58 }
 0x523   : > { %v1758_v60 = vpop.permute.xlu1 %1757 }
 0x524   : > { %v1766_v8 = vmul.f32 %v5288_v39, %v1758_v60  ;;  %v1747_v60 = vmul.f32 %v5293_v41, %v1742_v51 }
 0x526   : > { %v1770_v15 = vadd.f32 %v1766_v8, %v1746_v7  ;;  %v1771_v12 = vadd.f32 %v1767_v54, %v1747_v60  ;;  %v1808_v7 = vmul.f32 0.5, %v1804_v35 }
 0x528   : > { %v1794_v26 = vadd.f32 %v1790_v11, %v1770_v15  ;;  %v1778_v28 = vpop.permute.xlu1 %1777  ;;  %v1812_v51 = vmul.f32 1.442695, %v1808_v7 }
 0x529   : > { %v1789_v16 = vmul.f32 %v5301_v46, %v1778_v28 }
 0x52a   : > { %v1798_v9 = vsub.f32 %v1794_v26, %v5405_v48  ;;  %v1145_v26 = vpop.permute.xlu0 %1144 }
 0x52b   : > { %v1793_v10 = vadd.f32 %v1789_v16, %v1769_v43 }
 0x52c   : > { %v1786_v30 = vpop.permute.xlu1 %1785  ;;  %v1802_v6 = vmul.f32 %v1798_v9, %v1798_v9 }
 0x52d   : > { %v1797_v20 = vsub.f32 %v1793_v10, %v5405_v48  ;;  %v1791_v24 = vmul.f32 %v5301_v46, %v1786_v30 }
 0x52e   : > { %v1806_v8 = vsub.f32 0.0, %v1802_v6  ;;  %v1139_v30 = vpop.permute.xlu0 %1138 }
 0x52f   : > { %v1801_v19 = vmul.f32 %v1797_v20, %v1797_v20  ;;  %v1795_v18 = vadd.f32 %v1791_v24, %v1771_v12 }
 0x530   : > { %v1147_v11 = vpop.permute.xlu1 %1146  ;;  %v1810_v58 = vmul.f32 0.5, %v1806_v8 }
 0x531   : > { %v1805_v15 = vsub.f32 0.0, %v1801_v19  ;;  %v1799_v17 = vsub.f32 %v1795_v18, %v5405_v48  ;;  %4572 = vmatprep.subr.msk.mxu1 %vm826_vm2, %v1147_v11 }
 0x532   : > { %4573 = vmatpush3.xpose.msk.msra.mxu1 %vm826_vm2, %v1147_v11  ;;  %v1816_v28 = vmul.f32 1.442695, %v1810_v58 }
 0x533   : > { %v1803_v43 = vmul.f32 %v1799_v17, %v1799_v17  ;;  %4574 = vmatprep.subr.msk.mxu1 %vm826_vm2, %v1145_v26  ;;  %v1809_v10 = vmul.f32 0.5, %v1805_v15 }
 0x534   : > { %v1143_v35 = vpop.permute.xlu1 %1142  ;;  %4908 = vpow2.f32 %v1816_v28 }
 0x535   : > { %v1807_v54 = vsub.f32 0.0, %v1803_v43  ;;  %v1814_v12 = vmul.f32 1.442695, %v1809_v10  ;;  %4910 = vpow2.f32 %v1812_v51 }
 0x536   : > { %4575 = vmatpush3.xpose.msk.msra.mxu1 %vm826_vm2, %v1145_v26 }
 0x537   : > { %4576 = vmatprep.subr.msk.mxu1 %vm826_vm2, %v1143_v35  ;;  %4912 = vpow2.f32 %v1814_v12  ;;  %v1811_v16 = vmul.f32 0.5, %v1807_v54 }
 0x538   : > { %v1141_v60 = vpop.permute.xlu1 %1140 }
 0x539   : > { %v1818_v9 = vmul.f32 1.442695, %v1811_v16 }
 0x53a   : > { %4577 = vmatpush3.xpose.msk.msra.mxu1 %vm826_vm2, %v1143_v35 }
 0x53b   : > { %4578 = vmatprep.subr.msk.mxu1 %vm826_vm2, %v1141_v60  ;;  %4914 = vpow2.f32 %v1818_v9 }
 0x53e   : > { %4579 = vmatpush3.xpose.msk.msra.mxu1 %vm826_vm2, %v1141_v60 }
 0x53f   : > { %4580 = vmatprep.subr.msk.mxu1 %vm826_vm2, %v1139_v30 }
 0x541   : > { %v4909_v6 = vpop.eup %4908 }
 0x542   : > { %v4911_v20 = vpop.eup %4910  ;;  %4581 = vmatpush3.xpose.msk.msra.mxu1 %vm826_vm2, %v1139_v30  ;;  %vm1822_vm4 = vcmp.lt.f32.partialorder %v4909_v6, 0.60653067 }
 0x543   : > { %v1826_v24 = vsel %vm1822_vm4, -inf, %v5452_v1  ;;  %4624 = vmatprep.subr.msk.mxu1 %vm1512_vm9, %v5480_v47  ;;  %vm1820_vm6 = vcmp.lt.f32.partialorder %v4911_v20, 0.60653067  ;;  %vm2654_vm4 = vcmask 1046528  }
 0x544   : > { %v4913_v7 = vpop.eup %4912  ;;  %v1834_v8 = vsel %vm1476_vm14, %v1826_v24, -inf  ;;  %v1824_v58 = vsel %vm1820_vm6, -inf, %v5436_v36 }
 0x545   : > { %1835 = vmax.xlane.f32.xlu1 %v1834_v8  ;;  %vm1821_vm5 = vcmp.lt.f32.partialorder %v4913_v7, 0.60653067  ;;  %v1828_v15 = vsel %vm1476_vm14, %v1824_v58, -inf }
 0x546   : > { %v1825_v19 = vsel %vm1821_vm5, -inf, %v5430_v44 }
 0x547   : > { %v1831_v18 = vsel %vm1480_vm12, %v1825_v19, -inf }
 0x548   : > { %v4915_v11 = vpop.eup %4914  ;;  %1832 = vmax.xlane.f32.xlu0 %v1831_v18 }
 0x549   : > { %vm1823_vm7 = vcmp.lt.f32.partialorder %v4915_v11, 0.60653067 }
 0x54a   : > { %v1827_v17 = vsel %vm1823_vm7, -inf, %v5446_v62 }
 0x54b   : > { %v1837_v51 = vsel %vm1480_vm12, %v1827_v17, -inf }
 0x54c   : > { %1829 = vmax.xlane.f32.xlu0 %v1828_v15 }
 0x550   : > { %1838 = vmax.xlane.f32.xlu0 %v1837_v51 }
 0x556   : > { %1134 = vrot.lane.b32.xlu1 %v5271_v34, %s5048_s15 }
 0x566   : > { %1136 = vrot.lane.b32.xlu0 %v5269_v33, %s5048_s15 }
 0x5ce   : > { %v1836_v26 = vpop.xlane.xlu1 %1835 }
 0x5cf   : > { %v1842_v28 = vmax.f32 %v1836_v26, -1e+30 }
 0x5d1   : > { %v1846_v43 = vsub.f32 %v1826_v24, %v1842_v28  ;;  %v1833_v10 = vpop.xlane.xlu0 %1832 }
 0x5d2   : > { %v1841_v35 = vmax.f32 %v1833_v10, -1e+30  ;;  %v1135_v54 = vpop.permute.xlu1 %1134 }
 0x5d3   : > { %v1852_v12 = vmul.f32 1.442695, %v1846_v43  ;;  %4582 = vmatprep.mubr.msk.f32.mxu1 %vm826_vm2, %v1135_v54 }
 0x5d4   : > { %v1845_v16 = vsub.f32 %v1825_v19, %v1841_v35 }
 0x5d5   : > { %4916 = vpow2.f32 %v1852_v12  ;;  %v1830_v9 = vpop.xlane.xlu0 %1829 }
 0x5d6   : > { %v1840_v60 = vmax.f32 %v1830_v9, -1e+30  ;;  %v1850_v6 = vmul.f32 1.442695, %v1845_v16 }
 0x5d8   : > { %v1844_v30 = vsub.f32 %v1824_v58, %v1840_v60 }
 0x5d9   : > { %v1839_v20 = vpop.xlane.xlu0 %1838 }
 0x5da   : > { %v1848_v7 = vmul.f32 1.442695, %v1844_v30  ;;  %v1843_v8 = vmax.f32 %v1839_v20, -1e+30 }
 0x5dc   : > { %4918 = vpow2.f32 %v1848_v7  ;;  %v1847_v18 = vsub.f32 %v1827_v17, %v1843_v8 }
 0x5dd   : > { %4920 = vpow2.f32 %v1850_v6  ;;  %v1137_v11 = vpop.permute.xlu0 %1136 }
 0x5de   : > { %v1854_v24 = vmul.f32 1.442695, %v1847_v18  ;;  %4583 = vmatmul.mubr.msk.f32.vlgmr.msra.gmra.mxu1 %vm826_vm2, %v1137_v11 }
 0x5df   : > { %4625 = vmatpush3.msk.msra.mxu1 %vm1512_vm9, %v5480_v47 }
 0x5e0   : > { %4922 = vpow2.f32 %v1854_v24  ;;  %4626 = vmatprep.subr.mxu1 %v5493_v14 }
 0x5e1   : > { %4627 = vmatpush3.msra.mxu1 %v5493_v14 }
 0x5e2   : > { %v4917_v19 = vpop.eup %4916  ;;  %4628 = vmatprep.subr.mxu1 %v5500_v3 }
 0x5e3   : > { %4634 = vmatprep.mubr.msk.f32.mxu1 %vm1476_vm14, %v4917_v19  ;;  %4629 = vmatpush3.msra.mxu1 %v5500_v3 }
 0x5e4   : > { %4630 = vmatprep.subr.mxu1 %v5506_v25 }
 0x5e5   : > { %4631 = vmatpush3.msra.mxu1 %v5506_v25 }
 0x5e6   : > { %4632 = vmatprep.subr.mxu1 %v5512_v5 }
 0x5e7   : > { %4633 = vmatpush3.msra.mxu1 %v5512_v5 }
 0x5e9   : > { %v4919_v47 = vpop.eup %4918 }
 0x5ea   : > { %v4921_v58 = vpop.eup %4920  ;;  %4621 = vmatprep.mubr.msk.f32.mxu0 %vm1476_vm14, %v4919_v47 }
 0x5eb   : > { %4622 = vmatmul.mubr.msk.f32.vlgmr.msra.gmra.mxu0 %vm1476_vm14, %v4921_v58  ;;  %v6489_v58 = vmov 0.0  }
 0x5ed   : > { %v4923_v14 = vpop.eup %4922 }
 0x5ee   : > { %4635 = vmatmul.mubr.msk.f32.vlgmr.msra.gmra.mxu1 %vm1476_vm14, %v4923_v14 }
 0x69e   : > { %v5665_v15 = vpop.f32.mrf.mxu1 }
 0x6a0   : > { %v5667_v17 = vpop.f32.mrf.mxu1 }
 0x6ab   : > { %v4623_v3 = vpop.f32.mrf.mxu0 }
 0x6ac   : > { %vm2019_vm8 = vcmp.gt.f32.partialorder %v4623_v3, 0.0 }
 0x6ad   : > { %v5669_v51 = vpop.f32.mrf.mxu0  ;;  %v2023_v28 = vsel %vm2019_vm8, %v4623_v3, 1.0 }
 0x6ae   : > { %vm2018_vm10 = vcmp.gt.f32.partialorder %v5669_v51, 0.0  ;;  %v5672_v25 = vpop.f32.mrf.mxu1 }
 0x6af   : > { %v2022_v5 = vsel %vm2018_vm10, %v5669_v51, 1.0  ;;  %vm2021_vm11 = vcmp.gt.f32.partialorder %v5672_v25, 0.0 }
 0x6b0   : > { %4924 = vrcp.f32 %v2022_v5  ;;  %v5677_v26 = vpop.f32.mrf.mxu1  ;;  %v2025_v10 = vsel %vm2021_vm11, %v5672_v25, 1.0 }
 0x6b1   : > { %vm2020_vm13 = vcmp.gt.f32.partialorder %v5677_v26, 0.0 }
 0x6b2   : > { %v2024_v43 = vsel %vm2020_vm13, %v5677_v26, 1.0 }
 0x6b3   : > { %4926 = vrcp.f32 %v2024_v43 }
 0x6b4   : > { %4928 = vrcp.f32 %v2023_v28 }
 0x6b5   : > { %4930 = vrcp.f32 %v2025_v10 }
 0x6bd   : > { %v4925_v35 = vpop.eup %4924 }
 0x6be   : > { %2034 = vrot.lane.b32.xlu1 %v4925_v35, %s5049_s20 }
 0x6c0   : > { %v4927_v54 = vpop.eup %4926 }
 0x6c1   : > { %v4929_v12 = vpop.eup %4928  ;;  %2038 = vrot.lane.b32.xlu0 %v4927_v54, %s5049_s20 }
 0x6c2   : > { %2036 = vrot.lane.b32.xlu1 %v4929_v12, %s5049_s20  ;;  %v4931_v16 = vpop.eup %4930 }
 0x6c5   : > { %2040 = vrot.lane.b32.xlu0 %v4931_v16, %s5049_s20 }
 0x6c9   : > { %1039 = vrot.lane.b32.xlu0 %v5426_v40, %s5051_s21 }
 0x6cd   : > { %2545 = vrot.lane.b32.xlu0 %v5340_v4, %s5048_s15 }
 0x6d1   : > { %2444 = vrot.lane.b32.xlu0 %v5314_v55, %s5048_s15 }
 0x6d5   : > { %2442 = vrot.lane.b32.xlu0 %v5308_v52, %s5048_s15 }
 0x6d9   : > { %2440 = vrot.lane.b32.xlu0 %v5306_v50, %s5048_s15 }
 0x730   : > { %v2035_v9 = vpop.permute.xlu1 %2034 }
 0x731   : > { %v2046_v4 = vmul.f32 %v2035_v9, %v5669_v51 }
 0x733   : > { %v2039_v60 = vpop.permute.xlu0 %2038 }
 0x734   : > { %v2037_v30 = vpop.permute.xlu1 %2036  ;;  %v2048_v52 = vmul.f32 %v2039_v60, %v5677_v26 }
 0x735   : > { %v2047_v6 = vmul.f32 %v4623_v3, %v2037_v30 }
 0x737   : > { %2056 = vrot.lane.b32.xlu1 %v2047_v6, %s5050_s19  ;;  %v2041_v20 = vpop.permute.xlu0 %2040 }
 0x738   : > { %v2049_v40 = vmul.f32 %v5672_v25, %v2041_v20 }
 0x73a   : > { %2060 = vrot.lane.b32.xlu0 %v2049_v40, %s5050_s19 }
 0x73b   : > { %2054 = vrot.lane.b32.xlu1 %v2046_v4, %s5050_s19  ;;  %v5706_v55 = vpop.permute.xlu0 %1039 }
 0x73e   : > { %2058 = vrot.lane.b32.xlu0 %v2048_v52, %s5050_s19 }
 0x73f   : > { %1041 = vrot.lane.b32.xlu1 %v5421_v29, %s5051_s21  ;;  %v2546_v50 = vpop.permute.xlu0 %2545 }
 0x740   : > { %4650 = vmatprep.subr.msk.mxu1 %vm1512_vm9, %v2546_v50 }
 0x741   : > { %4651 = vmatpush3.msk.msra.mxu1 %vm1512_vm9, %v2546_v50 }
 0x743   : > { %2448 = vrot.lane.b32.xlu1 %v5326_v63, %s5048_s15  ;;  %v2445_v29 = vpop.permute.xlu0 %2444 }
 0x747   : > { %2446 = vrot.lane.b32.xlu1 %v5320_v59, %s5048_s15  ;;  %v2443_v7 = vpop.permute.xlu0 %2442 }
 0x74b   : > { %2543 = vrot.lane.b32.xlu1 %v5332_v2, %s5048_s15  ;;  %v2441_v8 = vpop.permute.xlu0 %2440 }
 0x74f   : > { %2541 = vrot.lane.b32.xlu1 %v5324_v61, %s5048_s15 }
 0x753   : > { %2539 = vrot.lane.b32.xlu1 %v5318_v57, %s5048_s15  ;;  %v6488_v57 = vmov 1  }
 0x757   : > { %2537 = vrot.lane.b32.xlu1 %v5312_v53, %s5048_s15 }
 0x7a9   : > { %v2057_v18 = vpop.permute.xlu1 %2056 }
 0x7aa   : > { %v2067_v63 = vsel %vm2019_vm8, %v2057_v18, %v5569_v56 }
 0x7ab   : > { %2123 = vperm.xlu1 %4872, %v2067_v63   ;;  %2077 = vperm.xlu0 %4873, %v2067_v63  }
 0x7ac   : > { %v2061_v59 = vpop.permute.xlu0 %2060 }
 0x7ad   : > { %v2055_v2 = vpop.permute.xlu1 %2054 }
 0x7ae   : > { %v2066_v61 = vsel %vm2018_vm10, %v2055_v2, %v5564_v37 }
 0x7af   : > { %4875 = vset.pattern.permute.xlu1 %v6487_v21  ;;  %4874 = vset.pattern.permute.xlu0 %v6488_v57 }
 0x7b0   : > { %2072 = vperm.xlu1 %4875, %v2066_v61   ;;  %2099 = vperm.xlu0 %4874, %v2067_v63   ;;  %v2059_v53 = vpop.permute.xlu0 %2058 }
 0x7b1   : > { %v5732_v11 = vpop.permute.xlu1 %1041  ;;  %v2068_v56 = vsel %vm2020_vm13, %v2059_v53, %v5580_v13  ;;  %v2069_v13 = vsel %vm2021_vm11, %v2061_v59, %v5584_v23 }
 0x7b4   : > { %4876 = vset.pattern.permute.xlu1 %v6488_v57  ;;  %4881 = vset.pattern.permute.xlu0 %v6487_v21 }
 0x7b5   : > { %2095 = vperm.xlu1 %4876, %v2066_v61   ;;  %v2449_v24 = vpop.permute.xlu1 %2448  ;;  %2082 = vperm.xlu0 %4881, %v2068_v56  }
 0x7b6   : > { %4637 = vmatprep.subr.msk.mxu0 %vm1512_vm9, %v2449_v24 }
 0x7b7   : > { %4638 = vmatpush3.msk.msra.mxu0 %vm1512_vm9, %v2449_v24  ;;  %vm2294_vm9 = vcmask 121856  }
 0x7b9   : > { %4877 = vset.pattern.permute.xlu1 %v6486_v27  ;;  %v2447_v37 = vpop.permute.xlu1 %2446  ;;  %4883 = vset.pattern.permute.xlu0 %v6486_v27 }
 0x7ba   : > { %2119 = vperm.xlu1 %4877, %v2066_v61   ;;  %4639 = vmatprep.subr.mxu0 %v2447_v37 }
 0x7bb   : > { %2127 = vperm.xlu0 %4883, %v2068_v56   ;;  %4640 = vmatpush3.msra.mxu0 %v2447_v37 }
 0x7bc   : > { %4641 = vmatprep.subr.mxu0 %v2445_v29 }
 0x7bd   : > { %v2544_v19 = vpop.permute.xlu1 %2543  ;;  %4642 = vmatpush3.msra.mxu0 %v2445_v29 }
 0x7be   : > { %4878 = vset.pattern.permute.xlu1 %v6487_v21  ;;  %4643 = vmatprep.subr.mxu0 %v2443_v7 }
 0x7bf   : > { %4652 = vmatprep.subr.mxu1 %v2544_v19  ;;  %4644 = vmatpush3.msra.mxu0 %v2443_v7 }
 0x7c0   : > { %4653 = vmatpush3.msra.mxu1 %v2544_v19  ;;  %2087 = vperm.xlu1 %4878, %v2069_v13  }
 0x7c1   : > { %4645 = vmatprep.subr.mxu0 %v2441_v8  ;;  %v2542_v47 = vpop.permute.xlu1 %2541 }
 0x7c2   : > { %4646 = vmatpush3.msra.mxu0 %v2441_v8  ;;  %4654 = vmatprep.subr.mxu1 %v2542_v47 }
 0x7c3   : > { %4655 = vmatpush3.msra.mxu1 %v2542_v47  ;;  %4663 = vmatprep.subr.mxu0 %v6489_v58 }
 0x7c4   : > { %4879 = vset.pattern.permute.xlu1 %v6488_v57 }
 0x7c5   : > { %2107 = vperm.xlu1 %4879, %v2069_v13   ;;  %v2540_v21 = vpop.permute.xlu1 %2539 }
 0x7c6   : > { %4656 = vmatprep.subr.mxu1 %v2540_v21 }
 0x7c7   : > { %4657 = vmatpush3.msra.mxu1 %v2540_v21 }
 0x7c9   : > { %4880 = vset.pattern.permute.xlu1 %v6486_v27  ;;  %v2538_v23 = vpop.permute.xlu1 %2537 }
 0x7ca   : > { %2131 = vperm.xlu1 %4880, %v2069_v13   ;;  %4658 = vmatprep.subr.mxu1 %v2538_v23 }
 0x7cb   : > { %4659 = vmatpush3.msra.mxu1 %v2538_v23 }
 0x7cc   : > { %4682 = vmatprep.subr.mxu1 %v6489_v58 }
 0x7ce   : > { %4882 = vset.pattern.permute.xlu1 %v6488_v57 }
 0x7cf   : > { %2103 = vperm.xlu1 %4882, %v2068_v56  }
 0x826   : > { %v2124_v14 = vpop.permute.xlu1 %2123  ;;  %v2078_v3 = vpop.permute.xlu0 %2077 }
 0x827   : > { %v2091_v5 = vmul.f32 %v5293_v41, %v2078_v3  ;;  %v2135_v28 = vmul.f32 %v5301_v46, %v2124_v14 }
 0x82b   : > { %v2073_v51 = vpop.permute.xlu1 %2072  ;;  %v2100_v25 = vpop.permute.xlu0 %2099 }
 0x82c   : > { %v2111_v26 = vmul.f32 %v5288_v39, %v2100_v25  ;;  %v2090_v12 = vmul.f32 %v5293_v41, %v2073_v51 }
 0x82e   : > { %v2115_v27 = vadd.f32 %v2111_v26, %v2091_v5 }
 0x830   : > { %v2139_v43 = vadd.f32 %v2135_v28, %v2115_v27  ;;  %v2096_v10 = vpop.permute.xlu1 %2095  ;;  %v2083_v59 = vpop.permute.xlu0 %2082 }
 0x831   : > { %v2110_v54 = vmul.f32 %v5288_v39, %v2096_v10  ;;  %v2092_v24 = vmul.f32 %v5293_v41, %v2083_v59 }
 0x832   : > { %v2143_v35 = vsub.f32 %v2139_v43, %v5405_v48 }
 0x833   : > { %v2114_v30 = vadd.f32 %v2110_v54, %v2090_v12 }
 0x834   : > { %v2147_v16 = vmul.f32 %v2143_v35, %v2143_v35 }
 0x835   : > { %v2120_v9 = vpop.permute.xlu1 %2119 }
 0x836   : > { %v2151_v60 = vsub.f32 0.0, %v2147_v16  ;;  %v2134_v6 = vmul.f32 %v5301_v46, %v2120_v9  ;;  %v2128_v57 = vpop.permute.xlu0 %2127  ;;  %v1126_v9 = vadd.f32 %v5548_v22, %v5706_v55 }
 0x837   : > { %v2136_v13 = vmul.f32 %v5301_v46, %v2128_v57 }
 0x838   : > { %v2155_v20 = vmul.f32 0.5, %v2151_v60  ;;  %v2138_v40 = vadd.f32 %v2134_v6, %v2114_v30  ;;  %v1131_v30 = vadd.f32 %v5546_v49, %v5732_v11 }
 0x83a   : > { %v2160_v4 = vmul.f32 1.442695, %v2155_v20  ;;  %v2142_v52 = vsub.f32 %v2138_v40, %v5405_v48  ;;  %v1234_v40 = vadd.f32 %v5665_v15, %v5732_v11 }
 0x83b   : > { %v2088_v50 = vpop.permute.xlu1 %2087 }
 0x83c   : > { %4932 = vpow2.f32 %v2160_v4  ;;  %v2146_v29 = vmul.f32 %v2142_v52, %v2142_v52  ;;  %v2093_v10 = vmul.f32 %v5293_v41, %v2088_v50 }
 0x83e   : > { %v2150_v7 = vsub.f32 0.0, %v2146_v29 }
 0x840   : > { %v2154_v8 = vmul.f32 0.5, %v2150_v7  ;;  %v2108_v18 = vpop.permute.xlu1 %2107 }
 0x842   : > { %v2158_v63 = vmul.f32 1.442695, %v2154_v8 }
 0x844   : > { %4934 = vpow2.f32 %v2158_v63 }
 0x845   : > { %v2132_v2 = vpop.permute.xlu1 %2131 }
 0x846   : > { %v2137_v35 = vmul.f32 %v5301_v46, %v2132_v2 }
 0x849   : > { %v5760_v61 = vpop.eup %4932 }
 0x84a   : > { %v2104_v53 = vpop.permute.xlu1 %2103  ;;  %v5764_v56 = vadd.f32 %v5760_v61, %v5430_v44 }
 0x84b   : > { %v2112_v37 = vmul.f32 %v5288_v39, %v2104_v53 }
 0x84c   : > { %v2173_v19 = vsel %vm1480_vm12, %v5764_v56, -inf }
 0x84d   : > { %v2116_v47 = vadd.f32 %v2112_v37, %v2092_v24  ;;  %2174 = vmax.xlane.f32.xlu0 %v2173_v19 }
 0x84f   : > { %v2140_v21 = vadd.f32 %v2136_v13, %v2116_v47 }
 0x851   : > { %v5771_v23 = vpop.eup %4934  ;;  %v2144_v14 = vsub.f32 %v2140_v21, %v5405_v48 }
 0x852   : > { %v5776_v44 = vadd.f32 %v5771_v23, %v5436_v36  ;;  %v2113_v36 = vmul.f32 %v5288_v39, %v2108_v18  ;;  %v2227_v39 = vadd.f32 %v5760_v61, %v1131_v30 }
 0x853   : > { %v2148_v3 = vmul.f32 %v2144_v14, %v2144_v14 }
 0x854   : > { %v2170_v51 = vsel %vm1476_vm14, %v5776_v44, -inf  ;;  %v2117_v54 = vadd.f32 %v2113_v36, %v2093_v10 }
 0x855   : > { %v2152_v25 = vsub.f32 0.0, %v2148_v3  ;;  %2171 = vmax.xlane.f32.xlu0 %v2170_v51 }
 0x856   : > { %v2141_v12 = vadd.f32 %v2137_v35, %v2117_v54 }
 0x857   : > { %v2156_v5 = vmul.f32 0.5, %v2152_v25 }
 0x858   : > { %v2145_v16 = vsub.f32 %v2141_v12, %v5405_v48  ;;  %v1229_v48 = vadd.f32 %v5667_v17, %v5706_v55 }
 0x859   : > { %v2162_v26 = vmul.f32 1.442695, %v2156_v5 }
 0x85a   : > { %v2149_v60 = vmul.f32 %v2145_v16, %v2145_v16 }
 0x85b   : > { %4936 = vpow2.f32 %v2162_v26 }
 0x85c   : > { %v2153_v6 = vsub.f32 0.0, %v2149_v60 }
 0x85e   : > { %v2157_v41 = vmul.f32 0.5, %v2153_v6 }
 0x860   : > { %v2164_v46 = vmul.f32 1.442695, %v2157_v41 }
 0x862   : > { %4938 = vpow2.f32 %v2164_v46 }
 0x868   : > { %v5780_v28 = vpop.eup %4936 }
 0x869   : > { %v5784_v27 = vadd.f32 %v5780_v28, %v5452_v1  ;;  %v2226_v1 = vadd.f32 %v5771_v23, %v1126_v9  ;;  %v2228_v20 = vadd.f32 %v5780_v28, %v1229_v48 }
 0x86b   : > { %v2176_v43 = vsel %vm1476_vm14, %v5784_v27, -inf }
 0x86c   : > { %2177 = vmax.xlane.f32.xlu1 %v2176_v43 }
 0x86f   : > { %v5801_v22 = vpop.eup %4938 }
 0x870   : > { %v2229_v49 = vadd.f32 %v5801_v22, %v1234_v40  ;;  %v2169_v4 = vadd.f32 %v5801_v22, %v5446_v62 }
 0x872   : > { %v2179_v52 = vsel %vm1480_vm12, %v2169_v4, -inf }
 0x882   : > { %2230 = vxpose.xlu0.b32.start [1/2] (short) (narrow) %v2226_v1, 40 }
 0x886   : > { %2231 = vxpose.xlu0.b32.end [2/2] (short) (narrow) %v2227_v39, 40 }
 0x89f   : > { %2262 = vxpose.xlu1.b32.start [1/2] (short) (narrow) %v2228_v20, 40 }
 0x8a3   : > { %2263 = vxpose.xlu1.b32.end [2/2] (short) (narrow) %v2229_v49, 40 }
 0x8bf   : > { %2180 = vmax.xlane.f32.xlu0 %v2179_v52 }
 0x8d6   : > { %v2175_v50 = vpop.xlane.xlu0 %2174 }
 0x8d7   : > { %v2183_v21 = vmax.f32 %v2175_v50, -1e+30 }
 0x8d9   : > { %v2187_v51 = vsub.f32 %v5764_v56, %v2183_v21 }
 0x8db   : > { %v2192_v5 = vmul.f32 1.442695, %v2187_v51 }
 0x8dd   : > { %4940 = vpow2.f32 %v2192_v5 }
 0x8de   : > { %v2172_v29 = vpop.xlane.xlu0 %2171 }
 0x8df   : > { %v2182_v25 = vmax.f32 %v2172_v29, -1e+30 }
 0x8e1   : > { %v2186_v26 = vsub.f32 %v5776_v44, %v2182_v25 }
 0x8e3   : > { %v2190_v43 = vmul.f32 1.442695, %v2186_v26 }
 0x8e5   : > { %4942 = vpow2.f32 %v2190_v43 }
 0x8ea   : > { %v5853_v36 = vpop.eup %4940 }
 0x8eb   : > { %v2201_v10 = vsel %vm1480_vm12, %v5853_v36, 0.0 }
 0x8f2   : > { %v5859_v56 = vpop.eup %4942 }
 0x8f3   : > { %v2198_v54 = vsel %vm1476_vm14, %v5859_v56, 0.0 }
 0x8f5   : > { %v2178_v2 = vpop.xlane.xlu1 %2177 }
 0x8f6   : > { %v2184_v12 = vmax.f32 %v2178_v2, -1e+30 }
 0x8f8   : > { %v2188_v9 = vsub.f32 %v5784_v27, %v2184_v12 }
 0x8fa   : > { %v2194_v60 = vmul.f32 1.442695, %v2188_v9 }
 0x8fe   : > { %v5809_v17 = vpop.trf.xlu0 }
 0x8ff   : > { %v2295_v55 = vsel %vm2294_vm9, %v5809_v17, -inf }
 0x900   : > { %2296 = vmax.xlane.f32.xlu1 %v2295_v55 }
 0x902   : > { %v5813_v15 = vpop.trf.xlu0 }
 0x903   : > { %v2298_v11 = vsel %vm2294_vm9, %v5813_v15, -inf }
 0x904   : > { %2299 = vmax.xlane.f32.xlu1 %v2298_v11 }
 0x906   : > { %v5817_v7 = vpop.trf.xlu0 }
 0x907   : > { %v2301_v62 = vsel %vm2294_vm9, %v5817_v7, -inf }
 0x908   : > { %2302 = vmax.xlane.f32.xlu1 %v2301_v62 }
 0x90a   : > { %v5821_v8 = vpop.trf.xlu0 }
 0x90b   : > { %v2304_v18 = vsel %vm2294_vm9, %v5821_v8, -inf }
 0x90c   : > { %2305 = vmax.xlane.f32.xlu1 %v2304_v18 }
 0x90e   : > { %v5825_v63 = vpop.trf.xlu0 }
 0x90f   : > { %v2308_v59 = vsel %vm2307_vm15, %v5825_v63, -inf }
 0x910   : > { %2309 = vmax.xlane.f32.xlu1 %v2308_v59 }
 0x91b   : > { %v5829_v57 = vpop.trf.xlu1 }
 0x91c   : > { %v2311_v53 = vsel %vm2294_vm9, %v5829_v57, -inf }
 0x91d   : > { %2312 = vmax.xlane.f32.xlu0 %v2311_v53 }
 0x91f   : > { %v5833_v24 = vpop.trf.xlu1 }
 0x920   : > { %v2314_v37 = vsel %vm2294_vm9, %v5833_v24, -inf }
 0x921   : > { %2315 = vmax.xlane.f32.xlu0 %v2314_v37  ;;  %2749 = vrot.lane.b32.xlu1 %v5269_v33, %s5047_s12 }
 0x923   : > { %v5839_v19 = vpop.trf.xlu1 }
 0x924   : > { %v2317_v13 = vsel %vm2294_vm9, %v5839_v19, -inf }
 0x925   : > { %2318 = vmax.xlane.f32.xlu0 %v2317_v13 }
 0x927   : > { %v5843_v47 = vpop.trf.xlu1 }
 0x928   : > { %v2320_v14 = vsel %vm2294_vm9, %v5843_v47, -inf }
 0x929   : > { %2321 = vmax.xlane.f32.xlu0 %v2320_v14 }
 0x92b   : > { %v5847_v3 = vpop.trf.xlu1 }
 0x92c   : > { %v2323_v33 = vsel %vm2307_vm15, %v5847_v3, -inf }
 0x92d   : > { %2324 = vmax.xlane.f32.xlu0 %v2323_v33 }
 0x943   : > { %2636 = vrot.lane.b32.xlu0 %v5263_v31, %s5047_s12 }
 0x945   : > { %2202 = vadd.xlane.f32.xlu1 %v2201_v10 }
 0x948   : > { %v2181_v35 = vpop.xlane.xlu0 %2180 }
 0x949   : > { %v2185_v44 = vmax.f32 %v2181_v35, -1e+30  ;;  %2199 = vadd.xlane.f32.xlu1 %v2198_v54 }
 0x94b   : > { %v2189_v16 = vsub.f32 %v2169_v4, %v2185_v44 }
 0x94d   : > { %v2196_v1 = vmul.f32 1.442695, %v2189_v16 }
 0x94f   : > { %4944 = vpow2.f32 %v2196_v1 }
 0x950   : > { %4946 = vpow2.f32 %v2194_v60 }
 0x95c   : > { %v5864_v31 = vpop.eup %4944 }
 0x95d   : > { %v2207_v30 = vsel %vm1480_vm12, %v5864_v31, 0.0  ;;  %v5868_v39 = vpop.eup %4946 }
 0x95e   : > { %v2204_v6 = vsel %vm1476_vm14, %v5868_v39, 0.0 }
 0x962   : > { %2208 = vadd.xlane.f32.xlu0 %v2207_v30 }
 0x966   : > { %2205 = vadd.xlane.f32.xlu0 %v2204_v6 }
 0x989   : > { %v2297_v41 = vpop.xlane.xlu1 %2296 }
 0x98a   : > { %v2326_v46 = vmax.f32 %v2297_v41, -1e+30 }
 0x98c   : > { %v2336_v27 = vsub.f32 %v5809_v17, %v2326_v46 }
 0x98d   : > { %v2300_v48 = vpop.xlane.xlu1 %2299 }
 0x98e   : > { %v2346_v20 = vmul.f32 1.442695, %v2336_v27  ;;  %v2327_v40 = vmax.f32 %v2300_v48, -1e+30 }
 0x990   : > { %4948 = vpow2.f32 %v2346_v20  ;;  %v2337_v49 = vsub.f32 %v5813_v15, %v2327_v40 }
 0x991   : > { %v2303_v4 = vpop.xlane.xlu1 %2302 }
 0x992   : > { %v2348_v52 = vmul.f32 1.442695, %v2337_v49  ;;  %v2328_v50 = vmax.f32 %v2303_v4, -1e+30 }
 0x994   : > { %4950 = vpow2.f32 %v2348_v52  ;;  %v2338_v29 = vsub.f32 %v5817_v7, %v2328_v50 }
 0x995   : > { %v2306_v55 = vpop.xlane.xlu1 %2305 }
 0x996   : > { %v2350_v11 = vmul.f32 1.442695, %v2338_v29  ;;  %v2329_v62 = vmax.f32 %v2306_v55, -1e+30 }
 0x998   : > { %4952 = vpow2.f32 %v2350_v11  ;;  %v2339_v18 = vsub.f32 %v5821_v8, %v2329_v62 }
 0x999   : > { %v2310_v7 = vpop.xlane.xlu1 %2309 }
 0x99a   : > { %v2352_v59 = vmul.f32 1.442695, %v2339_v18  ;;  %v2330_v21 = vmax.f32 %v2310_v7, -1e+30 }
 0x99c   : > { %4954 = vpow2.f32 %v2352_v59  ;;  %v2340_v26 = vsub.f32 %v5825_v63, %v2330_v21 }
 0x99d   : > { %v5876_v17 = vpop.eup %4948  ;;  %v2750_v50 = vpop.permute.xlu1 %2749 }
 0x99e   : > { %v2366_v2 = vsel %vm2294_vm9, %v5876_v17, 0.0  ;;  %v2354_v12 = vmul.f32 1.442695, %v2340_v26 }
 0x99f   : > { %2367 = vadd.xlane.f32.xlu1 %v2366_v2 }
 0x9a1   : > { %v5880_v15 = vpop.eup %4950 }
 0x9a2   : > { %v2369_v53 = vsel %vm2294_vm9, %v5880_v15, 0.0 }
 0x9a3   : > { %2370 = vadd.xlane.f32.xlu1 %v2369_v53 }
 0x9a5   : > { %v5884_v37 = vpop.eup %4952 }
 0x9a6   : > { %v2313_v13 = vpop.xlane.xlu0 %2312  ;;  %v2372_v8 = vsel %vm2294_vm9, %v5884_v37, 0.0 }
 0x9a7   : > { %v2331_v14 = vmax.f32 %v2313_v13, -1e+30  ;;  %2373 = vadd.xlane.f32.xlu1 %v2372_v8 }
 0x9a9   : > { %v5888_v51 = vpop.eup %4954  ;;  %v2341_v25 = vsub.f32 %v5829_v57, %v2331_v14 }
 0x9aa   : > { %v2316_v33 = vpop.xlane.xlu0 %2315  ;;  %v2375_v5 = vsel %vm2294_vm9, %v5888_v51, 0.0 }
 0x9ab   : > { %v2356_v43 = vmul.f32 1.442695, %v2341_v25  ;;  %v2332_v10 = vmax.f32 %v2316_v33, -1e+30  ;;  %2376 = vadd.xlane.f32.xlu1 %v2375_v5 }
 0x9ad   : > { %4956 = vpow2.f32 %v2356_v43  ;;  %v2342_v35 = vsub.f32 %v5833_v24, %v2332_v10 }
 0x9ae   : > { %v2319_v54 = vpop.xlane.xlu0 %2318 }
 0x9af   : > { %v2358_v44 = vmul.f32 1.442695, %v2342_v35  ;;  %v2333_v16 = vmax.f32 %v2319_v54, -1e+30 }
 0x9b1   : > { %4958 = vpow2.f32 %v2358_v44  ;;  %v2343_v9 = vsub.f32 %v5839_v19, %v2333_v16 }
 0x9b2   : > { %v2322_v57 = vpop.xlane.xlu0 %2321  ;;  %4960 = vpow2.f32 %v2354_v12 }
 0x9b3   : > { %v2360_v1 = vmul.f32 1.442695, %v2343_v9  ;;  %v2334_v60 = vmax.f32 %v2322_v57, -1e+30 }
 0x9b5   : > { %v2344_v30 = vsub.f32 %v5843_v47, %v2334_v60  ;;  %4962 = vpow2.f32 %v2360_v1 }
 0x9b6   : > { %v2325_v63 = vpop.xlane.xlu0 %2324 }
 0x9b7   : > { %v2362_v6 = vmul.f32 1.442695, %v2344_v30  ;;  %v2335_v41 = vmax.f32 %v2325_v63, -1e+30 }
 0x9b9   : > { %v2345_v46 = vsub.f32 %v5847_v3, %v2335_v41  ;;  %4964 = vpow2.f32 %v2362_v6 }
 0x9ba   : > { %v5898_v24 = vpop.eup %4956  ;;  %v2637_v8 = vpop.permute.xlu0 %2636 }
 0x9bb   : > { %v2364_v27 = vmul.f32 1.442695, %v2345_v46  ;;  %v2381_v48 = vsel %vm2294_vm9, %v5898_v24, 0.0 }
 0x9bc   : > { %2382 = vadd.xlane.f32.xlu0 %v2381_v48 }
 0x9bd   : > { %4966 = vpow2.f32 %v2364_v27 }
 0x9be   : > { %v5902_v19 = vpop.eup %4958 }
 0x9bf   : > { %v2384_v47 = vsel %vm2294_vm9, %v5902_v19, 0.0  ;;  %v5906_v20 = vpop.eup %4960 }
 0x9c0   : > { %2385 = vadd.xlane.f32.xlu0 %v2384_v47  ;;  %v2378_v3 = vsel %vm2307_vm15, %v5906_v20, 0.0 }
 0x9c2   : > { %v5910_v40 = vpop.eup %4962 }
 0x9c3   : > { %v2387_v49 = vsel %vm2294_vm9, %v5910_v40, 0.0 }
 0x9c4   : > { %2379 = vadd.xlane.f32.xlu0 %v2378_v3 }
 0x9c6   : > { %v5914_v4 = vpop.eup %4964 }
 0x9c7   : > { %v2390_v29 = vsel %vm2294_vm9, %v5914_v4, 0.0 }
 0x9c8   : > { %2388 = vadd.xlane.f32.xlu0 %v2387_v49 }
 0x9ca   : > { %v5916_v52 = vpop.eup %4966 }
 0x9cb   : > { %v2393_v55 = vsel %vm2307_vm15, %v5916_v52, 0.0 }
 0x9cc   : > { %2391 = vadd.xlane.f32.xlu0 %v2390_v29  ;;  %2394 = vadd.xlane.f32.xlu1 %v2393_v55 }
 0x9ce   : > { %v2203_v11 = vpop.xlane.xlu1 %2202 }
 0x9cf   : > { %vm2211_vm12 = vcmp.gt.f32.partialorder %v2203_v11, 0.0 }
 0x9d0   : > { %v2215_v62 = vsel %vm2211_vm12, %v2203_v11, 1.0 }
 0x9d1   : > { %4968 = vrcp.f32 %v2215_v62 }
 0x9d2   : > { %v2200_v18 = vpop.xlane.xlu1 %2199 }
 0x9d3   : > { %vm2210_vm3 = vcmp.gt.f32.partialorder %v2200_v18, 0.0 }
 0x9d4   : > { %v2214_v59 = vsel %vm2210_vm3, %v2200_v18, 1.0 }
 0x9d5   : > { %4970 = vrcp.f32 %v2214_v59 }
 0x9dd   : > { %2747 = vrot.lane.b32.xlu1 %v5271_v34, %s5047_s12 }
 0x9de   : > { %v4969_v2 = vpop.eup %4968 }
 0x9df   : > { %v5930_v13 = vmul.f32 %v4969_v2, %v5853_v36 }
 0x9e2   : > { %v4971_v53 = vpop.eup %4970  ;;  %2634 = vrot.lane.b32.xlu0 %v5265_v32, %s5047_s12 }
 0x9e3   : > { %v5927_v7 = vmul.f32 %v4971_v53, %v5859_v56 }
 0x9e5   : > { %4647 = vmatprep.mubr.msk.f32.mxu0 %vm1476_vm14, %v5927_v7 }
 0x9e6   : > { %4648 = vmatmul.mubr.msk.f32.vlgmr.msra.gmra.mxu0 %vm1476_vm14, %v5930_v13 }
 0x9e7   : > { %4664 = vmatpush3.msk.msra.mxu0 %vm2654_vm4, %v2637_v8  ;;  %4667 = vmatprep.mubr.msk.f32.mxu0 %vm5043_vm1, %v6489_v58 }
 0x9e8   : > { %4665 = vmatprep.subr.mxu0 %v6489_v58 }
 0x9eb   : > { %v2209_v32 = vpop.xlane.xlu0 %2208 }
 0x9ec   : > { %vm2213_vm5 = vcmp.gt.f32.partialorder %v2209_v32, 0.0 }
 0x9ed   : > { %v2217_v34 = vsel %vm2213_vm5, %v2209_v32, 1.0 }
 0x9ee   : > { %4972 = vrcp.f32 %v2217_v34 }
 0x9ef   : > { %v2206_v36 = vpop.xlane.xlu0 %2205 }
 0x9f0   : > { %vm2212_vm6 = vcmp.gt.f32.partialorder %v2206_v36, 0.0 }
 0x9f1   : > { %v2216_v56 = vsel %vm2212_vm6, %v2206_v36, 1.0  ;;  %vm3584_vm6 = vcmask 523264  }
 0x9f2   : > { %4974 = vrcp.f32 %v2216_v56 }
 0x9fb   : > { %v4973_v21 = vpop.eup %4972 }
 0x9fc   : > { %v5944_v33 = vmul.f32 %v4973_v21, %v5864_v31  ;;  %v5962_v31 = vld [vmem:[%s6472_s5 + $0x8] sm:$0xff] }
 0x9fd   : > { %3140 = vrot.lane.b32.xlu1 %v5962_v31, %s5052_s27 }
 0x9ff   : > { %v4975_v14 = vpop.eup %4974 }
 0xa00   : > { %v5941_v25 = vmul.f32 %v4975_v14, %v5868_v39  ;;  %v5957_v39 = vld [vmem:[%s6472_s5] sm:$0xff] }
 0xa01   : > { %3031 = vrot.lane.b32.xlu0 %v5957_v39, %s5052_s27 }
 0xa02   : > { %4660 = vmatprep.mubr.msk.f32.mxu1 %vm1476_vm14, %v5941_v25 }
 0xa03   : > { %4661 = vmatmul.mubr.msk.f32.vlgmr.msra.gmra.mxu1 %vm1476_vm14, %v5944_v33 }
 0xa04   : > { %4683 = vmatpush3.msk.msra.mxu1 %vm2654_vm4, %v2750_v50  ;;  %4686 = vmatprep.mubr.msk.f32.mxu1 %vm5043_vm1, %v6489_v58 }
 0xa05   : > { %4684 = vmatprep.subr.mxu1 %v6489_v58 }
 0xa28   : > { %v2368_v5 = vpop.xlane.xlu1 %2367 }
 0xa29   : > { %vm2396_vm7 = vcmp.gt.f32.partialorder %v2368_v5, 0.0 }
 0xa2a   : > { %v2406_v43 = vsel %vm2396_vm7, %v2368_v5, 1.0  ;;  %vm4006_vm7 = vcmask 834560  }
 0xa2b   : > { %4976 = vrcp.f32 %v2406_v43 }
 0xa2c   : > { %v2371_v26 = vpop.xlane.xlu1 %2370 }
 0xa2d   : > { %vm2397_vm8 = vcmp.gt.f32.partialorder %v2371_v26, 0.0 }
 0xa2e   : > { %v2407_v12 = vsel %vm2397_vm8, %v2371_v26, 1.0  ;;  %vm4008_vm8 = vcmask 833536  }
 0xa30   : > { %v2374_v35 = vpop.xlane.xlu1 %2373 }
 0xa31   : > { %vm2398_vm13 = vcmp.gt.f32.partialorder %v2374_v35, 0.0 }
 0xa32   : > { %v2408_v1 = vsel %vm2398_vm13, %v2374_v35, 1.0 }
 0xa34   : > { %v2377_v9 = vpop.xlane.xlu1 %2376 }
 0xa35   : > { %vm2399_vm15 = vcmp.gt.f32.partialorder %v2377_v9, 0.0 }
 0xa36   : > { %v2409_v30 = vsel %vm2399_vm15, %v2377_v9, 1.0 }
 0xa38   : > { %v4977_v6 = vpop.eup %4976 }
 0xa39   : > { %v5969_v55 = vmul.f32 %v4977_v6, %v5876_v17 }
 0xa45   : > { %v2383_v10 = vpop.xlane.xlu0 %2382 }
 0xa46   : > { %vm2401_vm10 = vcmp.gt.f32.partialorder %v2383_v10, 0.0 }
 0xa47   : > { %v2411_v54 = vsel %vm2401_vm10, %v2383_v10, 1.0 }
 0xa48   : > { %4978 = vrcp.f32 %v2411_v54 }
 0xa49   : > { %v2386_v44 = vpop.xlane.xlu0 %2385  ;;  %4980 = vrcp.f32 %v2407_v12 }
 0xa4a   : > { %vm2402_vm11 = vcmp.gt.f32.partialorder %v2386_v44, 0.0 }
 0xa4b   : > { %v2412_v16 = vsel %vm2402_vm11, %v2386_v44, 1.0 }
 0xa4c   : > { %4982 = vrcp.f32 %v2412_v16 }
 0xa4d   : > { %v2380_v57 = vpop.xlane.xlu0 %2379  ;;  %4984 = vrcp.f32 %v2408_v1 }
 0xa4e   : > { %vm2400_vm12 = vcmp.gt.f32.partialorder %v2380_v57, 0.0 }
 0xa4f   : > { %v2410_v41 = vsel %vm2400_vm12, %v2380_v57, 1.0 }
 0xa51   : > { %v2389_v60 = vpop.xlane.xlu0 %2388 }
 0xa52   : > { %vm2403_vm3 = vcmp.gt.f32.partialorder %v2389_v60, 0.0 }
 0xa53   : > { %v2413_v63 = vsel %vm2403_vm3, %v2389_v60, 1.0 }
 0xa54   : > { %4986 = vrcp.f32 %v2413_v63 }
 0xa55   : > { %4988 = vrcp.f32 %v2409_v30  ;;  %v2395_v46 = vpop.xlane.xlu1 %2394  ;;  %v2392_v27 = vpop.xlane.xlu0 %2391 }
 0xa56   : > { %v4979_v48 = vpop.eup %4978  ;;  %vm2405_vm4 = vcmp.gt.f32.partialorder %v2395_v46, 0.0  ;;  %vm2404_vm5 = vcmp.gt.f32.partialorder %v2392_v27, 0.0  ;;  %4990 = vrcp.f32 %v2410_v41 }
 0xa57   : > { %v2414_v47 = vsel %vm2404_vm5, %v2392_v27, 1.0  ;;  %v2415_v3 = vsel %vm2405_vm4, %v2395_v46, 1.0  ;;  %v4981_v49 = vpop.eup %4980  ;;  %v5972_v11 = vmul.f32 %v4979_v48, %v5898_v24 }
 0xa58   : > { %4992 = vrcp.f32 %v2414_v47  ;;  %v5983_v17 = vmul.f32 %v4981_v49, %v5880_v15  ;;  %v5024_v49 = vld [vmem:[%s5151_s11 + $0x8] sm:$0x7f] }
 0xa59   : > { %v2748_v50 = vpop.permute.xlu1 %2747  ;;  %v2635_v29 = vpop.permute.xlu0 %2634  ;;  %4994 = vrcp.f32 %v2415_v3 }
 0xa5a   : > { %v4983_v62 = vpop.eup %4982  ;;  %4666 = vmatpush3.msra.mxu0 %v2635_v29  ;;  %4685 = vmatpush3.msra.mxu1 %v2748_v50 }
 0xa5b   : > { %4668 = vmatmul.mubr.msk.f32.vlgmr.msra.gmra.mxu0 %vm2294_vm9, %v5969_v55  ;;  %4687 = vmatmul.mubr.msk.f32.vlgmr.msra.gmra.mxu1 %vm2294_vm9, %v5972_v11  ;;  %v5986_v24 = vmul.f32 %v4983_v62, %v5902_v19  ;;  %v4985_v18 = vpop.eup %4984  ;;  %v6087_v62 = vld [vmem:[%s6473_s6 + $0x18] sm:$0xff] }
 0xa5c   : > { %4670 = vmatprep.mubr.msk.f32.mxu0 %vm5043_vm1, %v6489_v58  ;;  %4689 = vmatprep.mubr.msk.f32.mxu1 %vm5043_vm1, %v6489_v58  ;;  %v6001_v19 = vmul.f32 %v4985_v18, %v5884_v37 }
 0xa5d   : > { %4701 = vmatprep.subr.mxu0 %v5957_v39  ;;  %4706 = vmatprep.subr.mxu1 %v5962_v31 }
 0xa5e   : > { %4702 = vmatpush3.msra.mxu0 %v5957_v39  ;;  %4707 = vmatpush3.msra.mxu1 %v5962_v31 }
 0xa5f   : > { %4671 = vmatmul.mubr.msk.f32.gmra.mxu0 %vm2294_vm9, %v5983_v17  ;;  %4690 = vmatmul.mubr.msk.f32.gmra.mxu1 %vm2294_vm9, %v5986_v24 }
 0xa60   : > { %4673 = vmatprep.mubr.msk.f32.mxu0 %vm5043_vm1, %v6489_v58  ;;  %4692 = vmatprep.mubr.msk.f32.mxu1 %vm5043_vm1, %v6489_v58 }
 0xa61   : > { %v4987_v15 = vpop.eup %4986  ;;  %4711 = vmatprep.subr.mxu0 %v6489_v58  ;;  %4728 = vmatprep.subr.mxu1 %v6489_v58 }
 0xa62   : > { %v4989_v59 = vpop.eup %4988  ;;  %v6006_v2 = vmul.f32 %v4987_v15, %v5910_v40 }
 0xa63   : > { %4674 = vmatmul.mubr.msk.f32.gmra.mxu0 %vm2294_vm9, %v6001_v19  ;;  %v4991_v53 = vpop.eup %4990  ;;  %v6015_v37 = vmul.f32 %v4989_v59, %v5888_v51 }
 0xa64   : > { %4693 = vmatmul.mubr.msk.f32.gmra.mxu1 %vm2294_vm9, %v6006_v2  ;;  %4676 = vmatprep.mubr.msk.f32.mxu0 %vm5043_vm1, %v6489_v58  ;;  %v6029_v51 = vmul.f32 %v4991_v53, %v5906_v20 }
 0xa65   : > { %4695 = vmatprep.mubr.msk.f32.mxu1 %vm5043_vm1, %v6489_v58  ;;  %v4993_v8 = vpop.eup %4992 }
 0xa66   : > { %v6022_v40 = vmul.f32 %v4993_v8, %v5914_v4  ;;  %v4995_v32 = vpop.eup %4994 }
 0xa67   : > { %4677 = vmatmul.mubr.msk.f32.gmra.mxu0 %vm2294_vm9, %v6015_v37  ;;  %v6036_v34 = vmul.f32 %v4995_v32, %v5916_v52 }
 0xa68   : > { %4679 = vmatprep.mubr.msk.f32.mxu0 %vm5043_vm1, %v6489_v58  ;;  %4696 = vmatmul.mubr.msk.f32.gmra.mxu1 %vm2294_vm9, %v6022_v40 }
 0xa69   : > { %4698 = vmatprep.mubr.msk.f32.mxu1 %vm5043_vm1, %v6489_v58 }
 0xa6b   : > { %4680 = vmatmul.mubr.msk.f32.gmra.mxu0 %vm2294_vm9, %v6029_v51 }
 0xa6c   : > { %4699 = vmatmul.mubr.msk.f32.gmra.mxu1 %vm2294_vm9, %v6036_v34  ;;  %vm3026_vm9 = vcmask 260096  }
 0xa6f   : > { %v3141_v14 = vpop.permute.xlu1 %3140 }
 0xa73   : > { %v3032_v56 = vpop.permute.xlu0 %3031 }
 0xaa6   : > { %v4649_v4 = vpop.f32.mrf.mxu0 }
 0xaa8   : > { %v2528_v36 = vpop.f32.mrf.mxu0 }
 0xaa9   : > { %4703 = vmatprep.mubr.msk.f32.mxu0 %vm826_vm2, %v2528_v36 }
 0xaaa   : > { %4704 = vmatmul.mubr.msk.f32.vlgmr.msra.gmra.mxu0 %vm826_vm2, %v4649_v4 }
 0xaab   : > { %4712 = vmatpush3.msra.mxu0 %v3032_v56  ;;  %4713 = vmatprep.mubr.msk.f32.mxu0 %vm5043_vm1, %v6489_v58 }
 0xaac   : > { %4745 = vmatprep.subr.mxu0 %v6087_v62 }
 0xac3   : > { %v4662_v20 = vpop.f32.mrf.mxu1 }
 0xac5   : > { %v2625_v21 = vpop.f32.mrf.mxu1 }
 0xac6   : > { %4708 = vmatprep.mubr.msk.f32.mxu1 %vm826_vm2, %v2625_v21 }
 0xac7   : > { %4709 = vmatmul.mubr.msk.f32.vlgmr.msra.gmra.mxu1 %vm826_vm2, %v4662_v20 }
 0xac8   : > { %4729 = vmatpush3.msra.mxu1 %v3141_v14  ;;  %4730 = vmatprep.mubr.msk.f32.mxu1 %vm5043_vm1, %v6489_v58 }
 0xac9   : > { %4756 = vmatprep.subr.mxu1 %v6489_v58 }
 0xb1b   : > { %v2723_v52 = vpop.f32.mrf.mxu0  ;;  %v2835_v39 = vpop.f32.mrf.mxu1 }
 0xb1c   : > { %4714 = vmatmul.mubr.msk.f32.vlgmr.msra.gmra.mxu0 %vm826_vm2, %v2723_v52  ;;  %4731 = vmatmul.mubr.msk.f32.vlgmr.msra.gmra.mxu1 %vm826_vm2, %v2835_v39  ;;  %v5025_v52 = vld [vmem:[%s5225_s30] sm:$0xff] }
 0xb1d   : > { %v4669_v31 = vpop.f32.mrf.mxu0  ;;  %v4688_v5 = vpop.f32.mrf.mxu1  ;;  %4716 = vmatprep.mubr.msk.f32.mxu0 %vm5043_vm1, %v6489_v58  ;;  %4733 = vmatprep.mubr.msk.f32.mxu1 %vm5043_vm1, %v6489_v58 }
 0xb1e   : > { %4746 = vmatpush3.msra.mxu0 %v6087_v62 }
 0xb1f   : > { %v2728_v26 = vpop.f32.mrf.mxu0  ;;  %v2840_v43 = vpop.f32.mrf.mxu1 }
 0xb20   : > { %4717 = vmatmul.mubr.msk.f32.gmra.mxu0 %vm826_vm2, %v2728_v26  ;;  %4734 = vmatmul.mubr.msk.f32.gmra.mxu1 %vm826_vm2, %v2840_v43 }
 0xb21   : > { %v4672_v10 = vpop.f32.mrf.mxu0  ;;  %v4691_v35 = vpop.f32.mrf.mxu1  ;;  %4719 = vmatprep.mubr.msk.f32.mxu0 %vm5043_vm1, %v6489_v58  ;;  %4736 = vmatprep.mubr.msk.f32.mxu1 %vm5043_vm1, %v6489_v58 }
 0xb22   : > { %v5026_v10 = vld [vmem:[%s5151_s11] sm:$0xff]  ;;  %s5053_s11 = smov 64  }
 0xb23   : > { %v2733_v54 = vpop.f32.mrf.mxu0 }
 0xb24   : > { %v2845_v12 = vpop.f32.mrf.mxu1  ;;  %4720 = vmatmul.mubr.msk.f32.gmra.mxu0 %vm826_vm2, %v2733_v54 }
 0xb25   : > { %v4675_v44 = vpop.f32.mrf.mxu0  ;;  %4737 = vmatmul.mubr.msk.f32.gmra.mxu1 %vm826_vm2, %v2845_v12  ;;  %4722 = vmatprep.mubr.msk.f32.mxu0 %vm5043_vm1, %v6489_v58 }
 0xb26   : > { %v4694_v16 = vpop.f32.mrf.mxu1  ;;  %4739 = vmatprep.mubr.msk.f32.mxu1 %vm5043_vm1, %v6489_v58 }
 0xb27   : > { %v2738_v9 = vpop.f32.mrf.mxu0 }
 0xb28   : > { %4723 = vmatmul.mubr.msk.f32.gmra.mxu0 %vm826_vm2, %v2738_v9  ;;  %v2850_v57 = vpop.f32.mrf.mxu1  ;;  %v5027_v9 = vld [vmem:[%s5225_s30 + $0x8] sm:$0xff] }
 0xb29   : > { %v4678_v1 = vpop.f32.mrf.mxu0  ;;  %4725 = vmatprep.mubr.msk.f32.mxu0 %vm5043_vm1, %v6489_v58  ;;  %4740 = vmatmul.mubr.msk.f32.gmra.mxu1 %vm826_vm2, %v2850_v57 }
 0xb2a   : > { %v4697_v60 = vpop.f32.mrf.mxu1  ;;  %4742 = vmatprep.mubr.msk.f32.mxu1 %vm5043_vm1, %v6489_v58 }
 0xb2b   : > { %v2743_v30 = vpop.f32.mrf.mxu0 }
 0xb2c   : > { %4726 = vmatmul.mubr.msk.f32.gmra.mxu0 %vm826_vm2, %v2743_v30  ;;  %v2855_v63 = vpop.f32.mrf.mxu1 }
 0xb2d   : > { %v4681_v6 = vpop.f32.mrf.mxu0  ;;  %4743 = vmatmul.mubr.msk.f32.gmra.mxu1 %vm826_vm2, %v2855_v63  ;;  %vm3260_vm2 = vcmask 254976  }
 0xb2e   : > { %v4700_v41 = vpop.f32.mrf.mxu1  ;;  %4764 = vmatprep.mubr.msk.f32.mxu1 %vm5043_vm1, %v6489_v58 }
 0xb6a   : > { %v4705_v46 = vpop.f32.mrf.mxu0 }
 0xb6b   : > { %v3027_v48 = vsel %vm3026_vm9, %v4705_v46, 0.0 }
 0xb6c   : > { %v2933_v15 = vpop.f32.mrf.mxu0 }
 0xb6d   : > { %v3023_v32 = vsel %vm442_vm0, %v2933_v15, 0.0 }
 0xb87   : > { %v4710_v27 = vpop.f32.mrf.mxu1 }
 0xb88   : > { %v3028_v47 = vsel %vm3026_vm9, %v4710_v27, 0.0 }
 0xb89   : > { %v3029_v3 = vadd.f32 %v3028_v47, %v3027_v48  ;;  %v3014_v18 = vpop.f32.mrf.mxu1 }
 0xb8a   : > { %v3024_v59 = vsel %vm442_vm0, %v3014_v18, 0.0 }
 0xb8b   : > { %v6080_v50 = vadd.f32 %v5024_v49, %v3029_v3  ;;  %v3025_v56 = vadd.f32 %v3024_v59, %v3023_v32  ;;  %v5028_v3 = vld [vmem:[%s5225_s30 + $0x10] sm:$0xff] }
 0xb8d   : > { %v3269_v29 = vsel %vm3026_vm9, %v6080_v50, 0.0  ;;  %v6101_v35 = vadd.f32 %v5026_v10, %v3025_v56  ;;  %v5029_v56 = vld [vmem:[%s5225_s30 + $0x18] sm:$0xff] }
 0xb8e   : > { %3270 = vadd.xlane.f32.xlu1 %v3269_v29 }
 0xb8f   : > { %v3266_v41 = vsel %vm442_vm0, %v6101_v35, 0.0 }
 0xbdc   : > { %v3115_v53 = vpop.f32.mrf.mxu0  ;;  %v3224_v8 = vpop.f32.mrf.mxu1 }
 0xbdd   : > { %v3248_v4 = vsel %vm442_vm0, %v3115_v53, 0.0  ;;  %v3249_v36 = vsel %vm442_vm0, %v3224_v8, 0.0 }
 0xbde   : > { %v3250_v20 = vadd.f32 %v3249_v36, %v3248_v4  ;;  %v4715_v21 = vpop.f32.mrf.mxu0  ;;  %v4732_v14 = vpop.f32.mrf.mxu1 }
 0xbe0   : > { %v6096_v39 = vadd.f32 %v5025_v52, %v3250_v20  ;;  %v3120_v31 = vpop.f32.mrf.mxu0  ;;  %v3229_v5 = vpop.f32.mrf.mxu1 }
 0xbe1   : > { %v3251_v26 = vsel %vm442_vm0, %v3120_v31, 0.0  ;;  %v3252_v43 = vsel %vm442_vm0, %v3229_v5, 0.0 }
 0xbe2   : > { %v3253_v54 = vadd.f32 %v3252_v43, %v3251_v26  ;;  %v4718_v12 = vpop.f32.mrf.mxu0  ;;  %v4735_v44 = vpop.f32.mrf.mxu1  ;;  %v3298_v16 = vsel %vm442_vm0, %v6096_v39, 0.0  ;;  %v5030_v43 = vld [vmem:[%s5225_s30 + $0x20] sm:$0x3] }
 0xbe3   : > { %3299 = vadd.xlane.f32.xlu0 %v3298_v16 }
 0xbe4   : > { %v6106_v57 = vadd.f32 %v5027_v9, %v3253_v54  ;;  %v3125_v1 = vpop.f32.mrf.mxu0 }
 0xbe5   : > { %v3254_v60 = vsel %vm442_vm0, %v3125_v1, 0.0  ;;  %v3234_v30 = vpop.f32.mrf.mxu1 }
 0xbe6   : > { %v3255_v63 = vsel %vm442_vm0, %v3234_v30, 0.0  ;;  %v4721_v6 = vpop.f32.mrf.mxu0  ;;  %v3301_v46 = vsel %vm442_vm0, %v6106_v57, 0.0 }
 0xbe7   : > { %v3256_v27 = vadd.f32 %v3255_v63, %v3254_v60  ;;  %v4738_v48 = vpop.f32.mrf.mxu1  ;;  %3267 = vadd.xlane.f32.xlu0 %v3266_v41  ;;  %3302 = vadd.xlane.f32.xlu1 %v3301_v46  ;;  %v3365_v60 = vld [vmem:[%s6473_s6 + $0x10] sm:$0xff] }
 0xbe8   : > { %v3130_v47 = vpop.f32.mrf.mxu0  ;;  %4747 = vmatprep.subr.mxu0 %v3365_v60 }
 0xbe9   : > { %v3295_v49 = vadd.f32 %v5028_v3, %v3256_v27  ;;  %v3257_v29 = vsel %vm442_vm0, %v3130_v47, 0.0  ;;  %v3239_v18 = vpop.f32.mrf.mxu1  ;;  %4748 = vmatpush3.msra.mxu0 %v3365_v60 }
 0xbea   : > { %v4724_v15 = vpop.f32.mrf.mxu0  ;;  %v3258_v59 = vsel %vm442_vm0, %v3239_v18, 0.0 }
 0xbeb   : > { %v3304_v53 = vsel %vm442_vm0, %v3295_v49, 0.0  ;;  %v3259_v8 = vadd.f32 %v3258_v59, %v3257_v29  ;;  %v4741_v32 = vpop.f32.mrf.mxu1 }
 0xbec   : > { %3305 = vadd.xlane.f32.xlu0 %v3304_v53  ;;  %v3135_v4 = vpop.f32.mrf.mxu0 }
 0xbed   : > { %v3261_v36 = vsel %vm3260_vm2, %v3135_v4, 0.0  ;;  %v3296_v20 = vadd.f32 %v5029_v56, %v3259_v8  ;;  %v3244_v21 = vpop.f32.mrf.mxu1 }
 0xbee   : > { %v4727_v14 = vpop.f32.mrf.mxu0  ;;  %v3262_v52 = vsel %vm3260_vm2, %v3244_v21, 0.0 }
 0xbef   : > { %v3263_v31 = vadd.f32 %v3262_v52, %v3261_v36  ;;  %v4744_v5 = vpop.f32.mrf.mxu1  ;;  %v3307_v26 = vsel %vm442_vm0, %v3296_v20, 0.0 }
 0xbf0   : > { %3308 = vadd.xlane.f32.xlu0 %v3307_v26 }
 0xbf1   : > { %v3297_v10 = vadd.f32 %v5030_v43, %v3263_v31 }
 0xbf3   : > { %v3310_v54 = vsel %vm3260_vm2, %v3297_v10, 0.0 }
 0xbf4   : > { %3311 = vadd.xlane.f32.xlu1 %v3310_v54  ;;  %v6187_v54 = vld [vmem:[%s6474_s7 + $0x20] sm:$0xff] }
 0xc05   : > { %3468 = vrot.lane.b32.xlu1 %v6087_v62, %s5053_s11  ;;  %v3364_v62 = vld [vmem:[%s6473_s6 + $0x8] sm:$0xff] }
 0xc06   : > { %4749 = vmatprep.subr.mxu0 %v3364_v62 }
 0xc07   : > { %4750 = vmatpush3.msra.mxu0 %v3364_v62 }
 0xc17   : > { %v3271_v12 = vpop.xlane.xlu1 %3270 }
 0xc18   : > { %v3274_v44 = vmul.f32 0.03125, %v3271_v12  ;;  %v6195_v12 = vld [vmem:[%s6474_s7 + $0x10] sm:$0xff] }
 0xc1a   : > { %v6127_v16 = vsub.f32 %v6080_v50, %v3274_v44  ;;  %v3363_v50 = vld [vmem:[%s6473_s6] sm:$0xff] }
 0xc1b   : > { %4751 = vmatprep.subr.mxu0 %v3363_v50  ;;  %v6202_v44 = vld [vmem:[%s6474_s7] sm:$0xff] }
 0xc1c   : > { %v3278_v9 = vmul.f32 %v6127_v16, %v6127_v16  ;;  %4752 = vmatpush3.msra.mxu0 %v3363_v50 }
 0xc1e   : > { %v3282_v1 = vsel %vm3026_vm9, %v3278_v9, 0.0  ;;  %v3374_v9 = vld [vmem:[%s6474_s7 + $0x38] sm:$0xff] }
 0xc1f   : > { %3283 = vadd.xlane.f32.xlu0 %v3282_v1  ;;  %4779 = vmatprep.subr.mxu0 %v3374_v9  ;;  %v6213_v1 = vld [vmem:[%s6474_s7 + $0x28] sm:$0xff] }
 0xc6c   : > { %v3300_v30 = vpop.xlane.xlu0 %3299 }
 0xc6d   : > { %v3313_v63 = vmul.f32 0.03125, %v3300_v30 }
 0xc6f   : > { %v6142_v6 = vsub.f32 %v6096_v39, %v3313_v63 }
 0xc70   : > { %v3268_v41 = vpop.xlane.xlu0 %3267  ;;  %v3303_v46 = vpop.xlane.xlu1 %3302 }
 0xc71   : > { %v3273_v27 = vmul.f32 0.03125, %v3268_v41  ;;  %v3314_v48 = vmul.f32 0.03125, %v3303_v46  ;;  %v3323_v47 = vmul.f32 %v6142_v6, %v6142_v6  ;;  %v5031_v41 = vld [vmem:[%s5418_s18 + $0x8] sm:$0x7f] }
 0xc73   : > { %v6147_v3 = vsub.f32 %v6101_v35, %v3273_v27  ;;  %v6150_v29 = vsub.f32 %v6106_v57, %v3314_v48  ;;  %v3328_v18 = vsel %vm442_vm0, %v3323_v47, 0.0 }
 0xc74   : > { %3329 = vadd.xlane.f32.xlu0 %v3328_v18 }
 0xc75   : > { %v3306_v15 = vpop.xlane.xlu0 %3305  ;;  %v3277_v39 = vmul.f32 %v6147_v3, %v6147_v3  ;;  %v3324_v8 = vmul.f32 %v6150_v29, %v6150_v29 }
 0xc76   : > { %v3315_v59 = vmul.f32 0.03125, %v3306_v15 }
 0xc77   : > { %v3279_v53 = vsel %vm442_vm0, %v3277_v39, 0.0  ;;  %v3331_v36 = vsel %vm442_vm0, %v3324_v8, 0.0 }
 0xc78   : > { %v6158_v32 = vsub.f32 %v3295_v49, %v3315_v59  ;;  %3280 = vadd.xlane.f32.xlu1 %v3279_v53 }
 0xc79   : > { %v3309_v35 = vpop.xlane.xlu0 %3308 }
 0xc7a   : > { %v3325_v57 = vmul.f32 %v6158_v32, %v6158_v32  ;;  %v3316_v4 = vmul.f32 0.03125, %v3309_v35 }
 0xc7c   : > { %3332 = vadd.xlane.f32.xlu1 %v3331_v36  ;;  %v3334_v56 = vsel %vm442_vm0, %v3325_v57, 0.0  ;;  %v6164_v21 = vsub.f32 %v3296_v20, %v3316_v4 }
 0xc7d   : > { %3335 = vadd.xlane.f32.xlu0 %v3334_v56  ;;  %v3312_v14 = vpop.xlane.xlu1 %3311 }
 0xc7e   : > { %v3317_v52 = vmul.f32 0.03125, %v3312_v14  ;;  %v3326_v49 = vmul.f32 %v6164_v21, %v6164_v21 }
 0xc80   : > { %v6168_v31 = vsub.f32 %v3297_v10, %v3317_v52  ;;  %v3337_v5 = vsel %vm442_vm0, %v3326_v49, 0.0  ;;  %v6180_v10 = vld [vmem:[%s6474_s7 + $0x30] sm:$0xff] }
 0xc81   : > { %3338 = vadd.xlane.f32.xlu1 %v3337_v5  ;;  %v3469_v26 = vpop.permute.xlu1 %3468 }
 0xc82   : > { %v3327_v43 = vmul.f32 %v6168_v31, %v6168_v31  ;;  %4757 = vmatpush3.msra.mxu1 %v3469_v26 }
 0xc83   : > { %4758 = vmatprep.subr.mxu1 %v6489_v58 }
 0xc84   : > { %v3340_v20 = vsel %vm3260_vm2, %v3327_v43, 0.0 }
 0xc85   : > { %3341 = vadd.xlane.f32.xlu0 %v3340_v20 }
 0xc92   : > { %3464 = vrot.lane.b32.xlu1 %v3364_v62, %s5053_s11  ;;  %v6227_v62 = vld [vmem:[%s6474_s7 + $0x8] sm:$0xff] }
 0xc96   : > { %3462 = vrot.lane.b32.xlu1 %v3363_v50, %s5053_s11 }
 0xc9a   : > { %3712 = vrot.lane.b32.xlu1 %v6180_v10, %s5052_s27 }
 0xc9b   : > { %3466 = vrot.lane.b32.xlu0 %v3365_v60, %s5053_s11  ;;  %v6220_v60 = vld [vmem:[%s6474_s7 + $0x18] sm:$0xff]  ;;  %s6420_s11 = scalar_lea.vmem %s6476_s9, %s4829_s26 }
 0xc9e   : > { %3708 = vrot.lane.b32.xlu1 %v6187_v54, %s5052_s27 }
 0xc9f   : > { %3714 = vrot.lane.b32.xlu0 %v3374_v9, %s5052_s27 }
 0xca2   : > { %3704 = vrot.lane.b32.xlu1 %v6195_v12, %s5052_s27 }
 0xca3   : > { %3710 = vrot.lane.b32.xlu0 %v6213_v1, %s5052_s27 }
 0xca6   : > { %3700 = vrot.lane.b32.xlu1 %v6202_v44, %s5052_s27 }
 0xca7   : > { %3706 = vrot.lane.b32.xlu0 %v6220_v60, %s5052_s27 }
 0xca8   : > { %v3284_v50 = vpop.xlane.xlu0 %3283 }
 0xca9   : > { %v3286_v30 = vmul.f32 0.03125, %v3284_v50 }
 0xcab   : > { %3702 = vrot.lane.b32.xlu0 %v6227_v62, %s5052_s27  ;;  %v3288_v27 = vadd.f32 1e-05, %v3286_v30  ;;  %s5055_s27 = smov 34  }
 0xcad   : > { %4996 = vrsqrt.f32 %v3288_v27 }
 0xcba   : > { %v4997_v36 = vpop.eup %4996 }
 0xcbb   : > { %v6242_v26 = vmul.f32 %v4997_v36, %v6127_v16 }
 0xccf   : > { %3901 = vxpose.xlu1.b32.start [1/5] (short) (narrow) %v5969_v55, 16 }
 0xcd3   : > { %3902 = vxpose.xlu1.b32.cont [2/5] (short) (narrow) %v5983_v17, 16 }
 0xcd7   : > { %3903 = vxpose.xlu1.b32.cont [3/5] (short) (narrow) %v6001_v19, 16 }
 0xcdb   : > { %3904 = vxpose.xlu1.b32.cont [4/5] (short) (narrow) %v6015_v37, 16 }
 0xcdf   : > { %3905 = vxpose.xlu1.b32.end [5/5] (short) (narrow) %v6029_v51, 16 }
 0xcfd   : > { %v3330_v63 = vpop.xlane.xlu0 %3329  ;;  %1239 = vrot.lane.b32.xlu1 %v5031_v41, %s5054_s23 }
 0xcfe   : > { %v3343_v46 = vmul.f32 0.03125, %v3330_v63 }
 0xd00   : > { %v3348_v55 = vadd.f32 1e-05, %v3343_v46 }
 0xd01   : > { %v3281_v48 = vpop.xlane.xlu1 %3280 }
 0xd02   : > { %v3285_v47 = vmul.f32 0.03125, %v3281_v48 }
 0xd04   : > { %v3287_v18 = vadd.f32 1e-05, %v3285_v47 }
 0xd05   : > { %v3333_v17 = vpop.xlane.xlu1 %3332 }
 0xd06   : > { %4998 = vrsqrt.f32 %v3287_v18  ;;  %v3344_v19 = vmul.f32 0.03125, %v3333_v17  ;;  %v3336_v37 = vpop.xlane.xlu0 %3335 }
 0xd07   : > { %5000 = vrsqrt.f32 %v3348_v55  ;;  %v3345_v51 = vmul.f32 0.03125, %v3336_v37 }
 0xd08   : > { %v3349_v15 = vadd.f32 1e-05, %v3344_v19 }
 0xd09   : > { %v3350_v39 = vadd.f32 1e-05, %v3345_v51 }
 0xd0a   : > { %5002 = vrsqrt.f32 %v3349_v15  ;;  %v3339_v59 = vpop.xlane.xlu1 %3338 }
 0xd0b   : > { %v3346_v53 = vmul.f32 0.03125, %v3339_v59  ;;  %5004 = vrsqrt.f32 %v3350_v39 }
 0xd0d   : > { %v3351_v8 = vadd.f32 1e-05, %v3346_v53 }
 0xd0e   : > { %v3342_v35 = vpop.xlane.xlu0 %3341  ;;  %v3465_v57 = vpop.permute.xlu1 %3464 }
 0xd0f   : > { %v3347_v4 = vmul.f32 0.03125, %v3342_v35  ;;  %5006 = vrsqrt.f32 %v3351_v8 }
 0xd11   : > { %v3352_v14 = vadd.f32 1e-05, %v3347_v4 }
 0xd12   : > { %v3467_v52 = vpop.permute.xlu0 %3466  ;;  %v3463_v43 = vpop.permute.xlu1 %3462 }
 0xd13   : > { %v4999_v56 = vpop.eup %4998  ;;  %4759 = vmatpush3.msra.mxu1 %v3467_v52  ;;  %5008 = vrsqrt.f32 %v3352_v14 }
 0xd14   : > { %v5001_v49 = vpop.eup %5000  ;;  %v6239_v5 = vmul.f32 %v4999_v56, %v6147_v3  ;;  %4760 = vmatprep.subr.mxu1 %v6489_v58 }
 0xd15   : > { %4761 = vmatpush3.msra.mxu1 %v3465_v57  ;;  %v6248_v20 = vmul.f32 %v5001_v49, %v6142_v6 }
 0xd16   : > { %4753 = vmatprep.mubr.msk.f32.mxu0 %vm442_vm0, %v6239_v5  ;;  %4762 = vmatprep.subr.mxu1 %v6489_v58  ;;  %v3713_v16 = vpop.permute.xlu1 %3712  ;;  %v3715_v30 = vpop.permute.xlu0 %3714 }
 0xd17   : > { %4754 = vmatmul.mubr.msk.f32.vlgmr.msra.gmra.mxu0 %vm442_vm0, %v6242_v26  ;;  %v5003_v3 = vpop.eup %5002  ;;  %4763 = vmatpush3.msra.mxu1 %v3463_v43 }
 0xd18   : > { %4780 = vmatpush3.msra.mxu0 %v3374_v9  ;;  %4765 = vmatmul.mubr.msk.f32.vlgmr.msra.gmra.mxu1 %vm442_vm0, %v6248_v20  ;;  %v6260_v6 = vmul.f32 %v5003_v3, %v6150_v29  ;;  %v5005_v50 = vpop.eup %5004 }
 0xd19   : > { %4798 = vmatprep.subr.mxu1 %v6489_v58  ;;  %4767 = vmatprep.mubr.msk.f32.mxu1 %vm5043_vm1, %v6489_v58  ;;  %v6270_v9 = vmul.f32 %v5005_v50, %v6158_v32 }
 0xd1a   : > { %4781 = vmatprep.subr.mxu0 %v6180_v10  ;;  %4799 = vmatpush3.msra.mxu1 %v3715_v30  ;;  %v3709_v29 = vpop.permute.xlu1 %3708  ;;  %v3711_v63 = vpop.permute.xlu0 %3710 }
 0xd1b   : > { %4782 = vmatpush3.msra.mxu0 %v6180_v10  ;;  %4800 = vmatprep.subr.mxu1 %v6489_v58 }
 0xd1c   : > { %4783 = vmatprep.subr.mxu0 %v6213_v1  ;;  %4768 = vmatmul.mubr.msk.f32.gmra.mxu1 %vm442_vm0, %v6260_v6  ;;  %v5007_v10 = vpop.eup %5006 }
 0xd1d   : > { %4784 = vmatpush3.msra.mxu0 %v6213_v1  ;;  %4770 = vmatprep.mubr.msk.f32.mxu1 %vm5043_vm1, %v6489_v58  ;;  %v6281_v32 = vmul.f32 %v5007_v10, %v6164_v21 }
 0xd1e   : > { %4785 = vmatprep.subr.mxu0 %v6187_v54  ;;  %4801 = vmatpush3.msra.mxu1 %v3713_v16  ;;  %v3707_v41 = vpop.permute.xlu0 %3706 }
 0xd1f   : > { %4786 = vmatpush3.msra.mxu0 %v6187_v54  ;;  %4802 = vmatprep.subr.mxu1 %v6489_v58  ;;  %v3705_v54 = vpop.permute.xlu1 %3704 }
 0xd20   : > { %4771 = vmatmul.mubr.msk.f32.gmra.mxu1 %vm442_vm0, %v6270_v9  ;;  %4787 = vmatprep.subr.mxu0 %v6220_v60  ;;  %v5009_v1 = vpop.eup %5008 }
 0xd21   : > { %4773 = vmatprep.mubr.msk.f32.mxu1 %vm5043_vm1, %v6489_v58  ;;  %4803 = vmatpush3.msra.mxu1 %v3711_v63  ;;  %v6292_v21 = vmul.f32 %v5009_v1, %v6168_v31 }
 0xd22   : > { %4804 = vmatprep.subr.mxu1 %v6489_v58  ;;  %4788 = vmatpush3.msra.mxu0 %v6220_v60  ;;  %v3703_v46 = vpop.permute.xlu0 %3702 }
 0xd23   : > { %4805 = vmatpush3.msra.mxu1 %v3709_v29  ;;  %4789 = vmatprep.subr.mxu0 %v6195_v12  ;;  %v3701_v60 = vpop.permute.xlu1 %3700 }
 0xd24   : > { %4774 = vmatmul.mubr.msk.f32.gmra.mxu1 %vm442_vm0, %v6281_v32  ;;  %4806 = vmatprep.subr.mxu1 %v6489_v58 }
 0xd25   : > { %4776 = vmatprep.mubr.msk.f32.mxu1 %vm5043_vm1, %v6489_v58  ;;  %4807 = vmatpush3.msra.mxu1 %v3707_v41 }
 0xd26   : > { %4808 = vmatprep.subr.mxu1 %v6489_v58  ;;  %4790 = vmatpush3.msra.mxu0 %v6195_v12 }
 0xd27   : > { %4809 = vmatpush3.msra.mxu1 %v3705_v54  ;;  %4791 = vmatprep.subr.mxu0 %v6227_v62 }
 0xd28   : > { %4777 = vmatmul.mubr.msk.f32.gmra.mxu1 %vm442_vm0, %v6292_v21  ;;  %4810 = vmatprep.subr.mxu1 %v6489_v58 }
 0xd29   : > { %4811 = vmatpush3.msra.mxu1 %v3703_v46  ;;  %4792 = vmatpush3.msra.mxu0 %v6227_v62 }
 0xd2a   : > { %4812 = vmatprep.subr.mxu1 %v6489_v58  ;;  %4814 = vmatprep.mubr.msk.f32.mxu1 %vm5043_vm1, %v6489_v58 }
 0xd2b   : > { %4813 = vmatpush3.msra.mxu1 %v3701_v60  ;;  %4793 = vmatprep.subr.mxu0 %v6202_v44 }
 0xd2c   : > { %4794 = vmatpush3.msra.mxu0 %v6202_v44 }
 0xdd7   : > { %v4755_v31 = vpop.f32.mrf.mxu0 }
 0xdd8   : > { %v3555_v12 = vpop.f32.mrf.mxu1  ;;  %v3457_v55 = vmax.f32 %v4755_v31, 0.0 }
 0xdd9   : > { %v3447_v27 = vpop.f32.mrf.mxu0  ;;  %v3579_v48 = vmax.f32 %v3555_v12, 0.0 }
 0xdda   : > { %v3456_v47 = vmax.f32 %v3447_v27, 0.0  ;;  %v4766_v18 = vpop.f32.mrf.mxu1  ;;  %v5032_v27 = vld [vmem:[%s5418_s18] sm:$0xff] }
 0xddb   : > { %4815 = vmatmul.mubr.msk.f32.vlgmr.msra.gmra.mxu1 %vm3584_vm6, %v3579_v48 }
 0xddc   : > { %4795 = vmatprep.mubr.msk.f32.mxu0 %vm3584_vm6, %v3456_v47  ;;  %v3560_v62 = vpop.f32.mrf.mxu1  ;;  %4817 = vmatprep.mubr.msk.f32.mxu1 %vm5043_vm1, %v6489_v58 }
 0xddd   : > { %4796 = vmatmul.mubr.msk.f32.vlgmr.msra.gmra.mxu0 %vm3584_vm6, %v3457_v55  ;;  %v3580_v17 = vmax.f32 %v3560_v62, 0.0 }
 0xdde   : > { %v4769_v44 = vpop.f32.mrf.mxu1 }
 0xddf   : > { %4818 = vmatmul.mubr.msk.f32.gmra.mxu1 %vm3584_vm6, %v3580_v17 }
 0xde0   : > { %v3565_v19 = vpop.f32.mrf.mxu1  ;;  %4820 = vmatprep.mubr.msk.f32.mxu1 %vm5043_vm1, %v6489_v58 }
 0xde1   : > { %v3581_v37 = vmax.f32 %v3565_v19, 0.0 }
 0xde2   : > { %v4772_v51 = vpop.f32.mrf.mxu1 }
 0xde3   : > { %4821 = vmatmul.mubr.msk.f32.gmra.mxu1 %vm3584_vm6, %v3581_v37 }
 0xde4   : > { %v3570_v15 = vpop.f32.mrf.mxu1  ;;  %4823 = vmatprep.mubr.msk.f32.mxu1 %vm5043_vm1, %v6489_v58 }
 0xde5   : > { %v3582_v39 = vmax.f32 %v3570_v15, 0.0 }
 0xde6   : > { %v4775_v59 = vpop.f32.mrf.mxu1 }
 0xde7   : > { %4824 = vmatmul.mubr.msk.f32.gmra.mxu1 %vm3584_vm6, %v3582_v39 }
 0xde8   : > { %v3575_v53 = vpop.f32.mrf.mxu1  ;;  %4826 = vmatprep.mubr.msk.f32.mxu1 %vm5043_vm1, %v6489_v58  ;;  %vm4001_vm1 = vcmask 556032  }
 0xde9   : > { %v3583_v8 = vmax.f32 %v3575_v53, 0.0 }
 0xdea   : > { %v4778_v35 = vpop.f32.mrf.mxu1 }
 0xdeb   : > { %4827 = vmatmul.mubr.msk.f32.gmra.mxu1 %vm3584_vm6, %v3583_v8 }
 0xe9b   : > { %v3805_v57 = vpop.f32.mrf.mxu1 }
 0xe9c   : > { %v3806_v58 = vadd.f32 %v3805_v57, %v6248_v20 }
 0xe9d   : > { %v4797_v4 = vpop.f32.mrf.mxu0  ;;  %v4816_v56 = vpop.f32.mrf.mxu1 }
 0xe9e   : > { %v6323_v36 = vadd.f32 %v4797_v4, %v6242_v26 }
 0xe9f   : > { %v3657_v14 = vpop.f32.mrf.mxu0  ;;  %v3810_v49 = vpop.f32.mrf.mxu1 }
 0xea0   : > { %v3658_v52 = vadd.f32 %v3657_v14, %v6239_v5  ;;  %v3669_v43 = vsel %vm3026_vm9, %v6323_v36, 0.0  ;;  %v6332_v26 = vadd.f32 %v3810_v49, %v6260_v6  ;;  %v3829_v5 = vsel %vm442_vm0, %v3806_v58, 0.0 }
 0xea1   : > { %3670 = vadd.xlane.f32.xlu1 %v3669_v43  ;;  %v4819_v3 = vpop.f32.mrf.mxu1 }
 0xea2   : > { %v3666_v16 = vsel %vm442_vm0, %v3658_v52, 0.0  ;;  %v3832_v41 = vsel %vm442_vm0, %v6332_v26, 0.0 }
 0xea3   : > { %3667 = vadd.xlane.f32.xlu0 %v3666_v16  ;;  %v3815_v50 = vpop.f32.mrf.mxu1 }
 0xea4   : > { %v3816_v30 = vadd.f32 %v3815_v50, %v6270_v9 }
 0xea5   : > { %v4822_v29 = vpop.f32.mrf.mxu1 }
 0xea6   : > { %v3835_v10 = vsel %vm442_vm0, %v3816_v30, 0.0 }
 0xea7   : > { %3830 = vadd.xlane.f32.xlu0 %v3829_v5  ;;  %v3820_v63 = vpop.f32.mrf.mxu1  ;;  %3836 = vadd.xlane.f32.xlu1 %v3835_v10 }
 0xea8   : > { %v6337_v20 = vadd.f32 %v3820_v63, %v6281_v32  ;;  %v3917_v32 = vpop.trf.xlu1 }
 0xea9   : > { %v4825_v1 = vpop.f32.mrf.mxu1 }
 0xeaa   : > { %v3838_v46 = vsel %vm442_vm0, %v6337_v20, 0.0 }
 0xeab   : > { %3833 = vadd.xlane.f32.xlu0 %v3832_v41  ;;  %v3825_v9 = vpop.f32.mrf.mxu1 }
 0xeac   : > { %v3826_v6 = vadd.f32 %v3825_v9, %v6292_v21  ;;  %v3918_v21 = vpop.trf.xlu1 }
 0xead   : > { %v4828_v54 = vpop.f32.mrf.mxu1 }
 0xeae   : > { %v3841_v60 = vsel %vm3260_vm2, %v3826_v6, 0.0 }
 0xeaf   : > { %3839 = vadd.xlane.f32.xlu0 %v3838_v46  ;;  %3842 = vadd.xlane.f32.xlu1 %v3841_v60 }
 0xeb0   : > { %v1240_v31 = vpop.permute.xlu1 %1239 }
 0xeb1   : > { %v1244_v12 = vadd.f32 %v5423_v38, %v1240_v31 }
 0xeb3   : > { %v2437_v48 = vadd.f32 %v5760_v61, %v1244_v12 }
 0xedc   : > { %3933 = vxpose.xlu0.b32.start [1/5] (short) (narrow) %v5972_v11, 16 }
 0xee0   : > { %3934 = vxpose.xlu0.b32.cont [2/5] (short) (narrow) %v5986_v24, 16 }
 0xee4   : > { %3935 = vxpose.xlu0.b32.cont [3/5] (short) (narrow) %v6006_v2, 16 }
 0xee8   : > { %3936 = vxpose.xlu0.b32.cont [4/5] (short) (narrow) %v6022_v40, 16 }
 0xeec   : > { %3937 = vxpose.xlu0.b32.end [5/5] (short) (narrow) %v6036_v34, 16 }
 0xf15   : > { %1237 = vrot.lane.b32.xlu0 %v5032_v27, %s5054_s23 }
 0xf19   : > { %3971 = vrot.lane.b32.xlu0 %v2437_v48, %s5055_s27 }
 0xf1d   : > { %3985 = vrot.lane.b32.xlu0 %v3917_v32, %s5056_s24 }
 0xf2a   : > { %v3671_v2 = vpop.xlane.xlu1 %3670 }
 0xf2b   : > { %v3673_v50 = vmul.f32 0.03125, %v3671_v2 }
 0xf2c   : > { %v3668_v11 = vpop.xlane.xlu0 %3667 }
 0xf2d   : > { %v3672_v24 = vmul.f32 0.03125, %v3668_v11 }
 0xf2f   : > { %v6356_v34 = vsub.f32 %v3658_v52, %v3672_v24 }
 0xf30   : > { %v3831_v40 = vpop.xlane.xlu0 %3830  ;;  %v3837_v55 = vpop.xlane.xlu1 %3836 }
 0xf31   : > { %v3844_v47 = vmul.f32 0.03125, %v3831_v40  ;;  %v3846_v38 = vmul.f32 0.03125, %v3837_v55  ;;  %v3676_v61 = vmul.f32 %v6356_v34, %v6356_v34 }
 0xf33   : > { %v6358_v18 = vsub.f32 %v3806_v58, %v3844_v47  ;;  %v6362_v17 = vsub.f32 %v3816_v30, %v3846_v38  ;;  %v3678_v19 = vsel %vm442_vm0, %v3676_v61, 0.0  ;;  %v1246_v58 = vadd.f32 %v5441_v42, %v1240_v31 }
 0xf34   : > { %v3834_v35 = vpop.xlane.xlu0 %3833 }
 0xf35   : > { %v3854_v37 = vmul.f32 %v6358_v18, %v6358_v18  ;;  %v3856_v39 = vmul.f32 %v6362_v17, %v6362_v17  ;;  %v2439_v16 = vadd.f32 %v5801_v22, %v1246_v58 }
 0xf37   : > { %v3859_v15 = vsel %vm442_vm0, %v3854_v37, 0.0  ;;  %v3865_v59 = vsel %vm442_vm0, %v3856_v39, 0.0 }
 0xf38   : > { %v3843_v62 = vpop.xlane.xlu1 %3842  ;;  %v3840_v57 = vpop.xlane.xlu0 %3839 }
 0xf39   : > { %v3848_v44 = vmul.f32 0.03125, %v3843_v62  ;;  %v3847_v30 = vmul.f32 0.03125, %v3840_v57 }
 0xf3b   : > { %v6367_v51 = vsub.f32 %v3826_v6, %v3848_v44 }
 0xf3c   : > { %3679 = vadd.xlane.f32.xlu0 %v3678_v19 }
 0xf3d   : > { %v3858_v53 = vmul.f32 %v6367_v51, %v6367_v51 }
 0xf3f   : > { %v3871_v8 = vsel %vm3260_vm2, %v3858_v53, 0.0 }
 0xf40   : > { %3860 = vadd.xlane.f32.xlu0 %v3859_v15 }
 0xf44   : > { %3866 = vadd.xlane.f32.xlu0 %v3865_v59 }
 0xf48   : > { %3872 = vadd.xlane.f32.xlu0 %v3871_v8 }
 0xf58   : > { %v3949_v4 = vpop.trf.xlu0 }
 0xf5c   : > { %v3950_v56 = vpop.trf.xlu0 }
 0xf5e   : > { %3989 = vrot.lane.b32.xlu0 %v3949_v4, %s5056_s24 }
 0xf87   : > { %v1238_v14 = vpop.permute.xlu0 %1237 }
 0xf88   : > { %v1243_v52 = vadd.f32 %v1238_v14, %v5432_v45  ;;  %v1245_v49 = vadd.f32 %v1238_v14, %v5448_v0  ;;  %v6388_v45 = vsub.f32 %v6323_v36, %v3673_v50  ;;  %v3845_v0 = vmul.f32 0.03125, %v3834_v35 }
 0xf8a   : > { %v2436_v43 = vadd.f32 %v5771_v23, %v1243_v52  ;;  %v2438_v3 = vadd.f32 %v5780_v28, %v1245_v49  ;;  %v6391_v23 = vsub.f32 %v6332_v26, %v3845_v0  ;;  %v3677_v42 = vmul.f32 %v6388_v45, %v6388_v45 }
 0xf8b   : > { %v6396_v28 = vsub.f32 %v6337_v20, %v3847_v30  ;;  %v3972_v22 = vpop.permute.xlu0 %3971 }
 0xf8c   : > { %3969 = vrot.lane.b32.xlu1 %v2436_v43, %s5055_s27  ;;  %v3681_v29 = vsel %vm3026_vm9, %v3677_v42, 0.0  ;;  %v3855_v5 = vmul.f32 %v6391_v23, %v6391_v23  ;;  %v3998_v37 = vsel %vm1476_vm14, %v5930_v13, %v3972_v22 }
 0xf8d   : > { %v3857_v26 = vmul.f32 %v6396_v28, %v6396_v28 }
 0xf8e   : > { %v3862_v36 = vsel %vm442_vm0, %v3855_v5, 0.0 }
 0xf8f   : > { %v3986_v10 = vpop.permute.xlu0 %3985  ;;  %v3868_v63 = vsel %vm442_vm0, %v3857_v26, 0.0 }
 0xf90   : > { %3973 = vrot.lane.b32.xlu1 %v2438_v3, %s5055_s27 }
 0xf94   : > { %3975 = vrot.lane.b32.xlu1 %v2439_v16, %s5055_s27 }
 0xf98   : > { %3987 = vrot.lane.b32.xlu1 %v3918_v21, %s5056_s24 }
 0xfbc   : > { %3682 = vadd.xlane.f32.xlu1 %v3681_v29 }
 0xfc0   : > { %3863 = vadd.xlane.f32.xlu1 %v3862_v36 }
 0xfc4   : > { %3869 = vadd.xlane.f32.xlu1 %v3868_v63 }
 0xfc5   : > { %v3680_v1 = vpop.xlane.xlu0 %3679 }
 0xfc6   : > { %v3684_v20 = vmul.f32 0.03125, %v3680_v1 }
 0xfc8   : > { %v3686_v41 = vadd.f32 1e-05, %v3684_v20 }
 0xfc9   : > { %v3861_v9 = vpop.xlane.xlu0 %3860 }
 0xfca   : > { %5010 = vrsqrt.f32 %v3686_v41  ;;  %v3874_v6 = vmul.f32 0.03125, %v3861_v9 }
 0xfcc   : > { %v3879_v54 = vadd.f32 1e-05, %v3874_v6 }
 0xfcd   : > { %v3867_v46 = vpop.xlane.xlu0 %3866 }
 0xfce   : > { %5012 = vrsqrt.f32 %v3879_v54  ;;  %v3876_v60 = vmul.f32 0.03125, %v3867_v46 }
 0xfd0   : > { %v3881_v32 = vadd.f32 1e-05, %v3876_v60 }
 0xfd1   : > { %v3873_v21 = vpop.xlane.xlu0 %3872 }
 0xfd2   : > { %5014 = vrsqrt.f32 %v3881_v32  ;;  %v3878_v31 = vmul.f32 0.03125, %v3873_v21 }
 0xfd4   : > { %v3883_v12 = vadd.f32 1e-05, %v3878_v31 }
 0xfd5   : > { %3991 = vrot.lane.b32.xlu1 %v3950_v56, %s5056_s24  ;;  %v3990_v62 = vpop.permute.xlu0 %3989 }
 0xfd6   : > { %5016 = vrsqrt.f32 %v3883_v12 }
 0xfd7   : > { %v5011_v27 = vpop.eup %5010 }
 0xfd8   : > { %v3690_v48 = vmul.f32 %v5011_v27, %v6356_v34 }
 0xfda   : > { %3894 = vst.msk [vmem:[%s6410_s29] sm:$0xff] %vm442_vm0, %v3690_v48 }
 0xfdb   : > { %v5013_v11 = vpop.eup %5012 }
 0xfdc   : > { %v3889_v24 = vmul.f32 %v5013_v11, %v6358_v18 }
 0xfde   : > { %3896 = vst.msk [vmem:[%s6420_s11] sm:$0xff] %vm442_vm0, %v3889_v24 }
 0xfdf   : > { %v5015_v2 = vpop.eup %5014 }
 0xfe0   : > { %v3891_v40 = vmul.f32 %v5015_v2, %v6362_v17 }
 0xfe2   : > { %3898 = vst.msk [vmem:[%s6420_s11 + $0x10] sm:$0xff] %vm442_vm0, %v3891_v40 }
 0xfe3   : > { %v5017_v34 = vpop.eup %5016 }
 0xfe4   : > { %v3893_v47 = vmul.f32 %v5017_v34, %v6367_v51 }
 0xfe6   : > { %3900 = vst.msk [vmem:[%s6420_s11 + $0x20] sm:$0x3] %vm3260_vm2, %v3893_v47 }
 0xffe   : > { %v3970_v55 = vpop.permute.xlu1 %3969 }
 0xfff   : > { %v3997_v38 = vsel %vm1476_vm14, %v5927_v7, %v3970_v55 }
0x1000   : > { %v4002_v18 = vsel %vm4001_vm1, %v3997_v38, %v3986_v10 }
0x1001   : > { %4007 = vst.msk [vmem:[%s6435_s16] sm:$0xff] %vm4006_vm7, %v4002_v18 }
0x1002   : > { %v3974_v61 = vpop.permute.xlu1 %3973 }
0x1003   : > { %v3999_v17 = vsel %vm1476_vm14, %v5941_v25, %v3974_v61 }
0x1004   : > { %v4004_v44 = vsel %vm4001_vm1, %v3999_v17, %v3990_v62 }
0x1005   : > { %4010 = vst.msk [vmem:[%s6435_s16 + $0x10] sm:$0xff] %vm4006_vm7, %v4004_v44 }
0x1006   : > { %v3976_v19 = vpop.permute.xlu1 %3975 }
0x1007   : > { %v4000_v4 = vsel %vm1476_vm14, %v5944_v33, %v3976_v19 }
0x100a   : > { %v3988_v51 = vpop.permute.xlu1 %3987 }
0x100b   : > { %v4003_v15 = vsel %vm4001_vm1, %v3998_v37, %v3988_v51 }
0x100c   : > { %4009 = vst.msk [vmem:[%s6435_s16 + $0x8] sm:$0x7f] %vm4008_vm8, %v4003_v15 }
0x1045   : > { %v3683_v7 = vpop.xlane.xlu1 %3682 }
0x1046   : > { %v3685_v39 = vmul.f32 0.03125, %v3683_v7 }
0x1048   : > { %v3687_v59 = vadd.f32 1e-05, %v3685_v39 }
0x1049   : > { %v3864_v53 = vpop.xlane.xlu1 %3863 }
0x104a   : > { %5018 = vrsqrt.f32 %v3687_v59  ;;  %v3875_v25 = vmul.f32 0.03125, %v3864_v53 }
0x104c   : > { %v3880_v8 = vadd.f32 1e-05, %v3875_v25 }
0x104d   : > { %v3870_v35 = vpop.xlane.xlu1 %3869 }
0x104e   : > { %5020 = vrsqrt.f32 %v3880_v8  ;;  %v3877_v57 = vmul.f32 0.03125, %v3870_v35 }
0x1050   : > { %v3882_v13 = vadd.f32 1e-05, %v3877_v57 }
0x1051   : > { %v3992_v56 = vpop.permute.xlu1 %3991 }
0x1052   : > { %5022 = vrsqrt.f32 %v3882_v13  ;;  %v4005_v14 = vsel %vm4001_vm1, %v4000_v4, %v3992_v56 }
0x1053   : > { %4011 = vst.msk [vmem:[%s6435_s16 + $0x18] sm:$0x7f] %vm4008_vm8, %v4005_v14 }
0x1057   : > { %v5019_v52 = vpop.eup %5018 }
0x1058   : > { %v3691_v49 = vmul.f32 %v5019_v52, %v6388_v45 }
0x105a   : > { %3895 = vst.msk [vmem:[%s6410_s29 + $0x8] sm:$0x7f] %vm3026_vm9, %v3691_v49 }
0x105b   : > { %v5021_v43 = vpop.eup %5020 }
0x105c   : > { %v3890_v58 = vmul.f32 %v5021_v43, %v6391_v23 }
0x105e   : > { %3897 = vst.msk [vmem:[%s6420_s11 + $0x8] sm:$0xff] %vm442_vm0, %v3890_v58 }
0x105f   : > { %v5023_v3 = vpop.eup %5022 }
0x1060   : > { %v3892_v16 = vmul.f32 %v5023_v3, %v6396_v28 }
0x1062   : > { %3899 = vst.msk [vmem:[%s6420_s11 + $0x18] sm:$0xff] %vm442_vm0, %v3892_v16 }
0x1063 PF: > { %s21_s13 = sadd.s32 1, %s5039_s13  }
0x1064   : > { %p18_p4 = scmp.ge.s32.totalorder %s21_s13, 4  }
0x1066   :  { %20 = sbr.rel (!%p18_p4) target bundleno = 1 (0x1), region = 112 }

</bundles_post_ra>
